<compile_context>
chip_gen: v6e
topology: v6e:2x2x1
jax: 0.10.0
libtpu: 0.0.40
codegen_flags: <defaults>
</compile_context>

<pallas_src>
import jax
import jax.numpy as jnp
from jax.experimental import pallas as pl
from jax.experimental.pallas import tpu as pltpu

ANCHOR_SIZES = [16, 19]
C1 = 16       # NetConv conv1 out-channels
C2 = 256      # NetConv conv2 out-channels
N_CLS = 10
N_BOX = 4
HEAD_N = 128  # lane-dense padded head width: cols [0,10) = cls, [10,14) = box


# --------------------------------------------------------------------------- #
# In-kernel helpers                                                            #
# --------------------------------------------------------------------------- #
def _im2col_3x3(xp, H, W):
    """xp: (H+2, W+2, C) zero-padded features -> (H*W, 9*C) patch matrix.

    Column order is (tap, cin) with tap = dy*3 + dx, matching weights stored as
    (9, Cin, Cout).reshape(9*Cin, Cout).
    """
    C = xp.shape[-1]
    cols = [xp[dy:dy + H, dx:dx + W, :] for dy in range(3) for dx in range(3)]
    return jnp.concatenate(cols, axis=-1).reshape(H * W, 9 * C)


def _pool2x2(y, H, W, C):
    """y: (H*W, C) -> (H//2, W//2, C), 2x2 max pool with stride 2 (floor mode)."""
    y = y.reshape(H // 2, 2, W, C)
    y = jnp.max(y, axis=1)
    y = y.reshape(H // 2, W // 2, 2, C)
    y = jnp.max(y, axis=2)
    return y


# --------------------------------------------------------------------------- #
# Fused per-image kernel: conv1 -> pool -> conv2 -> pool -> fused heads        #
# --------------------------------------------------------------------------- #
def _fused_forward_kernel(x_ref, w1_ref, b1_ref, w2_ref, b2_ref,
                          wh_ref, bh_ref, out_ref, pad_ref):
    # x_ref  : (1, H+2, W+2, 1)  f32   zero-padded single-channel image
    # w1_ref : (9, C1)           bf16  conv1 taps (tap-major)
    # b1_ref : (1, C1)           f32
    # w2_ref : (9*C1, C2)        bf16  conv2 im2col weights (row = tap*C1 + cin)
    # b2_ref : (1, C2)           f32
    # wh_ref : (C2, HEAD_N)      bf16  fused heads ([:, :10]=cls, [:, 10:14]=box)
    # bh_ref : (1, HEAD_N)       f32
    # out_ref: (1, H/4*W/4, HEAD_N) f32
    # pad_ref: (H/2+2, W/2+2, C1) f32  VMEM scratch: zero-padded conv2 input
    Hp, Wp = x_ref.shape[1], x_ref.shape[2]
    H, W = Hp - 2, Wp - 2
    H1, W1 = H // 2, W // 2
    H2, W2 = H1 // 2, W1 // 2

    # ---- layer 1: 3x3 conv (Cin=1) as one im2col matmul, bias + ReLU + pool ----
    p1 = _im2col_3x3(x_ref[0], H, W)                              # (H*W, 9)
    h1 = jnp.dot(p1.astype(jnp.bfloat16), w1_ref[...],
                 preferred_element_type=jnp.float32)              # (H*W, C1)
    h1 = jnp.maximum(h1 + b1_ref[...], 0.0)
    f1 = _pool2x2(h1, H, W, C1)                                   # (H1, W1, C1)

    # ---- conv2 input zero-padded in VMEM scratch (no HBM round trip) -----------
    pad_ref[...] = jnp.zeros_like(pad_ref)
    pad_ref[1:H1 + 1, 1:W1 + 1, :] = f1

    # ---- layer 2: 3x3 conv (Cin=16) as one K=144 im2col matmul -----------------
    p2 = _im2col_3x3(pad_ref[...], H1, W1)                        # (H1*W1, 9*C1)
    h2 = jnp.dot(p2.astype(jnp.bfloat16), w2_ref[...],
                 preferred_element_type=jnp.float32)              # (H1*W1, C2)
    h2 = jnp.maximum(h2 + b2_ref[...], 0.0)
    f2 = _pool2x2(h2, H1, W1, C2).reshape(H2 * W2, C2)            # (H2*W2, C2)

    # ---- fused heads: single matmul, lane-dense (M, 128) output ----------------
    out = jnp.dot(f2.astype(jnp.bfloat16), wh_ref[...],
                  preferred_element_type=jnp.float32) + bh_ref[...]
    out_ref[0] = out.astype(out_ref.dtype)


def _fused_forward(params, x_nchw):
    """Returns (classification_output (B*H/4*W/4, 10), box_regression (B*H/4*W/4, 4))."""
    x = jnp.transpose(x_nchw, (0, 2, 3, 1)).astype(jnp.float32)   # NCHW -> NHWC (C=1)
    B, H, W, _ = x.shape
    assert H % 4 == 0 and W % 4 == 0, "spatial dims must be multiples of 4"
    H1, W1 = H // 2, W // 2
    H2, W2 = H1 // 2, W1 // 2
    M = H2 * W2

    x_pad = jnp.pad(x, ((0, 0), (1, 1), (1, 1), (0, 0)))          # conv1 padding=1

    # Weight prep (layout plumbing only): flatten im2col weights, fuse + pad heads.
    w1 = params["w1"].reshape(9 * 1, C1).astype(jnp.bfloat16)
    w2 = params["w2"].reshape(9 * C1, C2).astype(jnp.bfloat16)
    wh = (jnp.zeros((C2, HEAD_N), jnp.float32)
          .at[:, :N_CLS].set(params["wc"])
          .at[:, N_CLS:N_CLS + N_BOX].set(params["wb"])
          .astype(jnp.bfloat16))
    bh = (jnp.zeros((1, HEAD_N), jnp.float32)
          .at[:, :N_CLS].set(params["bc"])
          .at[:, N_CLS:N_CLS + N_BOX].set(params["bb"]))

    out = pl.pallas_call(
        _fused_forward_kernel,
        out_shape=jax.ShapeDtypeStruct((B, M, HEAD_N), jnp.float32),
        grid=(B,),
        in_specs=[
            pl.BlockSpec((1, H + 2, W + 2, 1), lambda b: (b, 0, 0, 0)),
            pl.BlockSpec((9, C1), lambda b: (0, 0)),
            pl.BlockSpec((1, C1), lambda b: (0, 0)),
            pl.BlockSpec((9 * C1, C2), lambda b: (0, 0)),
            pl.BlockSpec((1, C2), lambda b: (0, 0)),
            pl.BlockSpec((C2, HEAD_N), lambda b: (0, 0)),
            pl.BlockSpec((1, HEAD_N), lambda b: (0, 0)),
        ],
        out_specs=pl.BlockSpec((1, M, HEAD_N), lambda b: (b, 0, 0)),
        scratch_shapes=[pltpu.VMEM((H1 + 2, W1 + 2, C1), jnp.float32)],
        compiler_params=pltpu.CompilerParams(
            dimension_semantics=("parallel",)),
    )(x_pad, w1, params["b1"], w2, params["b2"], wh, bh)

    out = out.reshape(B * M, HEAD_N)
    return out[:, :N_CLS], out[:, N_CLS:N_CLS + N_BOX]


_fused_forward_jit = jax.jit(_fused_forward)


# --------------------------------------------------------------------------- #
# Model glue                                                                   #
# --------------------------------------------------------------------------- #
class DigitDetectionModelOutput:
    def __init__(self, anchors, classification_output, box_regression_output):
        self.anchors = anchors
        self.classification_output = classification_output
        self.box_regression_output = box_regression_output


def make_anchors():
    # MnistBox is not defined in the spec; anchors are plain (x1, y1, x2, y2) tuples.
    anchors = []
    for n in range(0, 128 // 4):
        for m in range(0, 128 // 4):
            anchors.append((m * 4 - ANCHOR_SIZES[0] / 2,
                            n * 4 - ANCHOR_SIZES[1] / 2,
                            m * 4 + ANCHOR_SIZES[1] / 2,
                            n * 4 + ANCHOR_SIZES[0] / 2))
    return anchors


def init_params(key):
    # Deterministic synthetic init (PyTorch-style uniform(-1/sqrt(fan_in), +...)).
    ks = jax.random.split(key, 8)

    def u(k, shape, fan_in):
        bound = 1.0 / jnp.sqrt(float(fan_in))
        return jax.random.uniform(k, shape, jnp.float32, -bound, bound)

    return {
        "w1": u(ks[0], (9, 1, C1), 1 * 9),      # Conv2d(1, 16, 3, padding=1)
        "b1": u(ks[1], (1, C1), 1 * 9),
        "w2": u(ks[2], (9, C1, C2), C1 * 9),    # Conv2d(16, 256, 3, padding=1)
        "b2": u(ks[3], (1, C2), C1 * 9),
        "wc": u(ks[4], (C2, N_CLS), C2),        # ClassificationHead 1x1 conv
        "bc": u(ks[5], (1, N_CLS), C2),
        "wb": u(ks[6], (C2, N_BOX), C2),        # BoxRegressionHead 1x1 conv
        "bb": u(ks[7], (1, N_BOX), C2),
    }


def digit_detection_forward(params, x_nchw):
    cls, box = _fused_forward_jit(params, x_nchw)
    return DigitDetectionModelOutput(make_anchors(), cls, box)


# --------------------------------------------------------------------------- #
# Pure-JAX reference for correctness checking                                  #
# --------------------------------------------------------------------------- #
def _ref_forward(params, x_nchw):
    x = jnp.transpose(x_nchw, (0, 2, 3, 1))

    def conv_relu(x, w, b):
        w4 = w.reshape(3, 3, w.shape[1], w.shape[2])            # HWIO
        y = jax.lax.conv_general_dilated(
            x, w4, (1, 1), "SAME",
            dimension_numbers=("NHWC", "HWIO", "NHWC"))
        return jnp.maximum(y + b.reshape(1, 1, 1, -1), 0.0)

    def pool(x):
        B, H, W, C = x.shape
        return jnp.max(x.reshape(B, H // 2, 2, W // 2, 2, C), axis=(2, 4))

    h = pool(conv_relu(x, params["w1"], params["b1"]))
    h = pool(conv_relu(h, params["w2"], params["b2"]))
    f = h.reshape(-1, C2)
    return f @ params["wc"] + params["bc"], f @ params["wb"] + params["bb"]


if __name__ == "__main__":
    key = jax.random.PRNGKey(0)
    pkey, xkey = jax.random.split(key)
    params = init_params(pkey)

    # Small input consistent with the module: NCHW, 1 input channel.
    x = jax.random.normal(xkey, (2, 1, 16, 16), jnp.float32)

    out = digit_detection_forward(params, x)
    jax.block_until_ready((out.classification_output, out.box_regression_output))

    # Shape semantics: (B * H/4 * W/4, 10) and (B * H/4 * W/4, 4)
    assert out.classification_output.shape == (2 * 4 * 4, 10)
    assert out.box_regression_output.shape == (2 * 4 * 4, 4)
    assert len(out.anchors) == (128 // 4) * (128 // 4)

    ref_cls, ref_box = _ref_forward(params, x)
    assert jnp.allclose(out.classification_output, ref_cls, atol=3e-2, rtol=3e-2)
    assert jnp.allclose(out.box_regression_output, ref_box, atol=3e-2, rtol=3e-2)

    print("KERNEL_OK")
</pallas_src>

<mosaic_0001>
module attributes {stable_mosaic.version = 11 : i64} {
  func.func @_fused_forward_kernel(%arg0: i32, %arg1: memref<1x18x18x1xf32, #tpu.memory_space<vmem>>, %arg2: memref<9x16xbf16, #tpu.memory_space<vmem>>, %arg3: memref<1x16xf32, #tpu.memory_space<vmem>>, %arg4: memref<144x256xbf16, #tpu.memory_space<vmem>>, %arg5: memref<1x256xf32, #tpu.memory_space<vmem>>, %arg6: memref<256x128xbf16, #tpu.memory_space<vmem>>, %arg7: memref<1x128xf32, #tpu.memory_space<vmem>>, %arg8: memref<1x16x128xf32, #tpu.memory_space<vmem>>, %arg9: memref<10x10x16xf32, #tpu.memory_space<vmem>>) attributes {dimension_semantics = [#tpu.dimension_semantics<parallel>], iteration_bounds = array<i64: 2>, scalar_prefetch = 0 : i64, scratch_operands = 1 : i64, tpu.core_type = #tpu.core_type<tc>, window_params = [{transform_indices = @transform_0, window_bounds = array<i64: 1, 18, 18, 1>}, {pipeline_mode = #tpu.pipeline_mode<synchronous>, transform_indices = @transform_1, window_bounds = array<i64: 9, 16>}, {pipeline_mode = #tpu.pipeline_mode<synchronous>, transform_indices = @transform_2, window_bounds = array<i64: 1, 16>}, {pipeline_mode = #tpu.pipeline_mode<synchronous>, transform_indices = @transform_3, window_bounds = array<i64: 144, 256>}, {pipeline_mode = #tpu.pipeline_mode<synchronous>, transform_indices = @transform_4, window_bounds = array<i64: 1, 256>}, {pipeline_mode = #tpu.pipeline_mode<synchronous>, transform_indices = @transform_5, window_bounds = array<i64: 256, 128>}, {pipeline_mode = #tpu.pipeline_mode<synchronous>, transform_indices = @transform_6, window_bounds = array<i64: 1, 128>}, {transform_indices = @transform_7, window_bounds = array<i64: 1, 16, 128>}]} {
    %c0 = arith.constant 0 : index
    %c0_0 = arith.constant 0 : index
    %c0_1 = arith.constant 0 : index
    %c0_2 = arith.constant 0 : index
    %0 = vector.load %arg1[%c0, %c0_0, %c0_1, %c0_2] : memref<1x18x18x1xf32, #tpu.memory_space<vmem>>, vector<1x18x18x1xf32>
    %1 = vector.shape_cast %0 : vector<1x18x18x1xf32> to vector<18x18x1xf32>
    %2 = vector.extract_strided_slice %1 {offsets = [0, 0, 0], sizes = [16, 16, 1], strides = [1, 1, 1]} : vector<18x18x1xf32> to vector<16x16x1xf32>
    %3 = vector.extract_strided_slice %1 {offsets = [0, 1, 0], sizes = [16, 16, 1], strides = [1, 1, 1]} : vector<18x18x1xf32> to vector<16x16x1xf32>
    %4 = vector.extract_strided_slice %1 {offsets = [0, 2, 0], sizes = [16, 16, 1], strides = [1, 1, 1]} : vector<18x18x1xf32> to vector<16x16x1xf32>
    %5 = vector.extract_strided_slice %1 {offsets = [1, 0, 0], sizes = [16, 16, 1], strides = [1, 1, 1]} : vector<18x18x1xf32> to vector<16x16x1xf32>
    %6 = vector.extract_strided_slice %1 {offsets = [1, 1, 0], sizes = [16, 16, 1], strides = [1, 1, 1]} : vector<18x18x1xf32> to vector<16x16x1xf32>
    %7 = vector.extract_strided_slice %1 {offsets = [1, 2, 0], sizes = [16, 16, 1], strides = [1, 1, 1]} : vector<18x18x1xf32> to vector<16x16x1xf32>
    %8 = vector.extract_strided_slice %1 {offsets = [2, 0, 0], sizes = [16, 16, 1], strides = [1, 1, 1]} : vector<18x18x1xf32> to vector<16x16x1xf32>
    %9 = vector.extract_strided_slice %1 {offsets = [2, 1, 0], sizes = [16, 16, 1], strides = [1, 1, 1]} : vector<18x18x1xf32> to vector<16x16x1xf32>
    %10 = vector.extract_strided_slice %1 {offsets = [2, 2, 0], sizes = [16, 16, 1], strides = [1, 1, 1]} : vector<18x18x1xf32> to vector<16x16x1xf32>
    %11 = tpu.concatenate %2, %3, %4, %5, %6, %7, %8, %9, %10 in 2 : vector<16x16x1xf32>, vector<16x16x1xf32>, vector<16x16x1xf32>, vector<16x16x1xf32>, vector<16x16x1xf32>, vector<16x16x1xf32>, vector<16x16x1xf32>, vector<16x16x1xf32>, vector<16x16x1xf32> -> vector<16x16x9xf32>
    %12 = vector.shape_cast %11 : vector<16x16x9xf32> to vector<256x9xf32>
    %13 = arith.truncf %12 : vector<256x9xf32> to vector<256x9xbf16>
    %c0_3 = arith.constant 0 : index
    %c0_4 = arith.constant 0 : index
    %14 = vector.load %arg2[%c0_3, %c0_4] : memref<9x16xbf16, #tpu.memory_space<vmem>>, vector<9x16xbf16>
    %cst = arith.constant dense<0.000000e+00> : vector<256x16xf32>
    %15 = tpu.matmul %13, %14, %cst {dimension_numbers = #tpu.dot_dimension_numbers<[1], [0], [0], [1], [0, 0, 1, 1], [], []>} : vector<256x9xbf16>, vector<9x16xbf16>, vector<256x16xf32> -> vector<256x16xf32>
    %c0_5 = arith.constant 0 : index
    %c0_6 = arith.constant 0 : index
    %16 = vector.load %arg3[%c0_5, %c0_6] : memref<1x16xf32, #tpu.memory_space<vmem>>, vector<1x16xf32>
    %17 = vector.broadcast %16 : vector<1x16xf32> to vector<256x16xf32>
    %18 = arith.addf %15, %17 : vector<256x16xf32>
    %cst_7 = arith.constant 0.000000e+00 : f32
    %19 = vector.broadcast %cst_7 : f32 to vector<256x16xf32>
    %20 = arith.maximumf %18, %19 : vector<256x16xf32>
    %21 = vector.shape_cast %20 : vector<256x16xf32> to vector<8x2x16x16xf32>
    %cst_8 = arith.constant dense<0xFF800000> : vector<8x16x16xf32>
    %22 = vector.multi_reduction <maximumf>, %21, %cst_8 [1] : vector<8x2x16x16xf32> to vector<8x16x16xf32>
    %23 = vector.shape_cast %22 : vector<8x16x16xf32> to vector<8x8x2x16xf32>
    %cst_9 = arith.constant dense<0xFF800000> : vector<8x8x16xf32>
    %24 = vector.multi_reduction <maximumf>, %23, %cst_9 [2] : vector<8x8x2x16xf32> to vector<8x8x16xf32>
    %cst_10 = arith.constant 0.000000e+00 : f32
    %25 = vector.broadcast %cst_10 : f32 to vector<10x10x16xf32>
    %c0_11 = arith.constant 0 : index
    %c0_12 = arith.constant 0 : index
    %c0_13 = arith.constant 0 : index
    %26 = vector.load %arg9[%c0_11, %c0_12, %c0_13] : memref<10x10x16xf32, #tpu.memory_space<vmem>>, vector<10x10x16xf32>
    tpu.vector_store %arg9[%c0_11, %c0_12, %c0_13], %25 {strides = array<i32>} : memref<10x10x16xf32, #tpu.memory_space<vmem>>, vector<10x10x16xf32>,
    %c1 = arith.constant 1 : index
    %c1_14 = arith.constant 1 : index
    %c0_15 = arith.constant 0 : index
    %27 = vector.load %arg9[%c1, %c1_14, %c0_15] : memref<10x10x16xf32, #tpu.memory_space<vmem>>, vector<8x8x16xf32>
    tpu.vector_store %arg9[%c1, %c1_14, %c0_15], %24 {strides = array<i32>} : memref<10x10x16xf32, #tpu.memory_space<vmem>>, vector<8x8x16xf32>,
    %c0_16 = arith.constant 0 : index
    %c0_17 = arith.constant 0 : index
    %c0_18 = arith.constant 0 : index
    %28 = vector.load %arg9[%c0_16, %c0_17, %c0_18] : memref<10x10x16xf32, #tpu.memory_space<vmem>>, vector<10x10x16xf32>
    %29 = vector.extract_strided_slice %28 {offsets = [0, 0, 0], sizes = [8, 8, 16], strides = [1, 1, 1]} : vector<10x10x16xf32> to vector<8x8x16xf32>
    %30 = vector.extract_strided_slice %28 {offsets = [0, 1, 0], sizes = [8, 8, 16], strides = [1, 1, 1]} : vector<10x10x16xf32> to vector<8x8x16xf32>
    %31 = vector.extract_strided_slice %28 {offsets = [0, 2, 0], sizes = [8, 8, 16], strides = [1, 1, 1]} : vector<10x10x16xf32> to vector<8x8x16xf32>
    %32 = vector.extract_strided_slice %28 {offsets = [1, 0, 0], sizes = [8, 8, 16], strides = [1, 1, 1]} : vector<10x10x16xf32> to vector<8x8x16xf32>
    %33 = vector.extract_strided_slice %28 {offsets = [1, 1, 0], sizes = [8, 8, 16], strides = [1, 1, 1]} : vector<10x10x16xf32> to vector<8x8x16xf32>
    %34 = vector.extract_strided_slice %28 {offsets = [1, 2, 0], sizes = [8, 8, 16], strides = [1, 1, 1]} : vector<10x10x16xf32> to vector<8x8x16xf32>
    %35 = vector.extract_strided_slice %28 {offsets = [2, 0, 0], sizes = [8, 8, 16], strides = [1, 1, 1]} : vector<10x10x16xf32> to vector<8x8x16xf32>
    %36 = vector.extract_strided_slice %28 {offsets = [2, 1, 0], sizes = [8, 8, 16], strides = [1, 1, 1]} : vector<10x10x16xf32> to vector<8x8x16xf32>
    %37 = vector.extract_strided_slice %28 {offsets = [2, 2, 0], sizes = [8, 8, 16], strides = [1, 1, 1]} : vector<10x10x16xf32> to vector<8x8x16xf32>
    %38 = tpu.concatenate %29, %30, %31, %32, %33, %34, %35, %36, %37 in 2 : vector<8x8x16xf32>, vector<8x8x16xf32>, vector<8x8x16xf32>, vector<8x8x16xf32>, vector<8x8x16xf32>, vector<8x8x16xf32>, vector<8x8x16xf32>, vector<8x8x16xf32>, vector<8x8x16xf32> -> vector<8x8x144xf32>
    %39 = vector.shape_cast %38 : vector<8x8x144xf32> to vector<64x144xf32>
    %40 = arith.truncf %39 : vector<64x144xf32> to vector<64x144xbf16>
    %c0_19 = arith.constant 0 : index
    %c0_20 = arith.constant 0 : index
    %41 = vector.load %arg4[%c0_19, %c0_20] : memref<144x256xbf16, #tpu.memory_space<vmem>>, vector<144x256xbf16>
    %cst_21 = arith.constant dense<0.000000e+00> : vector<64x256xf32>
    %42 = tpu.matmul %40, %41, %cst_21 {dimension_numbers = #tpu.dot_dimension_numbers<[1], [0], [0], [1], [0, 0, 1, 1], [], []>} : vector<64x144xbf16>, vector<144x256xbf16>, vector<64x256xf32> -> vector<64x256xf32>
    %c0_22 = arith.constant 0 : index
    %c0_23 = arith.constant 0 : index
    %43 = vector.load %arg5[%c0_22, %c0_23] : memref<1x256xf32, #tpu.memory_space<vmem>>, vector<1x256xf32>
    %44 = vector.broadcast %43 : vector<1x256xf32> to vector<64x256xf32>
    %45 = arith.addf %42, %44 : vector<64x256xf32>
    %cst_24 = arith.constant 0.000000e+00 : f32
    %46 = vector.broadcast %cst_24 : f32 to vector<64x256xf32>
    %47 = arith.maximumf %45, %46 : vector<64x256xf32>
    %48 = vector.shape_cast %47 : vector<64x256xf32> to vector<4x2x8x256xf32>
    %cst_25 = arith.constant dense<0xFF800000> : vector<4x8x256xf32>
    %49 = vector.multi_reduction <maximumf>, %48, %cst_25 [1] : vector<4x2x8x256xf32> to vector<4x8x256xf32>
    %50 = vector.shape_cast %49 : vector<4x8x256xf32> to vector<4x4x2x256xf32>
    %cst_26 = arith.constant dense<0xFF800000> : vector<4x4x256xf32>
    %51 = vector.multi_reduction <maximumf>, %50, %cst_26 [2] : vector<4x4x2x256xf32> to vector<4x4x256xf32>
    %52 = vector.shape_cast %51 : vector<4x4x256xf32> to vector<16x256xf32>
    %53 = arith.truncf %52 : vector<16x256xf32> to vector<16x256xbf16>
    %c0_27 = arith.constant 0 : index
    %c0_28 = arith.constant 0 : index
    %54 = vector.load %arg6[%c0_27, %c0_28] : memref<256x128xbf16, #tpu.memory_space<vmem>>, vector<256x128xbf16>
    %cst_29 = arith.constant dense<0.000000e+00> : vector<16x128xf32>
    %55 = tpu.matmul %53, %54, %cst_29 {dimension_numbers = #tpu.dot_dimension_numbers<[1], [0], [0], [1], [0, 0, 1, 1], [], []>} : vector<16x256xbf16>, vector<256x128xbf16>, vector<16x128xf32> -> vector<16x128xf32>
    %c0_30 = arith.constant 0 : index
    %c0_31 = arith.constant 0 : index
    %56 = vector.load %arg7[%c0_30, %c0_31] : memref<1x128xf32, #tpu.memory_space<vmem>>, vector<1x128xf32>
    %57 = vector.broadcast %56 : vector<1x128xf32> to vector<16x128xf32>
    %58 = arith.addf %55, %57 : vector<16x128xf32>
    %c0_32 = arith.constant 0 : index
    %c0_33 = arith.constant 0 : index
    %c0_34 = arith.constant 0 : index
    %59 = vector.load %arg8[%c0_32, %c0_33, %c0_34] : memref<1x16x128xf32, #tpu.memory_space<vmem>>, vector<1x16x128xf32>
    %60 = vector.shape_cast %59 : vector<1x16x128xf32> to vector<16x128xf32>
    %61 = vector.shape_cast %58 : vector<16x128xf32> to vector<1x16x128xf32>
    tpu.vector_store %arg8[%c0_32, %c0_33, %c0_34], %61 {strides = array<i32>} : memref<1x16x128xf32, #tpu.memory_space<vmem>>, vector<1x16x128xf32>,
    return
  }
  func.func @transform_0(%arg0: i32) -> (i32, i32, i32, i32) {
    %c0_i32 = arith.constant 0 : i32
    %c0_i32_0 = arith.constant 0 : i32
    %c0_i32_1 = arith.constant 0 : i32
    %c0_i32_2 = arith.constant 0 : i32
    return %arg0, %c0_i32, %c0_i32_0, %c0_i32_1 : i32, i32, i32, i32
  }
  func.func @transform_1(%arg0: i32) -> (i32, i32) {
    %c0_i32 = arith.constant 0 : i32
    %c0_i32_0 = arith.constant 0 : i32
    %c0_i32_1 = arith.constant 0 : i32
    return %c0_i32, %c0_i32_0 : i32, i32
  }
  func.func @transform_2(%arg0: i32) -> (i32, i32) {
    %c0_i32 = arith.constant 0 : i32
    %c0_i32_0 = arith.constant 0 : i32
    %c0_i32_1 = arith.constant 0 : i32
    return %c0_i32, %c0_i32_0 : i32, i32
  }
  func.func @transform_3(%arg0: i32) -> (i32, i32) {
    %c0_i32 = arith.constant 0 : i32
    %c0_i32_0 = arith.constant 0 : i32
    %c0_i32_1 = arith.constant 0 : i32
    return %c0_i32, %c0_i32_0 : i32, i32
  }
  func.func @transform_4(%arg0: i32) -> (i32, i32) {
    %c0_i32 = arith.constant 0 : i32
    %c0_i32_0 = arith.constant 0 : i32
    %c0_i32_1 = arith.constant 0 : i32
    return %c0_i32, %c0_i32_0 : i32, i32
  }
  func.func @transform_5(%arg0: i32) -> (i32, i32) {
    %c0_i32 = arith.constant 0 : i32
    %c0_i32_0 = arith.constant 0 : i32
    %c0_i32_1 = arith.constant 0 : i32
    return %c0_i32, %c0_i32_0 : i32, i32
  }
  func.func @transform_6(%arg0: i32) -> (i32, i32) {
    %c0_i32 = arith.constant 0 : i32
    %c0_i32_0 = arith.constant 0 : i32
    %c0_i32_1 = arith.constant 0 : i32
    return %c0_i32, %c0_i32_0 : i32, i32
  }
  func.func @transform_7(%arg0: i32) -> (i32, i32, i32) {
    %c0_i32 = arith.constant 0 : i32
    %c0_i32_0 = arith.constant 0 : i32
    %c0_i32_1 = arith.constant 0 : i32
    return %arg0, %c0_i32, %c0_i32_0 : i32, i32, i32
  }
}

</mosaic_0001>

<bundles_post_ra>
// kernel: _fused_forward.1
= control target key start
LH: loop header
LB: loop body
LE: loop exit
PB: predicated region body
PF: predicated region fallthrough
CT: control target
= control target key end

     0   :  { %s5387_s24 = smov 0   ;;  %s7414_s0 = inlined_call_operand.vmem [shape: f32[2,18,18,1], index: 0, kind: input, shape index: {}]   ;;  %s7415_s1 = inlined_call_operand.vmem [shape: bf16[9,16], index: 1, kind: input, shape index: {}]   ;;  %s7416_s2 = inlined_call_operand.vmem [shape: f32[1,16], index: 2, kind: input, shape index: {}]   ;;  %s7417_s3 = inlined_call_operand.vmem [shape: bf16[144,256], index: 3, kind: input, shape index: {}]   ;;  %s7418_s4 = inlined_call_operand.vmem [shape: f32[1,256], index: 4, kind: input, shape index: {}]   ;;  %s7419_s5 = inlined_call_operand.vmem [shape: bf16[256,128], index: 5, kind: input, shape index: {}]   ;;  %s7420_s6 = inlined_call_operand.vmem [shape: f32[1,128], index: 6, kind: input, shape index: {}]   ;;  %s7421_s7 = inlined_call_operand.vmem [shape: f32[2,16,128], index: 7, kind: output, shape index: {}]  }
   0x1 LB: > { %s4296_s25 = sadd.s32 4294967295, %s5327_s24   ;;  %p4300_p0 = scmp.ge.s32.totalorder %s5327_s24, 1  ;;  %s5327_s24 = sphi %s5387_s24, %s17_s24  }
   0x2   : > { %p237_p1 = scmp.lt.s32.totalorder %s5327_s24, 3 }
   0x4   : > { %p238_p2 = pnand %p4300_p0, %p237_p1 }
   0x5   : > { %p269_p3 = scmp.lt.s32.totalorder (!%p238_p2), %s4296_s25, 1  ;;  %s5329_s30 = smov (!%p238_p2), 3  }
   0x6   : > { %241 = sbr.rel (%p238_p2) target bundleno = 1241 (0x4d9), region = 48  ;;  %s5330_s8 = smov (!%p238_p2), 2  }
   0x7   : > { %s5331_s9 = smov (!%p238_p2), 1   ;;  %s5332_s10 = smov (!%p238_p2), 4  }
   0x8   : > { %s5333_s11 = smov (!%p238_p2), 5   ;;  %s5334_s12 = smov (!%p238_p2), 6  }
   0x9   : > { %s5335_s13 = smov (!%p238_p2), 7   ;;  %s5336_s14 = smov (!%p238_p2), 8  }
   0xa   : > { %s5340_s19 = smov (!%p238_p2), 32   ;;  %s5341_s20 = smov (!%p238_p2), 16  }
   0xb   : > { %s7423_s25 = smov (!%p269_p3, %s4296_s25), 1  ;;  %vm559_vm0 = vcmask 1045504   ;;  %vm382_vm1 = vcmask 1046528   ;;  %vm1681_vm2 = vcmask 1043456   ;;  %vm1682_vm3 = vcmask 1044480   ;;  %s5342_s21 = smov 48  }
   0xc   : > { %s4439_s26 = smul.u32 432, %s7423_s25  ;;  %vm1338_vm4 = vcmask 7168   ;;  %vm1371_vm5 = vcmask 15360   ;;  %vm1404_vm6 = vcmask 23552   ;;  %vm1437_vm7 = vcmask 31744   ;;  %s5343_s22 = smov 64  }
   0xd   : > { %vm1470_vm8 = vcmask 39936   ;;  %vm1503_vm9 = vcmask 48128   ;;  %vm1536_vm10 = vcmask 56320   ;;  %vm1569_vm11 = vcmask 64512   ;;  %s4363_s18 = sshll.u32 %s7423_s25, 4 }
   0xe   : > { %s5401_s29 = scalar_lea.vmem %s7414_s0, %s4439_s26  ;;  %vm1632_vm12 = vcmask 72704   ;;  %vm1881_vm13 = vcmask 130048   ;;  %vm2282_vm14 = vcmask 123904   ;;  %vm2815_vm15 = vcmask 1041409  }
   0xf   : > { %v286_v0 = vld [vmem:[%s5401_s29 + $0x30] sm:$0xff]  ;;  %v287_v1 = vld [vmem:[%s5401_s29 + $0x38] sm:$0xff]  ;;  %v5411_v4 = vld [vmem:[%s5401_s29 + $0x20] sm:$0xff] }
  0x10   : > { %v5406_v2 = vld [vmem:[%s5401_s29 + $0x18] sm:$0xff]  ;;  %v5408_v3 = vpack.i.bf16 %v287_v1, %v286_v0  ;;  %v5414_v5 = vld [vmem:[%s5401_s29] sm:$0xff]  ;;  %v5417_v6 = vld [vmem:[%s5401_s29 + $0x8] sm:$0xff]  ;;  %v393_v9 = vrot.slane %v286_v0, 1  ;;  %v566_v19 = vrot.slane %v5411_v4, 2  ;;  %v389_v22 = vrot.slane %v5411_v4, 1 }
  0x11   : > { %v565_v7 = vrot.slane %v5406_v2, 2  ;;  %v388_v8 = vrot.slane %v5406_v2, 1  ;;  %v4466_v10 = vpack.i.bf16 %v5411_v4, %v5406_v2  ;;  %v282_v11 = vld [vmem:[%s5401_s29 + $0x10] sm:$0x3]  ;;  %v560_v12 = vrot.slane %v5414_v5, 2  ;;  %v5452_v46 = vld [vmem:[%s5401_s29 + $0x48] sm:$0xff] }
  0x12   : > { %v561_v13 = vrot.slane %v5417_v6, 2  ;;  %v383_v14 = vrot.slane %v5414_v5, 1  ;;  %4472 = vrot.lane.b32.xlu1 %v5408_v3, %s5329_s30  ;;  %v563_v15 = vrot.slane %v282_v11, 2  ;;  %v384_v16 = vrot.slane %v5417_v6, 1  ;;  %v285_v18 = vld [vmem:[%s5401_s29 + $0x28] sm:$0x3] }
  0x13   : > { %v386_v17 = vrot.slane %v282_v11, 1  ;;  %4467 = vrot.lane.b32.xlu0 %v4466_v10, %s5329_s30  ;;  %v568_v21 = vrot.slane %v285_v18, 2  ;;  %v391_v23 = vrot.slane %v285_v18, 1  ;;  %v288_v24 = vld [vmem:[%s5401_s29 + $0x40] sm:$0x3]  ;;  %v567_v28 = vsel %vm559_vm0, %v565_v7, %v566_v19  ;;  %v5455_v47 = vld [vmem:[%s5401_s29 + $0x50] sm:$0xff] }
  0x14   : > { %v562_v20 = vsel %vm559_vm0, %v560_v12, %v561_v13  ;;  %v564_v25 = vsel %vm559_vm0, %v561_v13, %v563_v15  ;;  %v385_v26 = vsel %vm382_vm1, %v383_v14, %v384_v16  ;;  %v390_v32 = vsel %vm382_vm1, %v388_v8, %v389_v22  ;;  %v291_v48 = vld [vmem:[%s5401_s29 + $0x58] sm:$0x3]  ;;  %v292_v63 = vld [vmem:[%s5401_s29 + $0x60] sm:$0xff] }
  0x15   : > { %v387_v27 = vsel %vm382_vm1, %v384_v16, %v386_v17  ;;  %v4486_v29 = vpack.i.bf16 %v564_v25, %v562_v20  ;;  %v569_v31 = vsel %vm559_vm0, %v566_v19, %v568_v21  ;;  %v392_v33 = vsel %vm382_vm1, %v389_v22, %v391_v23  ;;  %v5489_v15 = vld [vmem:[%s5401_s29 + $0x78] sm:$0xff]  ;;  %v5492_v16 = vld [vmem:[%s5401_s29 + $0x80] sm:$0xff]  ;;  %v297_v20 = vld [vmem:[%s5401_s29 + $0x88] sm:$0x3] }
  0x16   : > { %v4476_v30 = vpack.i.bf16 %v387_v27, %v385_v26  ;;  %v394_v34 = vrot.slane %v287_v1, 1  ;;  %v396_v35 = vrot.slane %v288_v24, 1  ;;  %v4491_v36 = vpack.i.bf16 %v569_v31, %v567_v28  ;;  %v5504_v23 = vld [vmem:[%s5401_s29 + $0xc0] sm:$0xff]  ;;  %v306_v25 = vld [vmem:[%s5401_s29 + $0xd0] sm:$0x3] }
  0x17   : > { %4487 = vrot.lane.b32.xlu1 %v4486_v29, %s5330_s8  ;;  %v4481_v37 = vpack.i.bf16 %v392_v33, %v390_v32  ;;  %v570_v38 = vrot.slane %v286_v0, 2  ;;  %v571_v41 = vrot.slane %v287_v1, 2  ;;  %v573_v42 = vrot.slane %v288_v24, 2  ;;  %v293_v0 = vld [vmem:[%s5401_s29 + $0x68] sm:$0xff]  ;;  %v294_v1 = vld [vmem:[%s5401_s29 + $0x70] sm:$0x3] }
  0x18   : > { %4477 = vrot.lane.b32.xlu0 %v4476_v30, %s5331_s9  ;;  %v395_v39 = vsel %vm382_vm1, %v393_v9, %v394_v34  ;;  %v397_v40 = vsel %vm382_vm1, %v394_v34, %v396_v35  ;;  %v398_v50 = vrot.slane %v5452_v46, 1  ;;  %v399_v51 = vrot.slane %v5455_v47, 1  ;;  %v5507_v24 = vld [vmem:[%s5401_s29 + $0xc8] sm:$0xff]  ;;  %v307_v32 = vld [vmem:[%s5401_s29 + $0xd8] sm:$0xff]  ;;  %v308_v33 = vld [vmem:[%s5401_s29 + $0xe0] sm:$0xff] }
  0x19   : > { %v4501_v43 = vpack.i.bf16 %v397_v40, %v395_v39  ;;  %v572_v44 = vsel %vm559_vm0, %v570_v38, %v571_v41  ;;  %v574_v45 = vsel %vm559_vm0, %v571_v41, %v573_v42  ;;  %v401_v52 = vrot.slane %v291_v48, 1  ;;  %v309_v35 = vld [vmem:[%s5401_s29 + $0xe8] sm:$0x3] }
  0x1a   : > { %v4511_v49 = vpack.i.bf16 %v574_v45, %v572_v44  ;;  %v4521_v53 = vpack.i.bf16 %v5455_v47, %v5452_v46  ;;  %v400_v54 = vsel %vm382_vm1, %v398_v50, %v399_v51  ;;  %v575_v57 = vrot.slane %v5452_v46, 2 }
  0x1b   : > { %4492 = vrot.lane.b32.xlu1 %v4491_v36, %s5330_s8  ;;  %v402_v55 = vsel %vm382_vm1, %v399_v51, %v401_v52  ;;  %v576_v58 = vrot.slane %v5455_v47, 2  ;;  %v578_v59 = vrot.slane %v291_v48, 2  ;;  %v404_v7 = vrot.slane %v293_v0, 1 }
  0x1c   : > { %4482 = vrot.lane.b32.xlu0 %v4481_v37, %s5331_s9  ;;  %v4531_v56 = vpack.i.bf16 %v402_v55, %v400_v54  ;;  %v406_v8 = vrot.slane %v294_v1, 1  ;;  %v4571_v9 = vpack.i.bf16 %v293_v0, %v292_v63  ;;  %v580_v10 = vrot.slane %v292_v63, 2 }
  0x1d   : > { %v577_v60 = vsel %vm559_vm0, %v575_v57, %v576_v58  ;;  %v579_v61 = vsel %vm559_vm0, %v576_v58, %v578_v59  ;;  %v581_v13 = vrot.slane %v293_v0, 2  ;;  %v583_v14 = vrot.slane %v294_v1, 2 }
  0x1e   : > { %v4546_v62 = vpack.i.bf16 %v579_v61, %v577_v60  ;;  %v407_v12 = vsel %vm382_vm1, %v404_v7, %v406_v8  ;;  %v408_v21 = vrot.slane %v5489_v15, 1  ;;  %v409_v22 = vrot.slane %v5492_v16, 1 }
  0x1f   : > { %4502 = vrot.lane.b32.xlu1 %v4501_v43, %s5332_s10  ;;  %v582_v18 = vsel %vm559_vm0, %v580_v10, %v581_v13  ;;  %v584_v19 = vsel %vm559_vm0, %v581_v13, %v583_v14  ;;  %v411_v27 = vrot.slane %v297_v20, 1  ;;  %v5515_v28 = vpack.i.bf16 %v5492_v16, %v5489_v15  ;;  %v310_v13 = vld [vmem:[%s5401_s29 + $0xf0] sm:$0xff]  ;;  %v311_v14 = vld [vmem:[%s5401_s29 + $0xf8] sm:$0xff] }
  0x20   : > { %4497 = vrot.lane.b32.xlu0 %v4481_v37, %s5332_s10  ;;  %v4591_v26 = vpack.i.bf16 %v584_v19, %v582_v18  ;;  %v423_v29 = vrot.slane %v5504_v23, 1  ;;  %v424_v30 = vrot.slane %v5507_v24, 1  ;;  %v426_v31 = vrot.slane %v306_v25, 1  ;;  %v5246_v37 = vld [vmem:[%s7415_s1] sm:$0x1f]  }
  0x21   : > { %v410_v34 = vsel %vm382_vm1, %v408_v21, %v409_v22  ;;  %v601_v38 = vrot.slane %v5507_v24, 2  ;;  %v603_v39 = vrot.slane %v306_v25, 2  ;;  %v412_v40 = vsel %vm382_vm1, %v409_v22, %v411_v27  ;;  %v300_v18 = vld [vmem:[%s5401_s29 + $0xa0] sm:$0x3] }
  0x22   : > { %v428_v41 = vrot.slane %v307_v32, 1  ;;  %v429_v42 = vrot.slane %v308_v33, 1  ;;  %v425_v45 = vsel %vm382_vm1, %v423_v29, %v424_v30  ;;  %v427_v48 = vsel %vm382_vm1, %v424_v30, %v426_v31 }
  0x23   : > { %4512 = vrot.lane.b32.xlu1 %v4511_v49, %s5333_s11  ;;  %v5533_v52 = vpack.i.bf16 %v427_v48, %v425_v45  ;;  %v604_v54 = vsel %vm559_vm0, %v601_v38, %v603_v39  ;;  %v4611_v55 = vpack.i.bf16 %v412_v40, %v410_v34  ;;  %v586_v58 = vrot.slane %v5492_v16, 2  ;;  %v299_v16 = vld [vmem:[%s5401_s29 + $0x98] sm:$0xff] }
  0x24   : > { %4507 = vrot.lane.b32.xlu0 %v4491_v36, %s5333_s11  ;;  %v600_v36 = vrot.slane %v5504_v23, 2  ;;  %v588_v59 = vrot.slane %v297_v20, 2  ;;  %v430_v60 = vsel %vm382_vm1, %v428_v41, %v429_v42  ;;  %v608_v0 = vrot.slane %v309_v35, 2 }
  0x25   : > { %v4681_v19 = vpack.i.bf16 %v311_v14, %v310_v13  ;;  %v433_v21 = vrot.slane %v310_v13, 1  ;;  %v434_v22 = vrot.slane %v311_v14, 1  ;;  %v414_v27 = vrot.slane %v299_v16, 1 }
  0x26   : > { %v416_v29 = vrot.slane %v300_v18, 1  ;;  %v591_v39 = vrot.slane %v299_v16, 2  ;;  %v593_v40 = vrot.slane %v300_v18, 2 }
  0x27   : > { %4522 = vrot.lane.b32.xlu1 %v4521_v53, %s5334_s12  ;;  %v435_v30 = vsel %vm382_vm1, %v433_v21, %v434_v22 }
  0x28   : > { %4517 = vrot.lane.b32.xlu0 %v5408_v3, %s5334_s12  ;;  %v403_v3 = vrot.slane %v292_v63, 1  ;;  %v606_v63 = vrot.slane %v308_v33, 2 }
  0x2a   : > { %v405_v11 = vsel %vm382_vm1, %v403_v3, %v404_v7  ;;  %v589_v7 = vsel %vm559_vm0, %v586_v58, %v588_v59 }
  0x2b   : > { %4532 = vrot.lane.b32.xlu1 %v4531_v56, %s5335_s13  ;;  %v5496_v17 = vpack.i.bf16 %v407_v12, %v405_v11  ;;  %v5572_v12 = vpack.i.bf16 %v308_v33, %v307_v32 }
  0x2c   : > { %4527 = vrot.lane.b32.xlu0 %v4501_v43, %s5335_s13 }
  0x2f   : > { %4542 = vrot.lane.b32.xlu1 %v4501_v43, %s5331_s9  ;;  %v5337_v43 = vmov 65535  }
  0x30   : > { %4537 = vrot.lane.b32.xlu0 %v4511_v49, %s5336_s14  ;;  %v1683_v44 = vsel %vm1681_vm2, 4294967295, %v5337_v43  ;;  %vm2817_vm2 = vcmask 1042434  }
  0x31   : > { %v1684_v50 = vsel %vm1682_vm3, %v1683_v44, 0  ;;  %v594_v44 = vsel %vm559_vm0, %v591_v39, %v593_v40  ;;  %vm2819_vm3 = vcmask 1043459  }
  0x32   : > { %v1686_v51 = vand.u32 %v5246_v37, %v1684_v50  ;;  %v314_v50 = vld [vmem:[%s5401_s29 + $0x110] sm:$0xff] }
  0x33   : > { %4552 = vrot.lane.b32.xlu1 %v4531_v56, %s5331_s9 }
  0x34   : > { %4547 = vrot.lane.b32.xlu0 %v4546_v62, %s5336_s14  ;;  %4403 = vmatprep.subr.bf16.mxu0 %v1686_v51 }
  0x35   : > { %4404 = vmatpush3.bf16.msra.mxu0 %v1686_v51  ;;  %4437 = vmatprep.subr.bf16.mxu1 %v1686_v51 }
  0x36   : > { %4438 = vmatpush3.bf16.msra.mxu1 %v1686_v51  ;;  %v301_v51 = vld [vmem:[%s5401_s29 + $0xa8] sm:$0xff] }
  0x37   : > { %4562 = vrot.lane.b32.xlu1 %v4546_v62, %s5330_s8 }
  0x38   : > { %4557 = vrot.lane.b32.xlu0 %v4511_v49, %s5330_s8  ;;  %v431_v49 = vrot.slane %v309_v35, 1  ;;  %v610_v35 = vrot.slane %v310_v13, 2 }
  0x3a   : > { %v432_v61 = vsel %vm382_vm1, %v429_v42, %v431_v49  ;;  %v313_v49 = vld [vmem:[%s5401_s29 + $0x108] sm:$0xff] }
  0x3b   : > { %4572 = vrot.lane.b32.xlu1 %v4571_v9, %s5329_s30  ;;  %v5546_v1 = vpack.i.bf16 %v432_v61, %v430_v60  ;;  %v438_v59 = vrot.slane %v313_v49, 1  ;;  %v439_v60 = vrot.slane %v314_v50, 1 }
  0x3c   : > { %4567 = vrot.lane.b32.xlu0 %v4521_v53, %s5329_s30  ;;  %v602_v53 = vsel %vm559_vm0, %v600_v36, %v601_v38  ;;  %v611_v36 = vrot.slane %v311_v14, 2 }
  0x3d   : > { %v5541_v57 = vpack.i.bf16 %v604_v54, %v602_v53  ;;  %v302_v53 = vld [vmem:[%s5401_s29 + $0xb0] sm:$0xff]  ;;  %v315_v54 = vld [vmem:[%s5401_s29 + $0x118] sm:$0x3] }
  0x3e   : > { %v612_v41 = vsel %vm559_vm0, %v610_v35, %v611_v36  ;;  %v441_v61 = vrot.slane %v315_v54, 1  ;;  %v618_v18 = vrot.slane %v315_v54, 2 }
  0x3f   : > { %4582 = vrot.lane.b32.xlu1 %v5496_v17, %s5332_s10 }
  0x40   : > { %4577 = vrot.lane.b32.xlu0 %v4531_v56, %s5332_s10  ;;  %v585_v56 = vrot.slane %v5489_v15, 2  ;;  %v298_v15 = vld [vmem:[%s5401_s29 + $0x90] sm:$0xff] }
  0x41   : > { %v4676_v20 = vpack.i.bf16 %v299_v16, %v298_v15  ;;  %v590_v38 = vrot.slane %v298_v15, 2  ;;  %v615_v16 = vrot.slane %v313_v49, 2 }
  0x42   : > { %v587_v3 = vsel %vm559_vm0, %v585_v56, %v586_v58  ;;  %v5624_v56 = vpack.i.bf16 %v314_v50, %v313_v49  ;;  %v5626_v58 = vpack.i.bf16 %v302_v53, %v301_v51 }
  0x43   : > { %4592 = vrot.lane.b32.xlu1 %v4591_v26, %s5333_s11  ;;  %v4631_v11 = vpack.i.bf16 %v589_v7, %v587_v3  ;;  %v592_v43 = vsel %vm559_vm0, %v590_v38, %v591_v39  ;;  %v440_v3 = vsel %vm382_vm1, %v438_v59, %v439_v60  ;;  %v442_v7 = vsel %vm382_vm1, %v439_v60, %v441_v61 }
  0x44   : > { %4587 = vrot.lane.b32.xlu0 %v4546_v62, %s5333_s11  ;;  %v605_v62 = vrot.slane %v307_v32, 2  ;;  %v5610_v48 = vpack.i.bf16 %v594_v44, %v592_v43  ;;  %v5682_v43 = vld [vmem:[%s5401_s29 + $0x128] sm:$0xff] }
  0x46   : > { %v607_v8 = vsel %vm559_vm0, %v605_v62, %v606_v63  ;;  %v418_v62 = vrot.slane %v301_v51, 1 }
  0x47   : > { %4602 = vrot.lane.b32.xlu1 %v5515_v28, %s5334_s12 }
  0x48   : > { %4597 = vrot.lane.b32.xlu0 %v4571_v9, %s5334_s12  ;;  %v609_v9 = vsel %vm559_vm0, %v606_v63, %v608_v0  ;;  %v419_v63 = vrot.slane %v302_v53, 1 }
  0x49   : > { %v5555_v10 = vpack.i.bf16 %v609_v9, %v607_v8 }
  0x4a   : > { %v420_v8 = vsel %vm382_vm1, %v418_v62, %v419_v63  ;;  %v5707_v62 = vpack.i.bf16 %v5507_v24, %v5504_v23 }
  0x4b   : > { %4612 = vrot.lane.b32.xlu1 %v4611_v55, %s5335_s13 }
  0x4c   : > { %4607 = vrot.lane.b32.xlu0 %v5496_v17, %s5335_s13 }
  0x4f   : > { %4622 = vrot.lane.b32.xlu1 %v5496_v17, %s5331_s9  ;;  %v312_v17 = vld [vmem:[%s5401_s29 + $0x100] sm:$0x3] }
  0x50   : > { %4617 = vrot.lane.b32.xlu0 %v4591_v26, %s5336_s14  ;;  %v436_v25 = vrot.slane %v312_v17, 1  ;;  %v613_v37 = vrot.slane %v312_v17, 2  ;;  %v616_v17 = vrot.slane %v314_v50, 2 }
  0x52   : > { %v437_v31 = vsel %vm382_vm1, %v434_v22, %v436_v25  ;;  %v614_v42 = vsel %vm559_vm0, %v611_v36, %v613_v37 }
  0x53   : > { %4632 = vrot.lane.b32.xlu1 %v4631_v11, %s5336_s14  ;;  %v5593_v33 = vpack.i.bf16 %v437_v31, %v435_v30  ;;  %v5608_v45 = vpack.i.bf16 %v614_v42, %v612_v41  ;;  %v5679_v42 = vld [vmem:[%s5401_s29 + $0x120] sm:$0xff] }
  0x54   : > { %4627 = vrot.lane.b32.xlu0 %v5533_v52, %s5331_s9  ;;  %v5697_v59 = vpack.i.bf16 %v5682_v43, %v5679_v42 }
  0x57   : > { %4642 = vrot.lane.b32.xlu1 %v5546_v1, %s5331_s9 }
  0x58   : > { %4637 = vrot.lane.b32.xlu0 %v4611_v55, %s5331_s9 }
  0x5b   : > { %4652 = vrot.lane.b32.xlu1 %v5541_v57, %s5330_s8 }
  0x5c   : > { %4647 = vrot.lane.b32.xlu0 %v4591_v26, %s5330_s8  ;;  %v413_v26 = vrot.slane %v298_v15, 1 }
  0x5e   : > { %v415_v32 = vsel %vm382_vm1, %v413_v26, %v414_v27  ;;  %v617_v26 = vsel %vm559_vm0, %v615_v16, %v616_v17 }
  0x5f   : > { %4662 = vrot.lane.b32.xlu1 %v5555_v10, %s5330_s8 }
  0x60   : > { %4657 = vrot.lane.b32.xlu0 %v4631_v11, %s5330_s8 }
  0x63   : > { %4672 = vrot.lane.b32.xlu1 %v5572_v12, %s5329_s30 }
  0x64   : > { %4667 = vrot.lane.b32.xlu0 %v5515_v28, %s5329_s30  ;;  %v417_v28 = vsel %vm382_vm1, %v414_v27, %v416_v29  ;;  %v619_v27 = vsel %vm559_vm0, %v616_v17, %v618_v18 }
  0x65   : > { %v5595_v34 = vpack.i.bf16 %v417_v28, %v415_v32  ;;  %v5664_v28 = vpack.i.bf16 %v619_v27, %v617_v26 }
  0x67   : > { %4682 = vrot.lane.b32.xlu1 %v4681_v19, %s5329_s30 }
  0x68   : > { %4677 = vrot.lane.b32.xlu0 %v4676_v20, %s5329_s30 }
  0x6b   : > { %4692 = vrot.lane.b32.xlu1 %v5546_v1, %s5332_s10 }
  0x6c   : > { %4687 = vrot.lane.b32.xlu0 %v4611_v55, %s5332_s10  ;;  %v303_v55 = vld [vmem:[%s5401_s29 + $0xb8] sm:$0x3] }
  0x6d   : > { %v421_v0 = vrot.slane %v303_v55, 1  ;;  %v598_v21 = vrot.slane %v303_v55, 2 }
  0x6f   : > { %4702 = vrot.lane.b32.xlu1 %v5593_v33, %s5332_s10  ;;  %v422_v9 = vsel %vm382_vm1, %v419_v63, %v421_v0  ;;  %v443_v63 = vrot.slane %v5679_v42, 1 }
  0x70   : > { %4697 = vrot.lane.b32.xlu0 %v5595_v34, %s5332_s10  ;;  %v5642_v13 = vpack.i.bf16 %v422_v9, %v420_v8 }
  0x73   : > { %4712 = vrot.lane.b32.xlu1 %v5555_v10, %s5333_s11 }
  0x74   : > { %4707 = vrot.lane.b32.xlu0 %v4631_v11, %s5333_s11  ;;  %v5640_v11 = vpack.i.bf16 %v442_v7, %v440_v3  ;;  %v444_v7 = vrot.slane %v5682_v43, 1 }
  0x77   : > { %4722 = vrot.lane.b32.xlu1 %v5608_v45, %s5333_s11 }
  0x78   : > { %4717 = vrot.lane.b32.xlu0 %v5610_v48, %s5333_s11 }
  0x7b   : > { %4732 = vrot.lane.b32.xlu1 %v4681_v19, %s5334_s12  ;;  %v595_v19 = vrot.slane %v301_v51, 2 }
  0x7c   : > { %4727 = vrot.lane.b32.xlu0 %v4676_v20, %s5334_s12  ;;  %v596_v20 = vrot.slane %v302_v53, 2  ;;  %v5693_v53 = vld [vmem:[%s5401_s29 + $0x130] sm:$0x3] }
  0x7e   : > { %v597_v29 = vsel %vm559_vm0, %v595_v19, %v596_v20  ;;  %v599_v30 = vsel %vm559_vm0, %v596_v20, %v598_v21 }
  0x7f   : > { %4742 = vrot.lane.b32.xlu1 %v5624_v56, %s5334_s12  ;;  %v5666_v35 = vpack.i.bf16 %v599_v30, %v597_v29 }
  0x80   : > { %4737 = vrot.lane.b32.xlu0 %v5626_v58, %s5334_s12 }
  0x83   : > { %4752 = vrot.lane.b32.xlu1 %v5593_v33, %s5335_s13 }
  0x84   : > { %4747 = vrot.lane.b32.xlu0 %v5595_v34, %s5335_s13  ;;  %v5644_v14 = vpop.permute.xlu1 %4472 }
  0x85   : > { %v5646_v15 = vpop.permute.xlu0 %4467  ;;  %v4474_v8 = vunpack.i.l.bf16 %v5644_v14 }
  0x86   : > { %v4470_v9 = vunpack.i.h.bf16 %v5646_v15  ;;  %v4469_v16 = vunpack.i.l.bf16 %v5646_v15 }
  0x87   : > { %4762 = vrot.lane.b32.xlu1 %v5640_v11, %s5335_s13 }
  0x88   : > { %4757 = vrot.lane.b32.xlu0 %v5642_v13, %s5335_s13 }
  0x89   : > { %v4488_v22 = vpop.permute.xlu1 %4487 }
  0x8a   : > { %v4478_v25 = vpop.permute.xlu0 %4477  ;;  %v4490_v44 = vunpack.i.h.bf16 %v4488_v22  ;;  %v4489_v49 = vunpack.i.l.bf16 %v4488_v22 }
  0x8b   : > { %4772 = vrot.lane.b32.xlu1 %v5608_v45, %s5336_s14  ;;  %v4480_v38 = vunpack.i.h.bf16 %v4478_v25  ;;  %v4479_v39 = vunpack.i.l.bf16 %v4478_v25 }
  0x8c   : > { %4767 = vrot.lane.b32.xlu0 %v5610_v48, %s5336_s14 }
  0x8d   : > { %v4493_v31 = vpop.permute.xlu1 %4492  ;;  %v1340_v50 = vsel %vm1338_vm4, %v5417_v6, %v4480_v38  ;;  %v1339_v51 = vsel %vm1338_vm4, %v5414_v5, %v4479_v39 }
  0x8e   : > { %v4483_v32 = vpop.permute.xlu0 %4482  ;;  %v4495_v54 = vunpack.i.h.bf16 %v4493_v31  ;;  %v4494_v55 = vunpack.i.l.bf16 %v4493_v31  ;;  %v1373_v0 = vsel %vm1371_vm5, %v1340_v50, %v4490_v44  ;;  %v1372_v3 = vsel %vm1371_vm5, %v1339_v51, %v4489_v49 }
  0x8f   : > { %4782 = vrot.lane.b32.xlu1 %v5593_v33, %s5331_s9  ;;  %v4485_v33 = vunpack.i.h.bf16 %v4483_v32  ;;  %v1406_v19 = vsel %vm1404_vm6, %v1373_v0, %v4470_v9 }
  0x90   : > { %4777 = vrot.lane.b32.xlu0 %v5595_v34, %s5331_s9  ;;  %v4484_v34 = vunpack.i.l.bf16 %v4483_v32 }
  0x91   : > { %v5668_v36 = vpop.permute.xlu1 %4502  ;;  %v1342_v6 = vsel %vm1338_vm4, %v5411_v4, %v4485_v33  ;;  %v446_v4 = vrot.slane %v5693_v53, 1 }
  0x92   : > { %v5670_v37 = vpop.permute.xlu0 %4497  ;;  %v1341_v5 = vsel %vm1338_vm4, %v5406_v2, %v4484_v34  ;;  %v4475_v2 = vunpack.i.h.bf16 %v5644_v14  ;;  %v1375_v23 = vsel %vm1371_vm5, %v1342_v6, %v4495_v54  ;;  %v1405_v14 = vsel %vm1404_vm6, %v1372_v3, %v4469_v16 }
  0x93   : > { %4792 = vrot.lane.b32.xlu1 %v5664_v28, %s5336_s14  ;;  %v1374_v24 = vsel %vm1371_vm5, %v1341_v5, %v4494_v55  ;;  %v4500_v17 = vunpack.i.h.bf16 %v5670_v37  ;;  %v4499_v18 = vunpack.i.l.bf16 %v5670_v37 }
  0x94   : > { %4787 = vrot.lane.b32.xlu0 %v5666_v35, %s5336_s14  ;;  %v1407_v27 = vsel %vm1404_vm6, %v1374_v24, %v4474_v8  ;;  %v1408_v29 = vsel %vm1404_vm6, %v1375_v23, %v4475_v2 }
  0x95   : > { %v5676_v40 = vpop.permute.xlu1 %4512  ;;  %v1438_v32 = vsel %vm1437_vm7, %v1405_v14, %v4499_v18  ;;  %v1439_v37 = vsel %vm1437_vm7, %v1406_v19, %v4500_v17 }
  0x96   : > { %v4508_v41 = vpop.permute.xlu0 %4507  ;;  %v4514_v38 = vunpack.i.l.bf16 %v5676_v40 }
  0x97   : > { %4802 = vrot.lane.b32.xlu1 %v5640_v11, %s5331_s9  ;;  %v4510_v20 = vunpack.i.h.bf16 %v4508_v41  ;;  %v4509_v15 = vunpack.i.l.bf16 %v4508_v41 }
  0x98   : > { %4797 = vrot.lane.b32.xlu0 %v5642_v13, %s5331_s9 }
  0x99   : > { %v5703_v60 = vpop.permute.xlu1 %4522  ;;  %v1471_v39 = vsel %vm1470_vm8, %v1438_v32, %v4509_v15  ;;  %v1472_v33 = vsel %vm1470_vm8, %v1439_v37, %v4510_v20 }
  0x9a   : > { %v4518_v61 = vpop.permute.xlu0 %4517  ;;  %v4525_v34 = vunpack.i.h.bf16 %v5703_v60  ;;  %v4524_v41 = vunpack.i.l.bf16 %v5703_v60 }
  0x9b   : > { %4812 = vrot.lane.b32.xlu1 %v5608_v45, %s5330_s8  ;;  %v4505_v45 = vunpack.i.h.bf16 %v5668_v36  ;;  %v4520_v25 = vunpack.i.h.bf16 %v4518_v61  ;;  %v4519_v26 = vunpack.i.l.bf16 %v4518_v61 }
  0x9c   : > { %4807 = vrot.lane.b32.xlu0 %v5610_v48, %s5330_s8  ;;  %v4504_v48 = vunpack.i.l.bf16 %v5668_v36  ;;  %v4515_v36 = vunpack.i.h.bf16 %v5676_v40 }
  0x9d   : > { %v4533_v21 = vpop.permute.xlu1 %4532  ;;  %v1504_v54 = vsel %vm1503_vm9, %v1471_v39, %v4519_v26  ;;  %v1505_v55 = vsel %vm1503_vm9, %v1472_v33, %v4520_v25  ;;  %v1441_v0 = vsel %vm1437_vm7, %v1408_v29, %v4505_v45 }
  0x9e   : > { %v4528_v22 = vpop.permute.xlu0 %4527  ;;  %v4535_v6 = vunpack.i.h.bf16 %v4533_v21  ;;  %v4534_v5 = vunpack.i.l.bf16 %v4533_v21  ;;  %v1440_v61 = vsel %vm1437_vm7, %v1407_v27, %v4504_v48  ;;  %v1474_v9 = vsel %vm1470_vm8, %v1441_v0, %v4515_v36 }
  0x9f   : > { %v4530_v30 = vunpack.i.h.bf16 %v4528_v22  ;;  %v4529_v31 = vunpack.i.l.bf16 %v4528_v22  ;;  %4822 = vrot.lane.b32.xlu1 %v5664_v28, %s5330_s8  ;;  %v1473_v8 = vsel %vm1470_vm8, %v1440_v61, %v4514_v38  ;;  %v1507_v24 = vsel %vm1503_vm9, %v1474_v9, %v4525_v34 }
  0xa0   : > { %4817 = vrot.lane.b32.xlu0 %v5666_v35, %s5330_s8  ;;  %v1506_v23 = vsel %vm1503_vm9, %v1473_v8, %v4524_v41  ;;  %v1540_v19 = vsel %vm1536_vm10, %v1507_v24, %v4535_v6  ;;  %v445_v21 = vsel %vm382_vm1, %v443_v63, %v444_v7  ;;  %v447_v22 = vsel %vm382_vm1, %v444_v7, %v446_v4 }
  0xa1   : > { %v5744_v44 = vpop.permute.xlu1 %4542  ;;  %v1537_v40 = vsel %vm1536_vm10, %v1504_v54, %v4529_v31  ;;  %v1538_v60 = vsel %vm1536_vm10, %v1505_v55, %v4530_v30  ;;  %v1539_v14 = vsel %vm1536_vm10, %v1506_v23, %v4534_v5  ;;  %v5787_v26 = vpack.i.bf16 %v447_v22, %v445_v21 }
  0xa2   : > { %v4538_v49 = vpop.permute.xlu0 %4537  ;;  %v620_v63 = vrot.slane %v5679_v42, 2  ;;  %v621_v27 = vrot.slane %v5682_v43, 2  ;;  %v623_v7 = vrot.slane %v5693_v53, 2  ;;  %v5807_v43 = vld [vmem:[%s5401_s29 + $0x138] sm:$0xff]  ;;  %v5810_v53 = vld [vmem:[%s5401_s29 + $0x140] sm:$0xff]  ;;  %v4545_v39 = vunpack.i.h.bf16 %v5744_v44 }
  0xa3   : > { %v4540_v50 = vunpack.i.h.bf16 %v4538_v49  ;;  %v4539_v51 = vunpack.i.l.bf16 %v4538_v49  ;;  %4832 = vrot.lane.b32.xlu1 %v5624_v56, %s5329_s30  ;;  %v448_v32 = vrot.slane %v5807_v43, 1  ;;  %v449_v37 = vrot.slane %v5810_v53, 1 }
  0xa4   : > { %4827 = vrot.lane.b32.xlu0 %v5626_v58, %s5329_s30  ;;  %v624_v30 = vsel %vm559_vm0, %v621_v27, %v623_v7  ;;  %v5835_v55 = vpack.i.bf16 %v5810_v53, %v5807_v43 }
  0xa5   : > { %v1570_v3 = vsel %vm1569_vm11, %v1537_v40, %v4539_v51  ;;  %v1571_v2 = vsel %vm1569_vm11, %v1538_v60, %v4540_v50  ;;  %v5760_v56 = vpop.permute.xlu1 %4552  ;;  %v450_v50 = vsel %vm382_vm1, %v448_v32, %v449_v37  ;;  %v5290_v40 = vld [vmem:[%s5401_s29 + $0x38] sm:$0xff] }
  0xa6   : > { %v4548_v16 = vpop.permute.xlu0 %4547  ;;  %v1602_v58 = vpack.c.bf16 %v1571_v2, %v1570_v3  ;;  %v4555_v41 = vunpack.i.h.bf16 %v5760_v56  ;;  %v4554_v49 = vunpack.i.l.bf16 %v5760_v56  ;;  %v1344_v60 = vsel %vm1338_vm4, %v5290_v40, %v4545_v39 }
  0xa7   : > { %v4550_v17 = vunpack.i.h.bf16 %v4548_v16  ;;  %v4549_v18 = vunpack.i.l.bf16 %v4548_v16  ;;  %4842 = vrot.lane.b32.xlu1 %v5697_v59, %s5329_s30 }
  0xa8   : > { %4837 = vrot.lane.b32.xlu0 %v5707_v62, %s5329_s30  ;;  %4405 = vmatprep.mubr.msk.bf16.mxu0 %vm1632_vm12, %v1602_v58  ;;  %v1346_v8 = vsel %vm1338_vm4, %v5455_v47, %v4555_v41  ;;  %v1345_v9 = vsel %vm1338_vm4, %v5452_v46, %v4554_v49  ;;  %v5291_v58 = vld [vmem:[%s5401_s29 + $0x30] sm:$0xff] }
  0xa9   : > { %v1572_v20 = vsel %vm1569_vm11, %v1539_v14, %v4549_v18  ;;  %v1573_v15 = vsel %vm1569_vm11, %v1540_v19, %v4550_v17  ;;  %v4563_v45 = vpop.permute.xlu1 %4562 }
  0xaa   : > { %v4558_v48 = vpop.permute.xlu0 %4557  ;;  %v1603_v25 = vpack.c.bf16 %v1573_v15, %v1572_v20  ;;  %v4565_v54 = vunpack.i.h.bf16 %v4563_v45 }
  0xab   : > { %4852 = vrot.lane.b32.xlu1 %v5640_v11, %s5332_s10  ;;  %v5798_v11 = vld [vmem:[%s5401_s29 + $0x148] sm:$0x3]  ;;  %v4560_v6 = vunpack.i.h.bf16 %v4558_v48  ;;  %v4559_v5 = vunpack.i.l.bf16 %v4558_v48 }
  0xac   : > { %4847 = vrot.lane.b32.xlu0 %v5642_v13, %s5332_s10  ;;  %4406 = vmatmul.mubr.msk.bf16.vlgmr.msra.gmra.mxu0 %vm1632_vm12, %v1603_v25  ;;  %v622_v13 = vsel %vm559_vm0, %v620_v63, %v621_v27  ;;  %v451_v36 = vrot.slane %v5798_v11, 1  ;;  %v1379_v17 = vsel %vm1371_vm5, %v1346_v8, %v4565_v54 }
  0xad   : > { %v4573_v4 = vpop.permute.xlu1 %4572  ;;  %v5819_v38 = vpack.i.bf16 %v624_v30, %v622_v13  ;;  %v1377_v47 = vsel %vm1371_vm5, %v1344_v60, %v4560_v6 }
  0xae   : > { %v4568_v29 = vpop.permute.xlu0 %4567  ;;  %v452_v51 = vsel %vm382_vm1, %v449_v37, %v451_v36  ;;  %v4575_v61 = vunpack.i.h.bf16 %v4573_v4 }
  0xaf   : > { %4862 = vrot.lane.b32.xlu1 %v5787_v26, %s5332_s10  ;;  %v5841_v2 = vpack.i.bf16 %v452_v51, %v450_v50  ;;  %v4570_v56 = vunpack.i.h.bf16 %v4568_v29  ;;  %v4569_v16 = vunpack.i.l.bf16 %v4568_v29 }
  0xb0   : > { %4857 = vrot.lane.b32.xlu0 %v5533_v52, %s5332_s10  ;;  %v1412_v20 = vsel %vm1404_vm6, %v1379_v17, %v4575_v61 }
  0xb1   : > { %v5802_v31 = vpop.permute.xlu1 %4582 }
  0xb2   : > { %v5804_v42 = vpop.permute.xlu0 %4577  ;;  %v4585_v63 = vunpack.i.h.bf16 %v5802_v31  ;;  %v4584_v27 = vunpack.i.l.bf16 %v5802_v31 }
  0xb3   : > { %4872 = vrot.lane.b32.xlu1 %v5664_v28, %s5333_s11  ;;  %v4544_v28 = vunpack.i.l.bf16 %v5744_v44  ;;  %v4574_v44 = vunpack.i.l.bf16 %v4573_v4  ;;  %v4580_v46 = vunpack.i.h.bf16 %v5804_v42  ;;  %v4579_v14 = vunpack.i.l.bf16 %v5804_v42 }
  0xb4   : > { %4867 = vrot.lane.b32.xlu0 %v5666_v35, %s5333_s11  ;;  %v4564_v35 = vunpack.i.l.bf16 %v4563_v45  ;;  %v1445_v6 = vsel %vm1437_vm7, %v1412_v20, %v4585_v63  ;;  %v322_v20 = vld [vmem:[%s5401_s29 + $0x150] sm:$0xff] }
  0xb5   : > { %v5822_v33 = vpop.permute.xlu1 %4592  ;;  %v1343_v23 = vsel %vm1338_vm4, %v5291_v58, %v4544_v28 }
  0xb6   : > { %v4588_v34 = vpop.permute.xlu0 %4587  ;;  %v1378_v24 = vsel %vm1371_vm5, %v1345_v9, %v4564_v35  ;;  %v1376_v18 = vsel %vm1371_vm5, %v1343_v23, %v4559_v5  ;;  %v4595_v30 = vunpack.i.h.bf16 %v5822_v33  ;;  %v4594_v42 = vunpack.i.l.bf16 %v5822_v33 }
  0xb7   : > { %4882 = vrot.lane.b32.xlu1 %v5819_v38, %s5333_s11  ;;  %v1411_v19 = vsel %vm1404_vm6, %v1378_v24, %v4574_v44  ;;  %v4590_v15 = vunpack.i.h.bf16 %v4588_v34  ;;  %v4589_v21 = vunpack.i.l.bf16 %v4588_v34  ;;  %v625_v23 = vrot.slane %v5807_v43, 2 }
  0xb8   : > { %4877 = vrot.lane.b32.xlu0 %v5541_v57, %s5333_s11  ;;  %v1444_v35 = vsel %vm1437_vm7, %v1411_v19, %v4584_v27  ;;  %v1478_v61 = vsel %vm1470_vm8, %v1445_v6, %v4595_v30 }
  0xb9   : > { %v5839_v0 = vpop.permute.xlu1 %4602  ;;  %v1477_v60 = vsel %vm1470_vm8, %v1444_v35, %v4594_v42 }
  0xba   : > { %v4598_v3 = vpop.permute.xlu0 %4597  ;;  %v4605_v37 = vunpack.i.h.bf16 %v5839_v0  ;;  %v4604_v36 = vunpack.i.l.bf16 %v5839_v0 }
  0xbb   : > { %4892 = vrot.lane.b32.xlu1 %v5697_v59, %s5334_s12  ;;  %v1409_v59 = vsel %vm1404_vm6, %v1376_v18, %v4569_v16  ;;  %v4600_v48 = vunpack.i.h.bf16 %v4598_v3  ;;  %v4599_v25 = vunpack.i.l.bf16 %v4598_v3  ;;  %v628_v18 = vrot.slane %v5798_v11, 2 }
  0xbc   : > { %4887 = vrot.lane.b32.xlu0 %v5707_v62, %s5334_s12  ;;  %v1410_v62 = vsel %vm1404_vm6, %v1377_v47, %v4570_v56  ;;  %v1442_v29 = vsel %vm1437_vm7, %v1409_v59, %v4579_v14  ;;  %v1510_v8 = vsel %vm1503_vm9, %v1477_v60, %v4604_v36  ;;  %v626_v47 = vrot.slane %v5810_v53, 2 }
  0xbd   : > { %v4613_v22 = vpop.permute.xlu1 %4612  ;;  %v1443_v13 = vsel %vm1437_vm7, %v1410_v62, %v4580_v46  ;;  %v1475_v32 = vsel %vm1470_vm8, %v1442_v29, %v4589_v21  ;;  %v324_v21 = vld [vmem:[%s5401_s29 + $0x160] sm:$0x3]  ;;  %v453_v59 = vrot.slane %v322_v20, 1 }
  0xbe   : > { %v4608_v45 = vpop.permute.xlu0 %4607  ;;  %v1476_v31 = vsel %vm1470_vm8, %v1443_v13, %v4590_v15  ;;  %v4615_v51 = vunpack.i.h.bf16 %v4613_v22  ;;  %v4614_v28 = vunpack.i.l.bf16 %v4613_v22  ;;  %v627_v43 = vsel %vm559_vm0, %v625_v23, %v626_v47  ;;  %v323_v15 = vld [vmem:[%s5401_s29 + $0x158] sm:$0xff]  ;;  %v333_v23 = vld [vmem:[%s5401_s29 + $0x1a8] sm:$0x3] }
  0xbf   : > { %v4610_v7 = vunpack.i.h.bf16 %v4608_v45  ;;  %v4609_v4 = vunpack.i.l.bf16 %v4608_v45  ;;  %4902 = vrot.lane.b32.xlu1 %v5835_v55, %s5334_s12  ;;  %v1509_v41 = vsel %vm1503_vm9, %v1476_v31, %v4600_v48  ;;  %v629_v53 = vsel %vm559_vm0, %v626_v47, %v628_v18 }
  0xc0   : > { %4897 = vrot.lane.b32.xlu0 %v5572_v12, %s5334_s12  ;;  %v1508_v12 = vsel %vm1503_vm9, %v1475_v32, %v4599_v25  ;;  %v1543_v16 = vsel %vm1536_vm10, %v1510_v8, %v4614_v28  ;;  %v454_v62 = vrot.slane %v323_v15, 1  ;;  %v456_v48 = vrot.slane %v324_v21, 1  ;;  %v326_v25 = vld [vmem:[%s5401_s29 + $0x170] sm:$0xff] }
  0xc1   : > { %v5877_v39 = vpop.permute.xlu1 %4622  ;;  %v1541_v33 = vsel %vm1536_vm10, %v1508_v12, %v4609_v4  ;;  %v1542_v54 = vsel %vm1536_vm10, %v1509_v41, %v4610_v7  ;;  %v5948_v7 = vpack.i.bf16 %v323_v15, %v322_v20  ;;  %v630_v13 = vrot.slane %v322_v20, 2  ;;  %v328_v12 = vld [vmem:[%s5401_s29 + $0x180] sm:$0xff] }
  0xc2   : > { %v4618_v34 = vpop.permute.xlu0 %4617  ;;  %v455_v4 = vsel %vm382_vm1, %v453_v59, %v454_v62  ;;  %v457_v29 = vsel %vm382_vm1, %v454_v62, %v456_v48  ;;  %v631_v30 = vrot.slane %v323_v15, 2  ;;  %v633_v42 = vrot.slane %v324_v21, 2 }
  0xc3   : > { %v4620_v49 = vunpack.i.h.bf16 %v4618_v34  ;;  %v4619_v50 = vunpack.i.l.bf16 %v4618_v34  ;;  %4912 = vrot.lane.b32.xlu1 %v5787_v26, %s5335_s13  ;;  %v459_v31 = vrot.slane %v326_v25, 1  ;;  %v5961_v41 = vpack.i.bf16 %v457_v29, %v455_v4 }
  0xc4   : > { %4907 = vrot.lane.b32.xlu0 %v5533_v52, %s5335_s13  ;;  %v1511_v52 = vsel %vm1503_vm9, %v1478_v61, %v4605_v37  ;;  %v636_v35 = vrot.slane %v326_v25, 2  ;;  %v1139_v21 = vrot.slane %v333_v23, 1 }
  0xc5   : > { %v1574_v5 = vsel %vm1569_vm11, %v1541_v33, %v4619_v50  ;;  %v1575_v40 = vsel %vm1569_vm11, %v1542_v54, %v4620_v49  ;;  %v4633_v44 = vpop.permute.xlu1 %4632  ;;  %v1544_v58 = vsel %vm1536_vm10, %v1511_v52, %v4615_v51  ;;  %v632_v49 = vsel %vm559_vm0, %v630_v13, %v631_v30  ;;  %v329_v50 = vld [vmem:[%s5401_s29 + $0x188] sm:$0xff]  ;;  %v330_v51 = vld [vmem:[%s5401_s29 + $0x190] sm:$0x3] }
  0xc6   : > { %v5893_v0 = vpop.permute.xlu0 %4627  ;;  %v1604_v3 = vpack.c.bf16 %v1575_v40, %v1574_v5  ;;  %v4635_v9 = vunpack.i.h.bf16 %v4633_v44  ;;  %v4634_v56 = vunpack.i.l.bf16 %v4633_v44  ;;  %v835_v5 = vrot.slane %v328_v12, 1 }
  0xc7   : > { %4922 = vrot.lane.b32.xlu1 %v5841_v2, %s5335_s13  ;;  %v836_v61 = vrot.slane %v329_v50, 1  ;;  %v838_v44 = vrot.slane %v330_v51, 1  ;;  %v6012_v62 = vpack.i.bf16 %v329_v50, %v328_v12 }
  0xc8   : > { %4917 = vrot.lane.b32.xlu0 %v5546_v1, %s5335_s13  ;;  %v1576_v24 = vsel %vm1569_vm11, %v1543_v16, %v4634_v56  ;;  %v1577_v17 = vsel %vm1569_vm11, %v1544_v58, %v4635_v9  ;;  %4409 = vmatprep.mubr.msk.bf16.mxu0 %vm1632_vm12, %v1604_v3  ;;  %v937_v3 = vrot.slane %v329_v50, 2  ;;  %v939_v9 = vrot.slane %v330_v51, 2  ;;  %v5982_v56 = vld [vmem:[%s5401_s29 + $0x198] sm:$0xff]  ;;  %v5991_v58 = vld [vmem:[%s5401_s29 + $0x1a0] sm:$0xff] }
  0xc9   : > { %v5909_v46 = vpop.permute.xlu1 %4642  ;;  %v1605_v1 = vpack.c.bf16 %v1577_v17, %v1576_v24  ;;  %v1137_v20 = vrot.slane %v5991_v58, 1  ;;  %v1136_v15 = vrot.slane %v5982_v56, 1  ;;  %v1238_v4 = vrot.slane %v5991_v58, 2 }
  0xca   : > { %v5911_v14 = vpop.permute.xlu0 %4637  ;;  %v5081_v29 = vpack.i.bf16 %v5991_v58, %v5982_v56  ;;  %v1237_v13 = vrot.slane %v5982_v56, 2  ;;  %v4644_v50 = vunpack.i.l.bf16 %v5909_v46 }
  0xcb   : > { %4932 = vrot.lane.b32.xlu1 %v5819_v38, %s5336_s14  ;;  %4410 = vmatmul.mubr.msk.bf16.gmra.mxu0 %vm1632_vm12, %v1605_v1  ;;  %v837_v1 = vsel %vm382_vm1, %v835_v5, %v836_v61  ;;  %v4640_v51 = vunpack.i.h.bf16 %v5911_v14  ;;  %v5293_v5 = vld [vmem:[%s5401_s29 + $0x60] sm:$0xff] }
  0xcc   : > { %4927 = vrot.lane.b32.xlu0 %v5541_v57, %s5336_s14  ;;  %v5929_v57 = vpack.i.bf16 %v629_v53, %v627_v43  ;;  %v839_v43 = vsel %vm382_vm1, %v836_v61, %v838_v44  ;;  %v5294_v44 = vld [vmem:[%s5401_s29 + $0xc8] sm:$0xff] }
  0xcd   : > { %v5920_v11 = vpop.permute.xlu1 %4652  ;;  %v6014_v48 = vpack.i.bf16 %v839_v43, %v837_v1  ;;  %v5298_v43 = vld [vmem:[%s5401_s29 + $0x80] sm:$0xff] }
  0xce   : > { %v5922_v19 = vpop.permute.xlu0 %4647 }
  0xcf   : > { %4942 = vrot.lane.b32.xlu1 %v5555_v10, %s5336_s14  ;;  %v325_v10 = vld [vmem:[%s5401_s29 + $0x168] sm:$0xff] }
  0xd0   : > { %4937 = vrot.lane.b32.xlu0 %v5787_v26, %s5331_s9  ;;  %v327_v26 = vld [vmem:[%s5401_s29 + $0x178] sm:$0x3]  ;;  %v458_v32 = vrot.slane %v325_v10, 1  ;;  %v635_v54 = vrot.slane %v325_v10, 2  ;;  %v5979_v52 = vpack.i.bf16 %v326_v25, %v325_v10 }
  0xd1   : > { %v5933_v22 = vpop.permute.xlu1 %4662  ;;  %v461_v37 = vrot.slane %v327_v26, 1  ;;  %v638_v6 = vrot.slane %v327_v26, 2 }
  0xd2   : > { %v5935_v45 = vpop.permute.xlu0 %4657  ;;  %v460_v28 = vsel %vm382_vm1, %v458_v32, %v459_v31  ;;  %v637_v24 = vsel %vm559_vm0, %v635_v54, %v636_v35  ;;  %v4625_v32 = vunpack.i.h.bf16 %v5877_v39  ;;  %v4650_v54 = vunpack.i.h.bf16 %v5922_v19 }
  0xd3   : > { %4952 = vrot.lane.b32.xlu1 %v5841_v2, %s5331_s9  ;;  %v462_v33 = vsel %vm382_vm1, %v459_v31, %v461_v37  ;;  %v639_v17 = vsel %vm559_vm0, %v636_v35, %v638_v6  ;;  %v4624_v31 = vunpack.i.l.bf16 %v5877_v39  ;;  %v4630_v37 = vunpack.i.h.bf16 %v5893_v0  ;;  %v5292_v35 = vld [vmem:[%s5401_s29 + $0x68] sm:$0xff] }
  0xd4   : > { %4947 = vrot.lane.b32.xlu0 %v5929_v57, %s5336_s14  ;;  %v5988_v16 = vpack.i.bf16 %v462_v33, %v460_v28  ;;  %v6010_v59 = vpack.i.bf16 %v639_v17, %v637_v24  ;;  %v4639_v39 = vunpack.i.l.bf16 %v5911_v14  ;;  %v1348_v6 = vsel %vm1338_vm4, %v5292_v35, %v4625_v32  ;;  %v5297_v17 = vld [vmem:[%s5401_s29 + $0xd8] sm:$0xff] }
  0xd5   : > { %v5944_v63 = vpop.permute.xlu1 %4672  ;;  %v1347_v61 = vsel %vm1338_vm4, %v5293_v5, %v4624_v31  ;;  %v1357_v1 = vsel %vm1338_vm4, %v5297_v17, %v4644_v50  ;;  %v1381_v32 = vsel %vm1371_vm5, %v1348_v6, %v4650_v54  ;;  %v4660_v31 = vunpack.i.h.bf16 %v5935_v45 }
  0xd6   : > { %v5946_v27 = vpop.permute.xlu0 %4667  ;;  %v4674_v50 = vunpack.i.l.bf16 %v5944_v63 }
  0xd7   : > { %4962 = vrot.lane.b32.xlu1 %v5929_v57, %s5330_s8 }
  0xd8   : > { %4957 = vrot.lane.b32.xlu0 %v5819_v38, %s5330_s8  ;;  %v634_v38 = vsel %vm559_vm0, %v631_v30, %v633_v42  ;;  %v6030_v30 = vsel %vm382_vm1, %v1137_v20, %v1139_v21  ;;  %v1240_v42 = vrot.slane %v333_v23, 2  ;;  %v5296_v23 = vld [vmem:[%s5401_s29 + $0xe0] sm:$0xff]  ;;  %v4664_v21 = vunpack.i.l.bf16 %v5933_v22 }
  0xd9   : > { %v5956_v36 = vpop.permute.xlu1 %4682  ;;  %v5977_v8 = vpack.i.bf16 %v634_v38, %v632_v49  ;;  %v4645_v49 = vunpack.i.h.bf16 %v5909_v46  ;;  %v4654_v38 = vunpack.i.l.bf16 %v5920_v11  ;;  %v6054_v46 = vsel %vm559_vm0, %v1237_v13, %v1238_v4 }
  0xda   : > { %v5958_v34 = vpop.permute.xlu0 %4677  ;;  %v6057_v14 = vsel %vm559_vm0, %v1238_v4, %v1240_v42 }
  0xdb   : > { %4972 = vrot.lane.b32.xlu1 %v5948_v7, %s5329_s30  ;;  %v1358_v24 = vsel %vm1338_vm4, %v5296_v23, %v4645_v49  ;;  %v4675_v49 = vunpack.i.h.bf16 %v5944_v63  ;;  %v4680_v54 = vunpack.i.h.bf16 %v5958_v34  ;;  %v5101_v56 = vpack.i.bf16 %v6057_v14, %v6054_v46 }
  0xdc   : > { %4967 = vrot.lane.b32.xlu0 %v5835_v55, %s5329_s30  ;;  %v936_v55 = vrot.slane %v328_v12, 2  ;;  %v4629_v12 = vunpack.i.l.bf16 %v5893_v0  ;;  %v4655_v0 = vunpack.i.h.bf16 %v5920_v11  ;;  %v1356_v11 = vsel %vm1338_vm4, %v5294_v44, %v4630_v37 }
  0xdd   : > { %v5973_v40 = vpop.permute.xlu1 %4692  ;;  %v4659_v37 = vunpack.i.l.bf16 %v5935_v45  ;;  %v4684_v45 = vunpack.i.l.bf16 %v5956_v36 }
  0xde   : > { %v5975_v60 = vpop.permute.xlu0 %4687  ;;  %v938_v53 = vsel %vm559_vm0, %v936_v55, %v937_v3  ;;  %v4649_v55 = vunpack.i.l.bf16 %v5922_v19  ;;  %v1389_v42 = vsel %vm1371_vm5, %v1356_v11, %v4655_v0  ;;  %v1390_v0 = vsel %vm1371_vm5, %v1357_v1, %v4664_v21 }
  0xdf   : > { %4982 = vrot.lane.b32.xlu1 %v5961_v41, %s5332_s10  ;;  %v4694_v35 = vunpack.i.l.bf16 %v5973_v40  ;;  %v1422_v11 = vsel %vm1404_vm6, %v1389_v42, %v4675_v49 }
  0xe0   : > { %4977 = vrot.lane.b32.xlu0 %v5841_v2, %s5332_s10  ;;  %v940_v2 = vsel %vm559_vm0, %v937_v3, %v939_v9  ;;  %v5295_v3 = vld [vmem:[%s5401_s29 + $0xc0] sm:$0xff] }
  0xe1   : > { %v5996_v47 = vpop.permute.xlu1 %4702  ;;  %v6020_v26 = vpack.i.bf16 %v940_v2, %v938_v53  ;;  %v1355_v9 = vsel %vm1338_vm4, %v5295_v3, %v4629_v12  ;;  %v1350_v53 = vsel %vm1338_vm4, %v5298_v43, %v4640_v51  ;;  %v5299_v2 = vld [vmem:[%s5401_s29 + $0x78] sm:$0xff]  ;;  %v1380_v12 = vsel %vm1371_vm5, %v1347_v61, %v4649_v55 }
  0xe2   : > { %v5998_v18 = vpop.permute.xlu0 %4697  ;;  %v1349_v19 = vsel %vm1338_vm4, %v5299_v2, %v4639_v39  ;;  %v4670_v51 = vunpack.i.h.bf16 %v5946_v27  ;;  %v4685_v39 = vunpack.i.h.bf16 %v5956_v36  ;;  %v1383_v5 = vsel %vm1371_vm5, %v1350_v53, %v4660_v31 }
  0xe3   : > { %4992 = vrot.lane.b32.xlu1 %v5977_v8, %s5333_s11  ;;  %v4695_v36 = vunpack.i.h.bf16 %v5973_v40  ;;  %v4689_v61 = vunpack.i.l.bf16 %v5975_v60  ;;  %v4690_v55 = vunpack.i.h.bf16 %v5975_v60  ;;  %v6125_v40 = vsel %vm1404_vm6, %v1390_v0, %v4684_v45 }
  0xe4   : > { %4987 = vrot.lane.b32.xlu0 %v5929_v57, %s5333_s11  ;;  %v6027_v57 = vsel %vm382_vm1, %v1136_v15, %v1137_v20  ;;  %v1388_v20 = vsel %vm1371_vm5, %v1355_v9, %v4654_v38  ;;  %v4665_v15 = vunpack.i.h.bf16 %v5933_v22  ;;  %v4669_v22 = vunpack.i.l.bf16 %v5946_v27 }
  0xe5   : > { %v6016_v10 = vpop.permute.xlu1 %4712  ;;  %v4679_v38 = vunpack.i.l.bf16 %v5958_v34  ;;  %v1382_v27 = vsel %vm1371_vm5, %v1349_v19, %v4659_v37  ;;  %v1421_v44 = vsel %vm1404_vm6, %v1388_v20, %v4674_v50  ;;  %v1414_v3 = vsel %vm1404_vm6, %v1381_v32, %v4670_v51 }
  0xe6   : > { %v6018_v25 = vpop.permute.xlu0 %4707  ;;  %v1391_v63 = vsel %vm1371_vm5, %v1358_v24, %v4665_v15  ;;  %v1413_v34 = vsel %vm1404_vm6, %v1380_v12, %v4669_v22  ;;  %v6134_v24 = vsel %vm1404_vm6, %v1383_v5, %v4680_v54  ;;  %v1454_v60 = vsel %vm1437_vm7, %v1421_v44, %v4694_v35 }
  0xe7   : > { %5002 = vrot.lane.b32.xlu1 %v5979_v52, %s5334_s12  ;;  %v6128_v9 = vsel %vm1404_vm6, %v1391_v63, %v4685_v39  ;;  %v6131_v23 = vsel %vm1404_vm6, %v1382_v27, %v4679_v38  ;;  %v4715_v17 = vunpack.i.h.bf16 %v6016_v10  ;;  %v4714_v1 = vunpack.i.l.bf16 %v6016_v10 }
  0xe8   : > { %4997 = vrot.lane.b32.xlu0 %v5948_v7, %s5334_s12  ;;  %v5091_v7 = vpack.i.bf16 %v6030_v30, %v6027_v57  ;;  %v1455_v2 = vsel %vm1437_vm7, %v1422_v11, %v4695_v36  ;;  %v1446_v19 = vsel %vm1437_vm7, %v1413_v34, %v4689_v61  ;;  %v4710_v20 = vunpack.i.h.bf16 %v6018_v25 }
  0xe9   : > { %v6045_v28 = vpop.permute.xlu1 %4722  ;;  %v4709_v15 = vunpack.i.l.bf16 %v6018_v25  ;;  %v1447_v21 = vsel %vm1437_vm7, %v1414_v3, %v4690_v55  ;;  %v4705_v42 = vunpack.i.h.bf16 %v5996_v47  ;;  %v4704_v32 = vunpack.i.l.bf16 %v5996_v47 }
  0xea   : > { %v6047_v33 = vpop.permute.xlu0 %4717  ;;  %v4700_v31 = vunpack.i.h.bf16 %v5998_v18  ;;  %v4699_v10 = vunpack.i.l.bf16 %v5998_v18  ;;  %v1487_v49 = vsel %vm1470_vm8, %v1454_v60, %v4714_v1  ;;  %v1488_v47 = vsel %vm1470_vm8, %v1455_v2, %v4715_v17 }
  0xeb   : > { %5012 = vrot.lane.b32.xlu1 %v5988_v16, %s5335_s13  ;;  %v1480_v18 = vsel %vm1470_vm8, %v1447_v21, %v4710_v20  ;;  %v4725_v45 = vunpack.i.h.bf16 %v6045_v28  ;;  %v4724_v38 = vunpack.i.l.bf16 %v6045_v28 }
  0xec   : > { %5007 = vrot.lane.b32.xlu0 %v5961_v41, %s5335_s13 }
  0xed   : > { %v6083_v4 = vpop.permute.xlu1 %4732 }
  0xee   : > { %v6085_v13 = vpop.permute.xlu0 %4727  ;;  %v4734_v37 = vunpack.i.l.bf16 %v6083_v4  ;;  %v4735_v50 = vunpack.i.h.bf16 %v6083_v4  ;;  %v4719_v4 = vunpack.i.l.bf16 %v6047_v33 }
  0xef   : > { %5022 = vrot.lane.b32.xlu1 %v5961_v41, %s5331_s9  ;;  %v4730_v25 = vunpack.i.h.bf16 %v6085_v13  ;;  %v4729_v12 = vunpack.i.l.bf16 %v6085_v13  ;;  %v4720_v13 = vunpack.i.h.bf16 %v6047_v33 }
  0xf0   : > { %5017 = vrot.lane.b32.xlu0 %v5977_v8, %s5336_s14  ;;  %v1520_v5 = vsel %vm1503_vm9, %v1487_v49, %v4734_v37  ;;  %v1521_v34 = vsel %vm1503_vm9, %v1488_v47, %v4735_v50  ;;  %v1457_v49 = vsel %vm1437_vm7, %v6128_v9, %v4705_v42  ;;  %v1448_v47 = vsel %vm1437_vm7, %v6131_v23, %v4699_v10 }
  0xf1   : > { %v6107_v41 = vpop.permute.xlu1 %4742  ;;  %v1513_v27 = vsel %vm1503_vm9, %v1480_v18, %v4730_v25  ;;  %v1481_v9 = vsel %vm1470_vm8, %v1448_v47, %v4719_v4 }
  0xf2   : > { %v6109_v6 = vpop.permute.xlu0 %4737  ;;  %v4745_v28 = vunpack.i.h.bf16 %v6107_v41  ;;  %v4744_v36 = vunpack.i.l.bf16 %v6107_v41 }
  0xf3   : > { %5032 = vrot.lane.b32.xlu1 %v5988_v16, %s5331_s9  ;;  %v4740_v60 = vunpack.i.h.bf16 %v6109_v6  ;;  %v4739_v20 = vunpack.i.l.bf16 %v6109_v6  ;;  %v1449_v6 = vsel %vm1437_vm7, %v6134_v24, %v4700_v31 }
  0xf4   : > { %5027 = vrot.lane.b32.xlu0 %v6010_v59, %s5336_s14  ;;  %v1482_v23 = vsel %vm1470_vm8, %v1449_v6, %v4720_v13  ;;  %v5302_v6 = vld [vmem:[%s5401_s29 + $0x98] sm:$0xff] }
  0xf5   : > { %v4753_v43 = vpop.permute.xlu1 %4752  ;;  %v1515_v31 = vsel %vm1503_vm9, %v1482_v23, %v4740_v60 }
  0xf6   : > { %v4748_v53 = vpop.permute.xlu0 %4747  ;;  %v4755_v0 = vunpack.i.h.bf16 %v4753_v43  ;;  %v4754_v63 = vunpack.i.l.bf16 %v4753_v43 }
  0xf7   : > { %5042 = vrot.lane.b32.xlu1 %v6010_v59, %s5330_s8  ;;  %v4749_v22 = vunpack.i.l.bf16 %v4748_v53  ;;  %v4750_v54 = vunpack.i.h.bf16 %v4748_v53 }
  0xf8   : > { %5037 = vrot.lane.b32.xlu0 %v5977_v8, %s5330_s8  ;;  %v1479_v8 = vsel %vm1470_vm8, %v1446_v19, %v4709_v15  ;;  %v1553_v41 = vsel %vm1536_vm10, %v1520_v5, %v4754_v63  ;;  %v1554_v1 = vsel %vm1536_vm10, %v1521_v34, %v4755_v0  ;;  %s5346_s8 = smov 112  }
  0xf9   : > { %v6158_v51 = vpop.permute.xlu1 %4762  ;;  %v1512_v35 = vsel %vm1503_vm9, %v1479_v8, %v4729_v12  ;;  %v1546_v17 = vsel %vm1536_vm10, %v1513_v27, %v4750_v54  ;;  %v1456_v12 = vsel %vm1437_vm7, %v6125_v40, %v4704_v32  ;;  %v1490_v40 = vsel %vm1470_vm8, %v1457_v49, %v4725_v45  ;;  %v5301_v49 = vld [vmem:[%s5401_s29 + $0xf0] sm:$0xff] }
  0xfa   : > { %v6160_v39 = vpop.permute.xlu0 %4757  ;;  %v1545_v61 = vsel %vm1536_vm10, %v1512_v35, %v4749_v22  ;;  %v4764_v15 = vunpack.i.l.bf16 %v6158_v51  ;;  %v1489_v50 = vsel %vm1470_vm8, %v1456_v12, %v4724_v38  ;;  %v4765_v22 = vunpack.i.h.bf16 %v6158_v51 }
  0xfb   : > { %5052 = vrot.lane.b32.xlu1 %v6012_v62, %s5329_s30  ;;  %v4760_v8 = vunpack.i.h.bf16 %v6160_v39  ;;  %v4759_v18 = vunpack.i.l.bf16 %v6160_v39  ;;  %v1522_v24 = vsel %vm1503_vm9, %v1489_v50, %v4744_v36  ;;  %v1523_v42 = vsel %vm1503_vm9, %v1490_v40, %v4745_v28 }
  0xfc   : > { %5047 = vrot.lane.b32.xlu0 %v5979_v52, %s5329_s30  ;;  %v1514_v32 = vsel %vm1503_vm9, %v1481_v9, %v4739_v20  ;;  %v1555_v10 = vsel %vm1536_vm10, %v1522_v24, %v4764_v15  ;;  %v1556_v0 = vsel %vm1536_vm10, %v1523_v42, %v4765_v22  ;;  %v5303_v22 = vld [vmem:[%s5401_s29 + $0x90] sm:$0xff]  ;;  %v5305_v9 = vld [vmem:[%s5401_s29 + $0x108] sm:$0xff]  ;;  %s5345_s30 = smov 96  }
  0xfd   : > { %v4773_v44 = vpop.permute.xlu1 %4772  ;;  %v1547_v63 = vsel %vm1536_vm10, %v1514_v32, %v4759_v18  ;;  %v1548_v54 = vsel %vm1536_vm10, %v1515_v31, %v4760_v8  ;;  %v5304_v18 = vld [vmem:[%s5401_s29 + $0x110] sm:$0xff] }
  0xfe   : > { %v4768_v11 = vpop.permute.xlu0 %4767  ;;  %v4775_v55 = vunpack.i.h.bf16 %v4773_v44  ;;  %v4774_v52 = vunpack.i.l.bf16 %v4773_v44  ;;  %v5306_v32 = vld [vmem:[%s5401_s29 + $0xb0] sm:$0xff] }
  0xff   : > { %v4770_v3 = vunpack.i.h.bf16 %v4768_v11  ;;  %v4769_v33 = vunpack.i.l.bf16 %v4768_v11  ;;  %5062 = vrot.lane.b32.xlu1 %v6014_v48, %s5332_s10 }
 0x100   : > { %5057 = vrot.lane.b32.xlu0 %v5988_v16, %s5332_s10  ;;  %v1586_v2 = vsel %vm1569_vm11, %v1553_v41, %v4774_v52  ;;  %v1587_v19 = vsel %vm1569_vm11, %v1554_v1, %v4775_v55 }
 0x101   : > { %v1578_v43 = vsel %vm1569_vm11, %v1545_v61, %v4769_v33  ;;  %v1579_v53 = vsel %vm1569_vm11, %v1546_v17, %v4770_v3  ;;  %v6193_v37 = vpop.permute.xlu1 %4782  ;;  %v1610_v25 = vpack.c.bf16 %v1587_v19, %v1586_v2 }
 0x102   : > { %v1606_v21 = vpack.c.bf16 %v1579_v53, %v1578_v43  ;;  %v6195_v16 = vpop.permute.xlu0 %4777  ;;  %v4785_v33 = vunpack.i.h.bf16 %v6193_v37  ;;  %v4784_v60 = vunpack.i.l.bf16 %v6193_v37 }
 0x103   : > { %5072 = vrot.lane.b32.xlu1 %v6020_v26, %s5333_s11  ;;  %4421 = vmatprep.mubr.msk.bf16.mxu1 %vm1632_vm12, %v1610_v25  ;;  %v4780_v17 = vunpack.i.h.bf16 %v6195_v16  ;;  %v4779_v41 = vunpack.i.l.bf16 %v6195_v16  ;;  %v5300_v25 = vld [vmem:[%s5401_s29 + $0xf8] sm:$0xff] }
 0x104   : > { %5067 = vrot.lane.b32.xlu0 %v6010_v59, %s5333_s11  ;;  %4413 = vmatprep.mubr.msk.bf16.mxu0 %vm1632_vm12, %v1606_v21  ;;  %v1360_v12 = vsel %vm1338_vm4, %v5300_v25, %v4785_v33  ;;  %v1359_v47 = vsel %vm1338_vm4, %v5301_v49, %v4784_v60 }
 0x105   : > { %v4793_v59 = vpop.permute.xlu1 %4792  ;;  %v1352_v50 = vsel %vm1338_vm4, %v5302_v6, %v4780_v17  ;;  %v1351_v8 = vsel %vm1338_vm4, %v5303_v22, %v4779_v41 }
 0x106   : > { %v4788_v51 = vpop.permute.xlu0 %4787  ;;  %v4795_v39 = vunpack.i.h.bf16 %v4793_v59  ;;  %v4794_v45 = vunpack.i.l.bf16 %v4793_v59 }
 0x107   : > { %v4790_v38 = vunpack.i.h.bf16 %v4788_v51  ;;  %v4789_v13 = vunpack.i.l.bf16 %v4788_v51  ;;  %5082 = vrot.lane.b32.xlu1 %v5081_v29, %s5334_s12  ;;  %v5338_v29 = vmov 0.0  }
 0x108   : > { %5077 = vrot.lane.b32.xlu0 %v6012_v62, %s5334_s12  ;;  %v1588_v4 = vsel %vm1569_vm11, %v1555_v10, %v4794_v45  ;;  %v1589_v35 = vsel %vm1569_vm11, %v1556_v0, %v4795_v39  ;;  %2733 = vst.msk [vmem:[#allocation2 + $0x10] sm:$0xff] %vm1881_vm13, %v5338_v29  ;;  %2731 = vst.msk [vmem:[#allocation2] sm:$0xff] %vm1881_vm13, %v5338_v29  ;;  %v5307_v10 = vld [vmem:[%s5401_s29 + $0xa8] sm:$0xff] }
 0x109   : > { %v1580_v27 = vsel %vm1569_vm11, %v1547_v63, %v4789_v13  ;;  %v1581_v5 = vsel %vm1569_vm11, %v1548_v54, %v4790_v38  ;;  %v1611_v28 = vpack.c.bf16 %v1589_v35, %v1588_v4  ;;  %v6236_v61 = vpop.permute.xlu1 %4802  ;;  %2734 = vst.msk [vmem:[#allocation2 + $0x18] sm:$0x3] %vm2282_vm14, %v5338_v29  ;;  %2732 = vst.msk [vmem:[#allocation2 + $0x8] sm:$0x3] %vm2282_vm14, %v5338_v29 }
 0x10a   : > { %v1607_v36 = vpack.c.bf16 %v1581_v5, %v1580_v27  ;;  %v6238_v44 = vpop.permute.xlu0 %4797  ;;  %2735 = vst.msk [vmem:[#allocation2 + $0x20] sm:$0xff] %vm1881_vm13, %v5338_v29  ;;  %2737 = vst.msk [vmem:[#allocation2 + $0x30] sm:$0xff] %vm1881_vm13, %v5338_v29  ;;  %v4805_v1 = vunpack.i.h.bf16 %v6236_v61  ;;  %v4804_v43 = vunpack.i.l.bf16 %v6236_v61 }
 0x10b   : > { %5092 = vrot.lane.b32.xlu1 %v5091_v7, %s5335_s13  ;;  %4422 = vmatmul.mubr.msk.bf16.vlgmr.msra.gmra.mxu1 %vm1632_vm12, %v1611_v28  ;;  %2736 = vst.msk [vmem:[#allocation2 + $0x28] sm:$0x3] %vm2282_vm14, %v5338_v29  ;;  %2738 = vst.msk [vmem:[#allocation2 + $0x38] sm:$0x3] %vm2282_vm14, %v5338_v29  ;;  %v4800_v53 = vunpack.i.h.bf16 %v6238_v44  ;;  %v4799_v2 = vunpack.i.l.bf16 %v6238_v44 }
 0x10c   : > { %5087 = vrot.lane.b32.xlu0 %v6014_v48, %s5335_s13  ;;  %4414 = vmatmul.mubr.msk.bf16.gmra.mxu0 %vm1632_vm12, %v1607_v36  ;;  %2739 = vst.msk [vmem:[#allocation2 + $0x40] sm:$0xff] %vm1881_vm13, %v5338_v29  ;;  %2741 = vst.msk [vmem:[#allocation2 + $0x50] sm:$0xff] %vm1881_vm13, %v5338_v29  ;;  %v1362_v40 = vsel %vm1338_vm4, %v5304_v18, %v4805_v1  ;;  %v1361_v23 = vsel %vm1338_vm4, %v5305_v9, %v4804_v43 }
 0x10d   : > { %v6250_v58 = vpop.permute.xlu1 %4812  ;;  %2740 = vst.msk [vmem:[#allocation2 + $0x48] sm:$0x3] %vm2282_vm14, %v5338_v29  ;;  %2742 = vst.msk [vmem:[#allocation2 + $0x58] sm:$0x3] %vm2282_vm14, %v5338_v29  ;;  %v1354_v31 = vsel %vm1338_vm4, %v5306_v32, %v4800_v53  ;;  %v1353_v59 = vsel %vm1338_vm4, %v5307_v10, %v4799_v2 }
 0x10e   : > { %v6252_v62 = vpop.permute.xlu0 %4807  ;;  %2743 = vst.msk [vmem:[#allocation2 + $0x60] sm:$0xff] %vm1881_vm13, %v5338_v29  ;;  %2745 = vst.msk [vmem:[#allocation2 + $0x70] sm:$0xff] %vm1881_vm13, %v5338_v29  ;;  %v4815_v19 = vunpack.i.h.bf16 %v6250_v58  ;;  %v4814_v20 = vunpack.i.l.bf16 %v6250_v58 }
 0x10f   : > { %2744 = vst.msk [vmem:[#allocation2 + $0x68] sm:$0x3] %vm2282_vm14, %v5338_v29  ;;  %2746 = vst.msk [vmem:[#allocation2 + $0x78] sm:$0x3] %vm2282_vm14, %v5338_v29  ;;  %5102 = vrot.lane.b32.xlu1 %v5101_v56, %s5336_s14  ;;  %v4810_v15 = vunpack.i.h.bf16 %v6252_v62  ;;  %v4809_v21 = vunpack.i.l.bf16 %v6252_v62 }
 0x110   : > { %2747 = vst.msk [vmem:[#allocation2 + $0x80] sm:$0xff] %vm1881_vm13, %v5338_v29  ;;  %2749 = vst.msk [vmem:[#allocation2 + $0x90] sm:$0xff] %vm1881_vm13, %v5338_v29  ;;  %5097 = vrot.lane.b32.xlu0 %v6020_v26, %s5336_s14  ;;  %v1392_v51 = vsel %vm1371_vm5, %v1359_v47, %v4814_v20  ;;  %v1393_v39 = vsel %vm1371_vm5, %v1360_v12, %v4815_v19 }
 0x111   : > { %2748 = vst.msk [vmem:[#allocation2 + $0x88] sm:$0x3] %vm2282_vm14, %v5338_v29  ;;  %2750 = vst.msk [vmem:[#allocation2 + $0x98] sm:$0x3] %vm2282_vm14, %v5338_v29  ;;  %v4823_v48 = vpop.permute.xlu1 %4822  ;;  %v1384_v45 = vsel %vm1371_vm5, %v1351_v8, %v4809_v21  ;;  %v1385_v38 = vsel %vm1371_vm5, %v1352_v50, %v4810_v15 }
 0x112   : > { %v6277_v57 = vpop.permute.xlu0 %4817  ;;  %v4825_v24 = vunpack.i.h.bf16 %v4823_v48  ;;  %v4824_v42 = vunpack.i.l.bf16 %v4823_v48 }
 0x113   : > { %v4820_v13 = vunpack.i.h.bf16 %v6277_v57  ;;  %v4819_v0 = vunpack.i.l.bf16 %v6277_v57 }
 0x114   : > { %v1394_v28 = vsel %vm1371_vm5, %v1361_v23, %v4824_v42  ;;  %v1395_v36 = vsel %vm1371_vm5, %v1362_v40, %v4825_v24 }
 0x115   : > { %v6279_v30 = vpop.permute.xlu1 %4832  ;;  %v1386_v48 = vsel %vm1371_vm5, %v1353_v59, %v4819_v0  ;;  %v1387_v57 = vsel %vm1371_vm5, %v1354_v31, %v4820_v13 }
 0x116   : > { %v6281_v7 = vpop.permute.xlu0 %4827  ;;  %v4835_v4 = vunpack.i.h.bf16 %v6279_v30  ;;  %v4834_v35 = vunpack.i.l.bf16 %v6279_v30 }
 0x117   : > { %v4830_v27 = vunpack.i.h.bf16 %v6281_v7  ;;  %v4829_v5 = vunpack.i.l.bf16 %v6281_v7 }
 0x119   : > { %v6283_v46 = vpop.permute.xlu1 %4842  ;;  %v1417_v17 = vsel %vm1404_vm6, %v1384_v45, %v4829_v5 }
 0x11a   : > { %v6285_v14 = vpop.permute.xlu0 %4837  ;;  %v4845_v61 = vunpack.i.h.bf16 %v6283_v46  ;;  %v4844_v44 = vunpack.i.l.bf16 %v6283_v46  ;;  %v1425_v46 = vsel %vm1404_vm6, %v1392_v51, %v4834_v35 }
 0x11b   : > { %v4840_v56 = vunpack.i.h.bf16 %v6285_v14  ;;  %v4839_v58 = vunpack.i.l.bf16 %v6285_v14  ;;  %v1426_v14 = vsel %vm1404_vm6, %v1393_v39, %v4835_v4 }
 0x11c   : > { %v6366_v41 = vsel %vm1404_vm6, %v1394_v28, %v4844_v44  ;;  %v6369_v1 = vsel %vm1404_vm6, %v1395_v36, %v4845_v61 }
 0x11d   : > { %v6287_v11 = vpop.permute.xlu1 %4852  ;;  %v1419_v53 = vsel %vm1404_vm6, %v1386_v48, %v4839_v58  ;;  %v1420_v2 = vsel %vm1404_vm6, %v1387_v57, %v4840_v56 }
 0x11e   : > { %v6289_v34 = vpop.permute.xlu0 %4847  ;;  %v4855_v62 = vunpack.i.h.bf16 %v6287_v11  ;;  %v4854_v29 = vunpack.i.l.bf16 %v6287_v11  ;;  %v1418_v11 = vsel %vm1404_vm6, %v1385_v38, %v4830_v27 }
 0x11f   : > { %v4850_v30 = vunpack.i.h.bf16 %v6289_v34  ;;  %v4849_v7 = vunpack.i.l.bf16 %v6289_v34 }
 0x120   : > { %v1458_v19 = vsel %vm1437_vm7, %v1425_v46, %v4854_v29  ;;  %v1459_v20 = vsel %vm1437_vm7, %v1426_v14, %v4855_v62 }
 0x121   : > { %v6291_v55 = vpop.permute.xlu1 %4862  ;;  %v1450_v15 = vsel %vm1437_vm7, %v1417_v17, %v4849_v7  ;;  %v1451_v21 = vsel %vm1437_vm7, %v1418_v11, %v4850_v30 }
 0x122   : > { %v6293_v52 = vpop.permute.xlu0 %4857  ;;  %v4864_v6 = vunpack.i.l.bf16 %v6291_v55 }
 0x123   : > { %v4860_v34 = vunpack.i.h.bf16 %v6293_v52  ;;  %v4859_v43 = vunpack.i.l.bf16 %v6293_v52  ;;  %v4865_v52 = vunpack.i.h.bf16 %v6291_v55 }
 0x125   : > { %v6295_v26 = vpop.permute.xlu1 %4872  ;;  %v1452_v8 = vsel %vm1437_vm7, %v1419_v53, %v4859_v43  ;;  %v1453_v18 = vsel %vm1437_vm7, %v1420_v2, %v4860_v34 }
 0x126   : > { %v6297_v3 = vpop.permute.xlu0 %4867  ;;  %v4875_v25 = vunpack.i.h.bf16 %v6295_v26  ;;  %v4874_v12 = vunpack.i.l.bf16 %v6295_v26 }
 0x127   : > { %v4870_v50 = vunpack.i.h.bf16 %v6297_v3  ;;  %v4869_v22 = vunpack.i.l.bf16 %v6297_v3 }
 0x128   : > { %v1491_v32 = vsel %vm1470_vm8, %v1458_v19, %v4874_v12  ;;  %v1492_v3 = vsel %vm1470_vm8, %v1459_v20, %v4875_v25 }
 0x129   : > { %v6311_v37 = vpop.permute.xlu1 %4882  ;;  %v1483_v39 = vsel %vm1470_vm8, %v1450_v15, %v4869_v22 }
 0x12a   : > { %v6313_v16 = vpop.permute.xlu0 %4877  ;;  %v4885_v45 = vunpack.i.h.bf16 %v6311_v37  ;;  %v4884_v38 = vunpack.i.l.bf16 %v6311_v37 }
 0x12b   : > { %v4880_v40 = vunpack.i.h.bf16 %v6313_v16  ;;  %v4879_v9 = vunpack.i.l.bf16 %v6313_v16  ;;  %v1484_v16 = vsel %vm1470_vm8, %v1451_v21, %v4870_v50 }
 0x12d   : > { %v6337_v63 = vpop.permute.xlu1 %4892  ;;  %v1485_v13 = vsel %vm1470_vm8, %v1452_v8, %v4879_v9  ;;  %v1486_v0 = vsel %vm1470_vm8, %v1453_v18, %v4880_v40  ;;  %v1461_v8 = vsel %vm1437_vm7, %v6369_v1, %v4865_v52 }
 0x12e   : > { %v6339_v54 = vpop.permute.xlu0 %4887  ;;  %v4895_v26 = vunpack.i.h.bf16 %v6337_v63  ;;  %v4894_v23 = vunpack.i.l.bf16 %v6337_v63 }
 0x12f   : > { %v4890_v24 = vunpack.i.h.bf16 %v6339_v54  ;;  %v4889_v42 = vunpack.i.l.bf16 %v6339_v54 }
 0x130   : > { %v1524_v4 = vsel %vm1503_vm9, %v1491_v32, %v4894_v23  ;;  %v1525_v35 = vsel %vm1503_vm9, %v1492_v3, %v4895_v26  ;;  %v1494_v26 = vsel %vm1470_vm8, %v1461_v8, %v4885_v45 }
 0x131   : > { %v6357_v33 = vpop.permute.xlu1 %4902  ;;  %v1516_v27 = vsel %vm1503_vm9, %v1483_v39, %v4889_v42  ;;  %v1517_v5 = vsel %vm1503_vm9, %v1484_v16, %v4890_v24 }
 0x132   : > { %v6359_v60 = vpop.permute.xlu0 %4897  ;;  %v4905_v34 = vunpack.i.h.bf16 %v6357_v33  ;;  %v4904_v43 = vunpack.i.l.bf16 %v6357_v33  ;;  %v1460_v33 = vsel %vm1437_vm7, %v6366_v41, %v4864_v6 }
 0x133   : > { %v4900_v28 = vunpack.i.h.bf16 %v6359_v60  ;;  %v4899_v36 = vunpack.i.l.bf16 %v6359_v60  ;;  %v1493_v9 = vsel %vm1470_vm8, %v1460_v33, %v4884_v38 }
 0x134   : > { %v1526_v32 = vsel %vm1503_vm9, %v1493_v9, %v4904_v43  ;;  %v1527_v41 = vsel %vm1503_vm9, %v1494_v26, %v4905_v34 }
 0x135   : > { %v4913_v49 = vpop.permute.xlu1 %4912  ;;  %v1518_v15 = vsel %vm1503_vm9, %v1485_v13, %v4899_v36  ;;  %v1519_v21 = vsel %vm1503_vm9, %v1486_v0, %v4900_v28 }
 0x136   : > { %v4908_v47 = vpop.permute.xlu0 %4907  ;;  %v4915_v31 = vunpack.i.h.bf16 %v4913_v49  ;;  %v4914_v10 = vunpack.i.l.bf16 %v4913_v49 }
 0x137   : > { %v4910_v63 = vunpack.i.h.bf16 %v4908_v47  ;;  %v4909_v54 = vunpack.i.l.bf16 %v4908_v47 }
 0x138   : > { %v1557_v37 = vsel %vm1536_vm10, %v1524_v4, %v4914_v10  ;;  %v1558_v61 = vsel %vm1536_vm10, %v1525_v35, %v4915_v31 }
 0x139   : > { %v6395_v59 = vpop.permute.xlu1 %4922  ;;  %v1549_v57 = vsel %vm1536_vm10, %v1516_v27, %v4909_v54  ;;  %v1550_v30 = vsel %vm1536_vm10, %v1517_v5, %v4910_v63 }
 0x13a   : > { %v4918_v51 = vpop.permute.xlu0 %4917  ;;  %v4925_v49 = vunpack.i.h.bf16 %v6395_v59  ;;  %v4924_v47 = vunpack.i.l.bf16 %v6395_v59 }
 0x13b   : > { %v4920_v7 = vunpack.i.h.bf16 %v4918_v51  ;;  %v4919_v46 = vunpack.i.l.bf16 %v4918_v51 }
 0x13c   : > { %v1559_v3 = vsel %vm1536_vm10, %v1526_v32, %v4924_v47  ;;  %v1560_v1 = vsel %vm1536_vm10, %v1527_v41, %v4925_v49 }
 0x13d   : > { %v4933_v44 = vpop.permute.xlu1 %4932  ;;  %v1551_v50 = vsel %vm1536_vm10, %v1518_v15, %v4919_v46  ;;  %v1552_v22 = vsel %vm1536_vm10, %v1519_v21, %v4920_v7  ;;  %v5310_v46 = vld [vmem:[%s5401_s29 + $0x128] sm:$0xff] }
 0x13e   : > { %v4928_v56 = vpop.permute.xlu0 %4927  ;;  %v4935_v58 = vunpack.i.h.bf16 %v4933_v44  ;;  %v4934_v62 = vunpack.i.l.bf16 %v4933_v44 }
 0x13f   : > { %v4930_v29 = vunpack.i.h.bf16 %v4928_v56  ;;  %v4929_v48 = vunpack.i.l.bf16 %v4928_v56 }
 0x140   : > { %v1590_v14 = vsel %vm1569_vm11, %v1557_v37, %v4934_v62  ;;  %v1591_v60 = vsel %vm1569_vm11, %v1558_v61, %v4935_v58  ;;  %v1950_v58 = vlaneseq  ;;  %v5308_v62 = vld [vmem:[%s5401_s29 + $0x140] sm:$0xff] }
 0x141   : > { %v1582_v17 = vsel %vm1569_vm11, %v1549_v57, %v4929_v48  ;;  %v1583_v11 = vsel %vm1569_vm11, %v1550_v30, %v4930_v29  ;;  %v1612_v53 = vpack.c.bf16 %v1591_v60, %v1590_v14  ;;  %v4943_v19 = vpop.permute.xlu1 %4942  ;;  %v5309_v48 = vld [vmem:[%s5401_s29 + $0x138] sm:$0xff]  ;;  %v5311_v60 = vld [vmem:[%s5401_s29 + $0x120] sm:$0xff] }
 0x142   : > { %v1608_v2 = vpack.c.bf16 %v1583_v11, %v1582_v17  ;;  %v6419_v20 = vpop.permute.xlu0 %4937  ;;  %v4945_v25 = vunpack.i.h.bf16 %v4943_v19  ;;  %v4944_v12 = vunpack.i.l.bf16 %v4943_v19 }
 0x143   : > { %4425 = vmatprep.mubr.msk.bf16.mxu1 %vm1632_vm12, %v1612_v53  ;;  %v4940_v4 = vunpack.i.h.bf16 %v6419_v20  ;;  %v4939_v35 = vunpack.i.l.bf16 %v6419_v20 }
 0x144   : > { %4417 = vmatprep.mubr.msk.bf16.mxu0 %vm1632_vm12, %v1608_v2  ;;  %v1584_v18 = vsel %vm1569_vm11, %v1551_v50, %v4944_v12  ;;  %v1585_v40 = vsel %vm1569_vm11, %v1552_v22, %v4945_v25 }
 0x145   : > { %v1609_v23 = vpack.c.bf16 %v1585_v40, %v1584_v18  ;;  %v4953_v24 = vpop.permute.xlu1 %4952  ;;  %v1364_v14 = vsel %vm1338_vm4, %v5310_v46, %v4940_v4  ;;  %v1363_v17 = vsel %vm1338_vm4, %v5311_v60, %v4939_v35 }
 0x146   : > { %v4948_v42 = vpop.permute.xlu0 %4947  ;;  %v4955_v63 = vunpack.i.h.bf16 %v4953_v24  ;;  %v4954_v54 = vunpack.i.l.bf16 %v4953_v24 }
 0x147   : > { %v4950_v6 = vunpack.i.h.bf16 %v4948_v42  ;;  %v4949_v55 = vunpack.i.l.bf16 %v4948_v42  ;;  %4418 = vmatmul.mubr.msk.bf16.gmra.mxu0 %vm1632_vm12, %v1609_v23 }
 0x148   : > { %v1366_v29 = vsel %vm1338_vm4, %v5308_v62, %v4955_v63  ;;  %v1365_v57 = vsel %vm1338_vm4, %v5309_v48, %v4954_v54 }
 0x149   : > { %v1593_v52 = vsel %vm1569_vm11, %v1560_v1, %v4950_v6  ;;  %v1592_v31 = vsel %vm1569_vm11, %v1559_v3, %v4949_v55  ;;  %v4963_v59 = vpop.permute.xlu1 %4962 }
 0x14a   : > { %v1613_v10 = vpack.c.bf16 %v1593_v52, %v1592_v31  ;;  %v4958_v51 = vpop.permute.xlu0 %4957  ;;  %v4965_v27 = vunpack.i.h.bf16 %v4963_v59  ;;  %v4964_v5 = vunpack.i.l.bf16 %v4963_v59 }
 0x14b   : > { %v4960_v28 = vunpack.i.h.bf16 %v4958_v51  ;;  %v4959_v36 = vunpack.i.l.bf16 %v4958_v51 }
 0x14c   : > { %4426 = vmatmul.mubr.msk.bf16.gmra.mxu1 %vm1632_vm12, %v1613_v10  ;;  %v1398_v11 = vsel %vm1371_vm5, %v1365_v57, %v4964_v5  ;;  %v1399_v34 = vsel %vm1371_vm5, %v1366_v29, %v4965_v27 }
 0x14d   : > { %v4973_v39 = vpop.permute.xlu1 %4972  ;;  %v1396_v43 = vsel %vm1371_vm5, %v1363_v17, %v4959_v36  ;;  %v1397_v53 = vsel %vm1371_vm5, %v1364_v14, %v4960_v28  ;;  %v5339_v28 = vmov 1983009808  }
 0x14e   : > { %v4968_v16 = vpop.permute.xlu0 %4967  ;;  %v4975_v37 = vunpack.i.h.bf16 %v4973_v39  ;;  %v4974_v61 = vunpack.i.l.bf16 %v4973_v39  ;;  %v1948_v36 = vunpack.c.l.s4 %v5339_v28 }
 0x14f   : > { %v4970_v30 = vunpack.i.h.bf16 %v4968_v16  ;;  %v4969_v7 = vunpack.i.l.bf16 %v4968_v16 }
 0x150   : > { %v1431_v20 = vsel %vm1404_vm6, %v1398_v11, %v4974_v61  ;;  %v1432_v15 = vsel %vm1404_vm6, %v1399_v34, %v4975_v37  ;;  %v1949_v11 = vunpack.c.0.s8 %v1948_v36 }
 0x151   : > { %v6449_v45 = vpop.permute.xlu1 %4982  ;;  %v1429_v47 = vsel %vm1404_vm6, %v1396_v43, %v4969_v7  ;;  %v1430_v50 = vsel %vm1404_vm6, %v1397_v53, %v4970_v30  ;;  %v6501_v30 = vshrl.u32 %v1950_v58, 7  ;;  %v6506_v53 = vld [vmem:[%s7416_s2] ss:$0 sm:$0xff] }
 0x152   : > { %v4978_v38 = vpop.permute.xlu0 %4977  ;;  %v4985_v8 = vunpack.i.h.bf16 %v6449_v45  ;;  %v4984_v18 = vunpack.i.l.bf16 %v6449_v45 }
 0x153   : > { %v4980_v2 = vunpack.i.h.bf16 %v4978_v38  ;;  %v4979_v19 = vunpack.i.l.bf16 %v4978_v38 }
 0x154   : > { %v1464_v38 = vsel %vm1437_vm7, %v1431_v20, %v4984_v18 }
 0x155   : > { %v6451_v13 = vpop.permute.xlu1 %4992  ;;  %v1462_v26 = vsel %vm1437_vm7, %v1429_v47, %v4979_v19  ;;  %v1463_v23 = vsel %vm1437_vm7, %v1430_v50, %v4980_v2 }
 0x156   : > { %v4988_v0 = vpop.permute.xlu0 %4987  ;;  %v4995_v24 = vunpack.i.h.bf16 %v6451_v13  ;;  %v4994_v42 = vunpack.i.l.bf16 %v6451_v13  ;;  %v1465_v13 = vsel %vm1437_vm7, %v1432_v15, %v4985_v8  ;;  %v5314_v8 = vld [vmem:[%s5401_s29 + $0x170] sm:$0xff] }
 0x157   : > { %v4990_v21 = vunpack.i.h.bf16 %v4988_v0  ;;  %v4989_v25 = vunpack.i.l.bf16 %v4988_v0 }
 0x158   : > { %v1497_v54 = vsel %vm1470_vm8, %v1464_v38, %v4994_v42  ;;  %v1498_v4 = vsel %vm1470_vm8, %v1465_v13, %v4995_v24 }
 0x159   : > { %v6455_v44 = vpop.permute.xlu1 %5002  ;;  %v1495_v32 = vsel %vm1470_vm8, %v1462_v26, %v4989_v25  ;;  %v1496_v41 = vsel %vm1470_vm8, %v1463_v23, %v4990_v21  ;;  %v5312_v21 = vld [vmem:[%s5401_s29 + $0x158] sm:$0xff] }
 0x15a   : > { %v4998_v56 = vpop.permute.xlu0 %4997  ;;  %v5005_v6 = vunpack.i.h.bf16 %v6455_v44  ;;  %v5004_v55 = vunpack.i.l.bf16 %v6455_v44 }
 0x15b   : > { %v5000_v22 = vunpack.i.h.bf16 %v4998_v56  ;;  %v4999_v33 = vunpack.i.l.bf16 %v4998_v56 }
 0x15c   : > { %v1530_v37 = vsel %vm1503_vm9, %v1497_v54, %v5004_v55  ;;  %v1531_v61 = vsel %vm1503_vm9, %v1498_v4, %v5005_v6 }
 0x15d   : > { %v5013_v12 = vpop.permute.xlu1 %5012  ;;  %v1528_v52 = vsel %vm1503_vm9, %v1495_v32, %v4999_v33  ;;  %v1529_v31 = vsel %vm1503_vm9, %v1496_v41, %v5000_v22  ;;  %v6515_v33 = vsub.s32 %v1949_v11, %v6501_v30 }
 0x15e   : > { %v5008_v49 = vpop.permute.xlu0 %5007  ;;  %v5015_v51 = vunpack.i.h.bf16 %v5013_v12  ;;  %v5014_v39 = vunpack.i.l.bf16 %v5013_v12  ;;  %v5313_v12 = vld [vmem:[%s5401_s29 + $0x150] sm:$0xff] }
 0x15f   : > { %v5010_v40 = vunpack.i.h.bf16 %v5008_v49  ;;  %v5009_v9 = vunpack.i.l.bf16 %v5008_v49 }
 0x160   : > { %v1563_v62 = vsel %vm1536_vm10, %v1530_v37, %v5014_v39  ;;  %v1564_v29 = vsel %vm1536_vm10, %v1531_v61, %v5015_v51 }
 0x161   : > { %v5023_v3 = vpop.permute.xlu1 %5022  ;;  %v1561_v16 = vsel %vm1536_vm10, %v1528_v52, %v5009_v9  ;;  %v1562_v45 = vsel %vm1536_vm10, %v1529_v31, %v5010_v40  ;;  %v5315_v40 = vld [vmem:[%s5401_s29 + $0x168] sm:$0xff]  ;;  %s5344_s29 = smov 80  }
 0x162   : > { %v5018_v1 = vpop.permute.xlu0 %5017  ;;  %v5025_v7 = vunpack.i.h.bf16 %v5023_v3  ;;  %v5024_v46 = vunpack.i.l.bf16 %v5023_v3 }
 0x163   : > { %v5020_v10 = vunpack.i.h.bf16 %v5018_v1  ;;  %v5019_v59 = vunpack.i.l.bf16 %v5018_v1 }
 0x164   : > { %v1368_v25 = vsel %vm1338_vm4, %v5312_v21, %v5025_v7  ;;  %v1367_v49 = vsel %vm1338_vm4, %v5313_v12, %v5024_v46 }
 0x165   : > { %v1594_v0 = vsel %vm1569_vm11, %v1561_v16, %v5019_v59  ;;  %v1595_v63 = vsel %vm1569_vm11, %v1562_v45, %v5020_v10  ;;  %v5033_v27 = vpop.permute.xlu1 %5032 }
 0x166   : > { %v1614_v35 = vpack.c.bf16 %v1595_v63, %v1594_v0  ;;  %v5028_v5 = vpop.permute.xlu0 %5027  ;;  %v5035_v34 = vunpack.i.h.bf16 %v5033_v27  ;;  %v5034_v43 = vunpack.i.l.bf16 %v5033_v27 }
 0x167   : > { %v5030_v44 = vunpack.i.h.bf16 %v5028_v5  ;;  %v5029_v56 = vunpack.i.l.bf16 %v5028_v5 }
 0x168   : > { %4429 = vmatprep.mubr.msk.bf16.mxu1 %vm1632_vm12, %v1614_v35  ;;  %v1370_v18 = vsel %vm1338_vm4, %v5314_v8, %v5035_v34  ;;  %v1369_v9 = vsel %vm1338_vm4, %v5315_v40, %v5034_v43  ;;  %vm2821_vm4 = vcmask 1044484  }
 0x169   : > { %v1597_v48 = vsel %vm1569_vm11, %v1564_v29, %v5030_v44  ;;  %v1596_v57 = vsel %vm1569_vm11, %v1563_v62, %v5029_v56  ;;  %v5043_v60 = vpop.permute.xlu1 %5042 }
 0x16a   : > { %v1615_v14 = vpack.c.bf16 %v1597_v48, %v1596_v57  ;;  %v5038_v17 = vpop.permute.xlu0 %5037  ;;  %v5045_v2 = vunpack.i.h.bf16 %v5043_v60  ;;  %v5044_v58 = vunpack.i.l.bf16 %v5043_v60 }
 0x16b   : > { %v5040_v19 = vunpack.i.h.bf16 %v5038_v17  ;;  %v5039_v20 = vunpack.i.l.bf16 %v5038_v17 }
 0x16c   : > { %4430 = vmatmul.mubr.msk.bf16.gmra.mxu1 %vm1632_vm12, %v1615_v14  ;;  %v4407_v15 = vpop.f32.mrf.mxu0  ;;  %v1402_v42 = vsel %vm1371_vm5, %v1369_v9, %v5044_v58  ;;  %v1403_v32 = vsel %vm1371_vm5, %v1370_v18, %v5045_v2 }
 0x16d   : > { %v1731_v47 = vadd.f32 %v4407_v15, %v6506_v53  ;;  %v5053_v50 = vpop.permute.xlu1 %5052  ;;  %v1401_v55 = vsel %vm1371_vm5, %v1368_v25, %v5040_v19  ;;  %v1400_v3 = vsel %vm1371_vm5, %v1367_v49, %v5039_v20  ;;  %vm2823_vm5 = vcmask 1045509  }
 0x16e   : > { %v5048_v22 = vpop.permute.xlu0 %5047  ;;  %v5055_v26 = vunpack.i.h.bf16 %v5053_v50  ;;  %v5054_v23 = vunpack.i.l.bf16 %v5053_v50  ;;  %v1722_v24 = vpop.f32.mrf.mxu0 }
 0x16f   : > { %v1851_v41 = vmax.f32 %v1731_v47, 0.0  ;;  %v1723_v6 = vadd.f32 %v6506_v53, %v1722_v24  ;;  %v5050_v1 = vunpack.i.h.bf16 %v5048_v22  ;;  %v5049_v52 = vunpack.i.l.bf16 %v5048_v22 }
 0x170   : > { %v4408_v31 = vpop.f32.mrf.mxu0  ;;  %v1435_v10 = vsel %vm1404_vm6, %v1402_v42, %v5054_v23  ;;  %v1436_v59 = vsel %vm1404_vm6, %v1403_v32, %v5055_v26 }
 0x171   : > { %v1849_v51 = vmax.f32 %v1723_v6, 0.0  ;;  %v1734_v39 = vadd.f32 %v4408_v31, %v6506_v53  ;;  %v5063_v16 = vpop.permute.xlu1 %5062  ;;  %v1883_v38 = vsel %vm1881_vm13, %v1851_v41, -inf  ;;  %v1433_v28 = vsel %vm1404_vm6, %v1400_v3, %v5049_v52 }
 0x172   : > { %v5058_v45 = vpop.permute.xlu0 %5057  ;;  %v5065_v13 = vunpack.i.h.bf16 %v5063_v16  ;;  %v5064_v0 = vunpack.i.l.bf16 %v5063_v16  ;;  %v1725_v54 = vpop.f32.mrf.mxu0  ;;  %v1434_v36 = vsel %vm1404_vm6, %v1401_v55, %v5050_v1  ;;  %vm2825_vm6 = vcmask 1046534  }
 0x173   : > { %v5059_v63 = vunpack.i.l.bf16 %v5058_v45  ;;  %v1882_v4 = vsel %vm1881_vm13, %v1849_v51, -inf  ;;  %v1852_v35 = vmax.f32 %v1734_v39, 0.0  ;;  %v5060_v27 = vunpack.i.h.bf16 %v5058_v45 }
 0x174   : > { %v1726_v5 = vadd.f32 %v6506_v53, %v1725_v54  ;;  %v1884_v37 = vmax.f32 %v1882_v4, %v1883_v38  ;;  %v1468_v61 = vsel %vm1437_vm7, %v1435_v10, %v5064_v0  ;;  %v1469_v56 = vsel %vm1437_vm7, %v1436_v59, %v5065_v13 }
 0x175   : > { %v1886_v44 = vsel %vm1881_vm13, %v1852_v35, -inf  ;;  %v1466_v62 = vsel %vm1437_vm7, %v1433_v28, %v5059_v63  ;;  %v5073_v48 = vpop.permute.xlu1 %5072  ;;  %v1467_v17 = vsel %vm1437_vm7, %v1434_v36, %v5060_v27  ;;  %vm2827_vm7 = vcmask 1047559  }
 0x176   : > { %v1850_v29 = vmax.f32 %v1726_v5, 0.0  ;;  %v5068_v57 = vpop.permute.xlu0 %5067  ;;  %v1946_v7 = vcombine.high %v1884_v37, %v1884_v37  ;;  %v1953_v46 = vrot.slane %v1884_v37, %v6515_v33  ;;  %v5075_v14 = vunpack.i.h.bf16 %v5073_v48 }
 0x177   : > { %v5074_v60 = vunpack.i.l.bf16 %v5073_v48  ;;  %v5070_v34 = vunpack.i.h.bf16 %v5068_v57  ;;  %v5069_v43 = vunpack.i.l.bf16 %v5068_v57 }
 0x178   : > { %v1885_v11 = vsel %vm1881_vm13, %v1850_v29, -inf  ;;  %v1960_v2 = vrot.slane %v1946_v7, %v6515_v33  ;;  %v1961_v58 = vcombine.high %v1953_v46, %v1953_v46  ;;  %v2283_v19 = vsel %vm2282_vm14, %v1953_v46, -inf }
 0x179   : > { %v1887_v20 = vmax.f32 %v1885_v11, %v1886_v44  ;;  %v2284_v15 = vrot.slane %v2283_v19, 4  ;;  %v6544_v21 = vsel %vm1470_vm8, %v1468_v61, %v5074_v60  ;;  %v6547_v25 = vsel %vm1470_vm8, %v1469_v56, %v5075_v14  ;;  %v6552_v49 = vpop.permute.xlu1 %5082 }
 0x17a   : > { %v6550_v12 = vsel %vm1470_vm8, %v1466_v62, %v5069_v43  ;;  %v1962_v47 = vcombine.high %v1960_v2, %v1960_v2  ;;  %v2290_v50 = vsel %vm2282_vm14, %v1961_v58, -inf  ;;  %v2297_v22 = vsel %vm2282_vm14, %v1960_v2, -inf  ;;  %v5078_v45 = vpop.permute.xlu0 %5077 }
 0x17b   : > { %v1963_v8 = vcombine.high %v1887_v20, %v1887_v20  ;;  %v2285_v18 = vmax.f32 %v2283_v19, %v2284_v15  ;;  %v2291_v40 = vrot.slane %v2290_v50, 4  ;;  %v2298_v9 = vrot.slane %v2297_v22, 4 }
 0x17c   : > { %v1970_v26 = vrot.slane %v1887_v20, %v6515_v33  ;;  %v2304_v23 = vsel %vm2282_vm14, %v1962_v47, -inf  ;;  %v6560_v42 = vsel %vm1470_vm8, %v1467_v17, %v5070_v34  ;;  %v5085_v32 = vunpack.i.h.bf16 %v6552_v49 }
 0x17d   : > { %v1977_v24 = vrot.slane %v1963_v8, %v6515_v33  ;;  %v2286_v41 = vrot.slane %v2285_v18, 2  ;;  %v2292_v6 = vmax.f32 %v2290_v50, %v2291_v40  ;;  %v2299_v55 = vmax.f32 %v2297_v22, %v2298_v9  ;;  %v5093_v46 = vpop.permute.xlu1 %5092 }
 0x17e   : > { %v2305_v3 = vrot.slane %v2304_v23, 4  ;;  %v1978_v1 = vcombine.high %v1970_v26, %v1970_v26  ;;  %v2311_v31 = vsel %vm2282_vm14, %v1970_v26, -inf  ;;  %v5084_v11 = vunpack.i.l.bf16 %v6552_v49  ;;  %v5088_v34 = vpop.permute.xlu0 %5087 }
 0x17f   : > { %v1979_v52 = vcombine.high %v1977_v24, %v1977_v24  ;;  %v2325_v10 = vsel %vm2282_vm14, %v1977_v24, -inf  ;;  %v2287_v59 = vmax.f32 %v2285_v18, %v2286_v41  ;;  %v2293_v51 = vrot.slane %v2292_v6, 2 }
 0x180   : > { %v2300_v39 = vrot.slane %v2299_v55, 2  ;;  %v2306_v16 = vmax.f32 %v2304_v23, %v2305_v3  ;;  %v2312_v38 = vrot.slane %v2311_v31, 4  ;;  %v2318_v13 = vsel %vm2282_vm14, %v1978_v1, -inf }
 0x181   : > { %v2326_v0 = vrot.slane %v2325_v10, 4  ;;  %v2332_v63 = vsel %vm2282_vm14, %v1979_v52, -inf  ;;  %v2288_v54 = vrot.slane %v2287_v59, 1  ;;  %v2294_v4 = vmax.f32 %v2292_v6, %v2293_v51  ;;  %v5103_v3 = vpop.permute.xlu1 %5102 }
 0x182   : > { %v2301_v35 = vmax.f32 %v2299_v55, %v2300_v39  ;;  %v2307_v27 = vrot.slane %v2306_v16, 2  ;;  %v2313_v5 = vmax.f32 %v2311_v31, %v2312_v38  ;;  %v2319_v28 = vrot.slane %v2318_v13, 4  ;;  %v5098_v52 = vpop.permute.xlu0 %5097 }
 0x183   : > { %v2327_v36 = vmax.f32 %v2325_v10, %v2326_v0  ;;  %v2333_v37 = vrot.slane %v2332_v63, 4  ;;  %v2289_v61 = vmax.f32 %v2287_v59, %v2288_v54  ;;  %v2295_v44 = vrot.slane %v2294_v4, 1 }
 0x184   : > { %v2302_v56 = vrot.slane %v2301_v35, 1  ;;  %v2308_v62 = vmax.f32 %v2306_v16, %v2307_v27  ;;  %v2314_v29 = vrot.slane %v2313_v5, 2  ;;  %v2320_v48 = vmax.f32 %v2318_v13, %v2319_v28  ;;  %v2895_v28 = vld [vmem:[#allocation2] sm:$0xff] }
 0x185   : > { %v2328_v57 = vrot.slane %v2327_v36, 2  ;;  %v2334_v7 = vmax.f32 %v2332_v63, %v2333_v37  ;;  %v2296_v14 = vmax.f32 %v2294_v4, %v2295_v44  ;;  %v1534_v47 = vsel %vm1503_vm9, %v6544_v21, %v5084_v11 }
 0x186   : > { %v2303_v60 = vmax.f32 %v2301_v35, %v2302_v56  ;;  %v2309_v17 = vrot.slane %v2308_v62, 1  ;;  %v2315_v43 = vmax.f32 %v2313_v5, %v2314_v29  ;;  %v2321_v2 = vrot.slane %v2320_v48, 2 }
 0x187   : > { %v2329_v58 = vmax.f32 %v2327_v36, %v2328_v57  ;;  %v2335_v19 = vrot.slane %v2334_v7, 2  ;;  %v2816_v15 = vsel %vm2815_vm15, %v2296_v14, %v2289_v61  ;;  %v1535_v50 = vsel %vm1503_vm9, %v6547_v25, %v5085_v32 }
 0x188   : > { %v2310_v20 = vmax.f32 %v2308_v62, %v2309_v17  ;;  %v2818_v22 = vsel %vm2817_vm2, %v2303_v60, %v2816_v15  ;;  %v2316_v8 = vrot.slane %v2315_v43, 1  ;;  %v2322_v18 = vmax.f32 %v2320_v48, %v2321_v2  ;;  %v2896_v62 = vld [vmem:[#allocation2 + $0x8] sm:$0x3] }
 0x189   : > { %v2330_v40 = vrot.slane %v2329_v58, 1  ;;  %v2336_v49 = vmax.f32 %v2334_v7, %v2335_v19  ;;  %v5080_v26 = vunpack.i.h.bf16 %v5078_v45  ;;  %v5079_v23 = vunpack.i.l.bf16 %v5078_v45 }
 0x18a   : > { %v2820_v9 = vsel %vm2819_vm3, %v2310_v20, %v2818_v22  ;;  %v2317_v24 = vmax.f32 %v2315_v43, %v2316_v8  ;;  %v2323_v41 = vrot.slane %v2322_v18, 1  ;;  %v5095_v55 = vunpack.i.h.bf16 %v5093_v46 }
 0x18b   : > { %v2331_v6 = vmax.f32 %v2329_v58, %v2330_v40  ;;  %v2337_v1 = vrot.slane %v2336_v49, 1  ;;  %v1532_v21 = vsel %vm1503_vm9, %v6550_v12, %v5079_v23  ;;  %v1533_v25 = vsel %vm1503_vm9, %v6560_v42, %v5080_v26  ;;  %v4411_v39 = vpop.f32.mrf.mxu0 }
 0x18c   : > { %v5094_v32 = vunpack.i.l.bf16 %v5093_v46  ;;  %v2324_v31 = vmax.f32 %v2322_v18, %v2323_v41  ;;  %v2822_v10 = vsel %vm2821_vm4, %v2317_v24, %v2820_v9  ;;  %v1568_v59 = vsel %vm1536_vm10, %v1535_v50, %v5095_v55 }
 0x18d   : > { %v5090_v51 = vunpack.i.h.bf16 %v5088_v34  ;;  %v2338_v16 = vmax.f32 %v2336_v49, %v2337_v1  ;;  %v5089_v38 = vunpack.i.l.bf16 %v5088_v34  ;;  %v5105_v13 = vunpack.i.h.bf16 %v5103_v3  ;;  %v1738_v54 = vpop.f32.mrf.mxu0 }
 0x18e   : > { %v1567_v45 = vsel %vm1536_vm10, %v1534_v47, %v5094_v32  ;;  %v2824_v0 = vsel %vm2823_vm5, %v2324_v31, %v2822_v10  ;;  %v5104_v63 = vunpack.i.l.bf16 %v5103_v3  ;;  %v5100_v42 = vunpack.i.h.bf16 %v5098_v52 }
 0x18f   : > { %v1566_v12 = vsel %vm1536_vm10, %v1533_v25, %v5090_v51  ;;  %v2826_v4 = vsel %vm2825_vm6, %v2331_v6, %v2824_v0  ;;  %v1565_v35 = vsel %vm1536_vm10, %v1532_v21, %v5089_v38  ;;  %v1601_v27 = vsel %vm1569_vm11, %v1568_v59, %v5105_v13  ;;  %v4412_v56 = vpop.f32.mrf.mxu0 }
 0x190   : > { %v5099_v5 = vunpack.i.l.bf16 %v5098_v52  ;;  %v2828_v36 = vsel %vm2827_vm7, %v2338_v16, %v2826_v4  ;;  %v1600_v37 = vsel %vm1569_vm11, %v1567_v45, %v5104_v63  ;;  %v1599_v61 = vsel %vm1569_vm11, %v1566_v12, %v5100_v42 }
 0x191   : > { %v1747_v44 = vadd.f32 %v4411_v39, %v6506_v53  ;;  %2887 = vst.msk [vmem:[#allocation2 + $0x11] sm:$0xff] %vm1881_vm13, %v2828_v36  ;;  %v1617_v29 = vpack.c.bf16 %v1601_v27, %v1600_v37  ;;  %v1739_v57 = vadd.f32 %v6506_v53, %v1738_v54  ;;  %v1750_v7 = vadd.f32 %v4412_v56, %v6506_v53  ;;  %v1741_v60 = vpop.f32.mrf.mxu0 }
 0x192   : > { %v1598_v48 = vsel %vm1569_vm11, %v1565_v35, %v5099_v5  ;;  %v2979_v17 = vrot.slane %v2895_v28, 2  ;;  %v1742_v43 = vadd.f32 %v6506_v53, %v1741_v60  ;;  %v2980_v2 = vrot.slane %v2896_v62, 2 }
 0x193   : > { %v1616_v46 = vpack.c.bf16 %v1599_v61, %v1598_v48  ;;  %v1855_v14 = vmax.f32 %v1747_v44, 0.0  ;;  %v1853_v11 = vmax.f32 %v1739_v57, 0.0  ;;  %v1856_v34 = vmax.f32 %v1750_v7, 0.0 }
 0x194   : > { %v2931_v58 = vrot.slane %v2895_v28, 1  ;;  %v2932_v19 = vrot.slane %v2896_v62, 1  ;;  %v1854_v47 = vmax.f32 %v1742_v43, 0.0  ;;  %v6603_v18 = vsel %vm559_vm0, %v2979_v17, %v2980_v2 }
 0x195   : > { %4433 = vmatprep.mubr.msk.bf16.mxu1 %vm1632_vm12, %v1616_v46  ;;  %v1889_v20 = vsel %vm1881_vm13, %v1855_v14, -inf  ;;  %v1888_v15 = vsel %vm1881_vm13, %v1853_v11, -inf  ;;  %v1892_v22 = vsel %vm1881_vm13, %v1856_v34, -inf  ;;  %vm3188_vm8 = vcmask 392192  }
 0x196   : > { %4434 = vmatmul.mubr.msk.bf16.gmra.mxu1 %vm1632_vm12, %v1617_v29  ;;  %v1890_v50 = vmax.f32 %v1888_v15, %v1889_v20  ;;  %v1891_v8 = vsel %vm1881_vm13, %v1854_v47, -inf  ;;  %v6609_v24 = vsel %vm382_vm1, %v2931_v58, %v2932_v19  ;;  %vm3197_vm9 = vcmask 523264  }
 0x197   : > { %v1893_v9 = vmax.f32 %v1891_v8, %v1892_v22  ;;  %vm3206_vm10 = vcmask 654336   ;;  %vm3215_vm11 = vcmask 785408   ;;  %vm3224_vm12 = vcmask 916480  }
 0x198   : > { %v1980_v40 = vcombine.high %v1890_v50, %v1890_v50  ;;  %v1987_v49 = vrot.slane %v1890_v50, %v6515_v33  ;;  %v6606_v26 = vld [vmem:[#allocation2 + $0x10] sm:$0xff]  ;;  %v2898_v23 = vld [vmem:[#allocation2 + $0x18] sm:$0x3] }
 0x199   : > { %v2982_v41 = vrot.slane %v6606_v26, 2  ;;  %v2983_v6 = vrot.slane %v2898_v23, 2  ;;  %v2934_v55 = vrot.slane %v6606_v26, 1  ;;  %v2935_v3 = vrot.slane %v2898_v23, 1 }
 0x19a   : > { %v1994_v1 = vrot.slane %v1980_v40, %v6515_v33  ;;  %v1995_v21 = vcombine.high %v1987_v49, %v1987_v49  ;;  %v2339_v25 = vsel %vm2282_vm14, %v1987_v49, -inf  ;;  %v1997_v32 = vcombine.high %v1893_v9, %v1893_v9 }
 0x19b   : > { %v2340_v52 = vrot.slane %v2339_v25, 4  ;;  %v2004_v31 = vrot.slane %v1893_v9, %v6515_v33  ;;  %v6617_v10 = vsel %vm559_vm0, %v2982_v41, %v2983_v6  ;;  %v6620_v59 = vsel %vm382_vm1, %v2934_v55, %v2935_v3 }
 0x19c   : > { %v1996_v51 = vcombine.high %v1994_v1, %v1994_v1  ;;  %v2346_v39 = vsel %vm2282_vm14, %v1995_v21, -inf  ;;  %v2353_v16 = vsel %vm2282_vm14, %v1994_v1, -inf  ;;  %v2011_v45 = vrot.slane %v1997_v32, %v6515_v33 }
 0x19d   : > { %v2341_v38 = vmax.f32 %v2339_v25, %v2340_v52  ;;  %v2347_v13 = vrot.slane %v2346_v39, 4  ;;  %v2354_v0 = vrot.slane %v2353_v16, 4  ;;  %v2012_v12 = vcombine.high %v2004_v31, %v2004_v31 }
 0x19e   : > { %v2360_v63 = vsel %vm2282_vm14, %v1996_v51, -inf  ;;  %v2013_v42 = vcombine.high %v2011_v45, %v2011_v45  ;;  %v2367_v54 = vsel %vm2282_vm14, %v2004_v31, -inf  ;;  %v2381_v4 = vsel %vm2282_vm14, %v2011_v45, -inf }
 0x19f   : > { %v2342_v35 = vrot.slane %v2341_v38, 2  ;;  %v2348_v27 = vmax.f32 %v2346_v39, %v2347_v13  ;;  %v2355_v5 = vmax.f32 %v2353_v16, %v2354_v0  ;;  %v2361_v28 = vrot.slane %v2360_v63, 4 }
 0x1a0   : > { %v2368_v36 = vrot.slane %v2367_v54, 4  ;;  %v2374_v37 = vsel %vm2282_vm14, %v2012_v12, -inf  ;;  %v2382_v61 = vrot.slane %v2381_v4, 4  ;;  %v2388_v44 = vsel %vm2282_vm14, %v2013_v42, -inf }
 0x1a1   : > { %v2343_v56 = vmax.f32 %v2341_v38, %v2342_v35  ;;  %v2349_v62 = vrot.slane %v2348_v27, 2  ;;  %v2356_v29 = vrot.slane %v2355_v5, 2  ;;  %v2362_v48 = vmax.f32 %v2360_v63, %v2361_v28 }
 0x1a2   : > { %v2369_v57 = vmax.f32 %v2367_v54, %v2368_v36  ;;  %v2375_v7 = vrot.slane %v2374_v37, 4  ;;  %v2383_v46 = vmax.f32 %v2381_v4, %v2382_v61  ;;  %v2389_v14 = vrot.slane %v2388_v44, 4 }
 0x1a3   : > { %v2344_v60 = vrot.slane %v2343_v56, 1  ;;  %v2350_v17 = vmax.f32 %v2348_v27, %v2349_v62  ;;  %v2357_v11 = vmax.f32 %v2355_v5, %v2356_v29  ;;  %v2363_v34 = vrot.slane %v2362_v48, 2 }
 0x1a4   : > { %v2370_v43 = vrot.slane %v2369_v57, 2  ;;  %v2376_v2 = vmax.f32 %v2374_v37, %v2375_v7  ;;  %v2384_v58 = vrot.slane %v2383_v46, 2  ;;  %v2390_v19 = vmax.f32 %v2388_v44, %v2389_v14 }
 0x1a5   : > { %v2345_v20 = vmax.f32 %v2343_v56, %v2344_v60  ;;  %v2351_v15 = vrot.slane %v2350_v17, 1  ;;  %v2358_v47 = vrot.slane %v2357_v11, 1  ;;  %v2364_v50 = vmax.f32 %v2362_v48, %v2363_v34 }
 0x1a6   : > { %v2371_v22 = vmax.f32 %v2369_v57, %v2370_v43  ;;  %v2377_v8 = vrot.slane %v2376_v2, 2  ;;  %v2385_v40 = vmax.f32 %v2383_v46, %v2384_v58  ;;  %v2391_v49 = vrot.slane %v2390_v19, 2 }
 0x1a7   : > { %v2352_v9 = vmax.f32 %v2350_v17, %v2351_v15  ;;  %v2359_v23 = vmax.f32 %v2357_v11, %v2358_v47  ;;  %v2365_v41 = vrot.slane %v2364_v50, 1  ;;  %v5111_v6 = vpack.i.bf16 %v6617_v10, %v6603_v18 }
 0x1a8   : > { %v2372_v55 = vrot.slane %v2371_v22, 1  ;;  %v2378_v3 = vmax.f32 %v2376_v2, %v2377_v8  ;;  %v2386_v1 = vrot.slane %v2385_v40, 1  ;;  %v2392_v21 = vmax.f32 %v2390_v19, %v2391_v49 }
 0x1a9   : > { %v2366_v25 = vmax.f32 %v2364_v50, %v2365_v41  ;;  %v2829_v32 = vsel %vm2815_vm15, %v2352_v9, %v2345_v20  ;;  %5112 = vrot.lane.b32.xlu1 %v5111_v6, %s5340_s19  ;;  %v5106_v52 = vpack.i.bf16 %v6620_v59, %v6609_v24 }
 0x1aa   : > { %v2830_v31 = vsel %vm2817_vm2, %v2359_v23, %v2829_v32  ;;  %v2373_v51 = vmax.f32 %v2371_v22, %v2372_v55  ;;  %v2379_v39 = vrot.slane %v2378_v3, 1  ;;  %v2387_v16 = vmax.f32 %v2385_v40, %v2386_v1 }
 0x1ab   : > { %v2393_v45 = vrot.slane %v2392_v21, 1  ;;  %v2831_v18 = vsel %vm2819_vm3, %v2366_v25, %v2830_v31  ;;  %5107 = vrot.lane.b32.xlu0 %v5106_v52, %s5341_s20 }
 0x1ac   : > { %v2380_v38 = vmax.f32 %v2378_v3, %v2379_v39  ;;  %v2832_v13 = vsel %vm2821_vm4, %v2373_v51, %v2831_v18 }
 0x1ad   : > { %v2394_v0 = vmax.f32 %v2392_v21, %v2393_v45 }
 0x1ae   : > { %v2833_v12 = vsel %vm2823_vm5, %v2380_v38, %v2832_v13 }
 0x1af   : > { %v2834_v63 = vsel %vm2825_vm6, %v2387_v16, %v2833_v12 }
 0x1b0   : > { %v2835_v24 = vsel %vm2827_vm7, %v2394_v0, %v2834_v63 }
 0x1b1   : > { %2888 = vst.msk [vmem:[#allocation2 + $0x21] sm:$0xff] %vm1881_vm13, %v2835_v24 }
 0x1b8   : > { %v6644_v42 = vld [vmem:[#allocation2 + $0x20] sm:$0xff]  ;;  %v6646_v54 = vld [vmem:[#allocation2 + $0x28] sm:$0x3] }
 0x1b9   : > { %v5116_v4 = vpack.i.bf16 %v6644_v42, %v6606_v26  ;;  %v2937_v35 = vrot.slane %v6644_v42, 1  ;;  %v2938_v27 = vrot.slane %v6646_v54, 1 }
 0x1bb   : > { %5117 = vrot.lane.b32.xlu0 %v5116_v4, %s5342_s21  ;;  %v6654_v5 = vsel %vm382_vm1, %v2937_v35, %v2938_v27 }
 0x1bc   : > { %v5126_v28 = vpack.i.bf16 %v6654_v5, %v6620_v59 }
 0x1be   : > { %5127 = vrot.lane.b32.xlu1 %v5126_v28, %s5343_s22 }
 0x1cb   : > { %v4423_v26 = vpop.f32.mrf.mxu1 }
 0x1cc   : > { %v4415_v36 = vpop.f32.mrf.mxu0  ;;  %v1795_v61 = vadd.f32 %v4423_v26, %v6506_v53 }
 0x1cd   : > { %v1763_v37 = vadd.f32 %v4415_v36, %v6506_v53  ;;  %v1786_v29 = vpop.f32.mrf.mxu1 }
 0x1ce   : > { %v1754_v44 = vpop.f32.mrf.mxu0  ;;  %v1867_v48 = vmax.f32 %v1795_v61, 0.0  ;;  %v1787_v57 = vadd.f32 %v6506_v53, %v1786_v29 }
 0x1cf   : > { %v1859_v56 = vmax.f32 %v1763_v37, 0.0  ;;  %v1755_v62 = vadd.f32 %v6506_v53, %v1754_v44  ;;  %v4424_v20 = vpop.f32.mrf.mxu1 }
 0x1d0   : > { %v4416_v7 = vpop.f32.mrf.mxu0  ;;  %v1865_v14 = vmax.f32 %v1787_v57, 0.0  ;;  %v1907_v2 = vsel %vm1881_vm13, %v1867_v48, -inf  ;;  %v1798_v9 = vadd.f32 %v4424_v20, %v6506_v53 }
 0x1d1   : > { %v1857_v46 = vmax.f32 %v1755_v62, 0.0  ;;  %v1766_v59 = vadd.f32 %v4416_v7, %v6506_v53  ;;  %v1895_v17 = vsel %vm1881_vm13, %v1859_v56, -inf  ;;  %v1789_v62 = vpop.f32.mrf.mxu1 }
 0x1d2   : > { %v1757_v60 = vpop.f32.mrf.mxu0  ;;  %v1906_v19 = vsel %vm1881_vm13, %v1865_v14, -inf }
 0x1d3   : > { %v1894_v11 = vsel %vm1881_vm13, %v1857_v46, -inf  ;;  %v1860_v34 = vmax.f32 %v1766_v59, 0.0  ;;  %v1758_v43 = vadd.f32 %v6506_v53, %v1757_v60  ;;  %v1908_v15 = vmax.f32 %v1906_v19, %v1907_v2 }
 0x1d4   : > { %v1896_v58 = vmax.f32 %v1894_v11, %v1895_v17 }
 0x1d5   : > { %v1858_v47 = vmax.f32 %v1758_v43, 0.0  ;;  %v2082_v8 = vcombine.high %v1908_v15, %v1908_v15  ;;  %v2089_v40 = vrot.slane %v1908_v15, %v6515_v33  ;;  %v1898_v49 = vsel %vm1881_vm13, %v1860_v34, -inf }
 0x1d6   : > { %v2014_v50 = vcombine.high %v1896_v58, %v1896_v58  ;;  %v2021_v22 = vrot.slane %v1896_v58, %v6515_v33  ;;  %v1868_v34 = vmax.f32 %v1798_v9, 0.0  ;;  %v1790_v43 = vadd.f32 %v6506_v53, %v1789_v62 }
 0x1d7   : > { %v1897_v55 = vsel %vm1881_vm13, %v1858_v47, -inf  ;;  %v2096_v1 = vrot.slane %v2082_v8, %v6515_v33  ;;  %v2097_v21 = vcombine.high %v2089_v40, %v2089_v40  ;;  %v2507_v25 = vsel %vm2282_vm14, %v2089_v40, -inf }
 0x1d8   : > { %v2028_v23 = vrot.slane %v2014_v50, %v6515_v33  ;;  %v2029_v41 = vcombine.high %v2021_v22, %v2021_v22  ;;  %v2395_v6 = vsel %vm2282_vm14, %v2021_v22, -inf  ;;  %v2508_v51 = vrot.slane %v2507_v25, 4 }
 0x1d9   : > { %v2396_v3 = vrot.slane %v2395_v6, 4  ;;  %v2098_v18 = vcombine.high %v2096_v1, %v2096_v1  ;;  %v2514_v0 = vsel %vm2282_vm14, %v2097_v21, -inf  ;;  %v2521_v12 = vsel %vm2282_vm14, %v2096_v1, -inf }
 0x1da   : > { %v2030_v32 = vcombine.high %v2028_v23, %v2028_v23  ;;  %v2402_v52 = vsel %vm2282_vm14, %v2029_v41, -inf  ;;  %v2409_v31 = vsel %vm2282_vm14, %v2028_v23, -inf  ;;  %v2509_v13 = vmax.f32 %v2507_v25, %v2508_v51 }
 0x1db   : > { %v2397_v39 = vmax.f32 %v2395_v6, %v2396_v3  ;;  %v2403_v16 = vrot.slane %v2402_v52, 4  ;;  %v2410_v45 = vrot.slane %v2409_v31, 4  ;;  %v2515_v28 = vrot.slane %v2514_v0, 4 }
 0x1dc   : > { %v2416_v38 = vsel %vm2282_vm14, %v2030_v32, -inf  ;;  %v2510_v27 = vrot.slane %v2509_v13, 2  ;;  %v2522_v36 = vrot.slane %v2521_v12, 4  ;;  %v2528_v37 = vsel %vm2282_vm14, %v2098_v18, -inf }
 0x1dd   : > { %v2398_v63 = vrot.slane %v2397_v39, 2  ;;  %v2404_v24 = vmax.f32 %v2402_v52, %v2403_v16  ;;  %v2411_v4 = vmax.f32 %v2409_v31, %v2410_v45  ;;  %v2417_v35 = vrot.slane %v2416_v38, 4 }
 0x1de   : > { %v2511_v29 = vmax.f32 %v2509_v13, %v2510_v27  ;;  %v2516_v48 = vmax.f32 %v2514_v0, %v2515_v28  ;;  %v2523_v57 = vmax.f32 %v2521_v12, %v2522_v36  ;;  %v2529_v7 = vrot.slane %v2528_v37, 4 }
 0x1df   : > { %v2399_v26 = vmax.f32 %v2397_v39, %v2398_v63  ;;  %v2405_v61 = vrot.slane %v2404_v24, 2  ;;  %v2412_v44 = vrot.slane %v2411_v4, 2  ;;  %v2418_v56 = vmax.f32 %v2416_v38, %v2417_v35 }
 0x1e0   : > { %v1899_v60 = vmax.f32 %v1897_v55, %v1898_v49  ;;  %v2517_v17 = vrot.slane %v2516_v48, 2  ;;  %v2524_v11 = vrot.slane %v2523_v57, 2  ;;  %v2512_v19 = vrot.slane %v2511_v29, 1 }
 0x1e1   : > { %v2406_v46 = vmax.f32 %v2404_v24, %v2405_v61  ;;  %v2413_v59 = vmax.f32 %v2411_v4, %v2412_v44  ;;  %v2419_v14 = vrot.slane %v2418_v56, 2  ;;  %v2400_v2 = vrot.slane %v2399_v26, 1 }
 0x1e2   : > { %v2530_v20 = vmax.f32 %v2528_v37, %v2529_v7  ;;  %v2518_v50 = vmax.f32 %v2516_v48, %v2517_v17  ;;  %v2525_v22 = vmax.f32 %v2523_v57, %v2524_v11  ;;  %v2031_v8 = vcombine.high %v1899_v60, %v1899_v60 }
 0x1e3   : > { %v2407_v58 = vrot.slane %v2406_v46, 1  ;;  %v2414_v15 = vrot.slane %v2413_v59, 1  ;;  %v2420_v47 = vmax.f32 %v2418_v56, %v2419_v14  ;;  %v1910_v23 = vsel %vm1881_vm13, %v1868_v34, -inf }
 0x1e4   : > { %v2038_v41 = vrot.slane %v1899_v60, %v6515_v33  ;;  %v1866_v49 = vmax.f32 %v1790_v43, 0.0  ;;  %v2401_v6 = vmax.f32 %v2399_v26, %v2400_v2  ;;  %v2519_v55 = vrot.slane %v2518_v50, 1 }
 0x1e5   : > { %v2408_v40 = vmax.f32 %v2406_v46, %v2407_v58  ;;  %v2531_v9 = vrot.slane %v2530_v20, 2  ;;  %v2045_v3 = vrot.slane %v2031_v8, %v6515_v33  ;;  %v2415_v1 = vmax.f32 %v2413_v59, %v2414_v15 }
 0x1e6   : > { %v2421_v21 = vrot.slane %v2420_v47, 1  ;;  %v2513_v25 = vmax.f32 %v2511_v29, %v2512_v19  ;;  %v2526_v32 = vrot.slane %v2525_v22, 1  ;;  %v2046_v52 = vcombine.high %v2038_v41, %v2038_v41 }
 0x1e7   : > { %v2047_v31 = vcombine.high %v2045_v3, %v2045_v3  ;;  %v2423_v51 = vsel %vm2282_vm14, %v2038_v41, -inf  ;;  %v2437_v39 = vsel %vm2282_vm14, %v2045_v3, -inf  ;;  %v2836_v16 = vsel %vm2815_vm15, %v2408_v40, %v2401_v6 }
 0x1e8   : > { %v2424_v45 = vrot.slane %v2423_v51, 4  ;;  %v2438_v18 = vrot.slane %v2437_v39, 4  ;;  %v1909_v38 = vsel %vm1881_vm13, %v1866_v49, -inf  ;;  %v2520_v13 = vmax.f32 %v2518_v50, %v2519_v55 }
 0x1e9   : > { %v2532_v0 = vmax.f32 %v2530_v20, %v2531_v9  ;;  %v2430_v12 = vsel %vm2282_vm14, %v2046_v52, -inf  ;;  %v2444_v63 = vsel %vm2282_vm14, %v2047_v31, -inf  ;;  %v2422_v28 = vmax.f32 %v2420_v47, %v2421_v21 }
 0x1ea   : > { %v2425_v24 = vmax.f32 %v2423_v51, %v2424_v45  ;;  %v2431_v4 = vrot.slane %v2430_v12, 4  ;;  %v2439_v35 = vmax.f32 %v2437_v39, %v2438_v18  ;;  %v2445_v27 = vrot.slane %v2444_v63, 4 }
 0x1eb   : > { %v2837_v36 = vsel %vm2817_vm2, %v2415_v1, %v2836_v16  ;;  %v2527_v37 = vmax.f32 %v2525_v22, %v2526_v32  ;;  %v1911_v26 = vmax.f32 %v1909_v38, %v1910_v23  ;;  %v2533_v29 = vrot.slane %v2532_v0, 1 }
 0x1ec   : > { %v2426_v61 = vrot.slane %v2425_v24, 2  ;;  %v2432_v44 = vmax.f32 %v2430_v12, %v2431_v4  ;;  %v2440_v56 = vrot.slane %v2439_v35, 2  ;;  %v2446_v62 = vmax.f32 %v2444_v63, %v2445_v27 }
 0x1ed   : > { %v2850_v48 = vsel %vm2815_vm15, %v2520_v13, %v2513_v25  ;;  %v2099_v57 = vcombine.high %v1911_v26, %v1911_v26  ;;  %v2106_v7 = vrot.slane %v1911_v26, %v6515_v33  ;;  %v2838_v17 = vsel %vm2819_vm3, %v2422_v28, %v2837_v36 }
 0x1ee   : > { %v2427_v46 = vmax.f32 %v2425_v24, %v2426_v61  ;;  %v2433_v59 = vrot.slane %v2432_v44, 2  ;;  %v2441_v14 = vmax.f32 %v2439_v35, %v2440_v56  ;;  %v2447_v60 = vrot.slane %v2446_v62, 2 }
 0x1ef   : > { %v2113_v11 = vrot.slane %v2099_v57, %v6515_v33  ;;  %v2114_v34 = vcombine.high %v2106_v7, %v2106_v7  ;;  %v2535_v43 = vsel %vm2282_vm14, %v2106_v7, -inf  ;;  %v2534_v51 = vmax.f32 %v2532_v0, %v2533_v29 }
 0x1f0   : > { %v2428_v2 = vrot.slane %v2427_v46, 1  ;;  %v2434_v58 = vmax.f32 %v2432_v44, %v2433_v59  ;;  %v2442_v19 = vrot.slane %v2441_v14, 1  ;;  %v2448_v20 = vmax.f32 %v2446_v62, %v2447_v60 }
 0x1f1   : > { %v2115_v15 = vcombine.high %v2113_v11, %v2113_v11  ;;  %v2536_v47 = vrot.slane %v2535_v43, 4  ;;  %v2542_v50 = vsel %vm2282_vm14, %v2114_v34, -inf  ;;  %v2549_v22 = vsel %vm2282_vm14, %v2113_v11, -inf }
 0x1f2   : > { %v2429_v8 = vmax.f32 %v2427_v46, %v2428_v2  ;;  %v2435_v40 = vrot.slane %v2434_v58, 1  ;;  %v2443_v23 = vmax.f32 %v2441_v14, %v2442_v19  ;;  %v2449_v41 = vrot.slane %v2448_v20, 1 }
 0x1f3   : > { %v2537_v49 = vmax.f32 %v2535_v43, %v2536_v47  ;;  %v2543_v6 = vrot.slane %v2542_v50, 4  ;;  %v2550_v55 = vrot.slane %v2549_v22, 4  ;;  %v2556_v9 = vsel %vm2282_vm14, %v2115_v15, -inf }
 0x1f4   : > { %v2436_v3 = vmax.f32 %v2434_v58, %v2435_v40  ;;  %v2450_v1 = vmax.f32 %v2448_v20, %v2449_v41  ;;  %v2839_v21 = vsel %vm2821_vm4, %v2429_v8, %v2838_v17  ;;  %v2557_v25 = vrot.slane %v2556_v9, 4  ;;  %v5247_v40 = vld [vmem:[%s7417_s3 + $0x70] ss:$8 sps:$4 sm:$0xff]  }
 0x1f5   : > { %v2538_v32 = vrot.slane %v2537_v49, 2  ;;  %v2544_v52 = vmax.f32 %v2542_v50, %v2543_v6  ;;  %v2551_v31 = vmax.f32 %v2549_v22, %v2550_v55  ;;  %v2851_v39 = vsel %vm2817_vm2, %v2527_v37, %v2850_v48 }
 0x1f6   : > { %v2840_v16 = vsel %vm2823_vm5, %v2436_v3, %v2839_v21  ;;  %v2558_v45 = vmax.f32 %v2556_v9, %v2557_v25  ;;  %v2852_v0 = vsel %vm2819_vm3, %v2534_v51, %v2851_v39  ;;  %v2985_v57 = vrot.slane %v6644_v42, 2  ;;  %v6747_v3 = vld [vmem:[%s7416_s2] ss:$0 sm:$0xff]  ;;  %v5255_v39 = vld [vmem:[%s7417_s3 + $0x54] ss:$8 sps:$4 sm:$0xff]  }
 0x1f7   : > { %v2841_v18 = vsel %vm2825_vm6, %v2443_v23, %v2840_v16  ;;  %v2539_v38 = vmax.f32 %v2537_v49, %v2538_v32  ;;  %v2545_v13 = vrot.slane %v2544_v52, 2  ;;  %v2552_v12 = vrot.slane %v2551_v31, 2  ;;  %v5249_v23 = vld [vmem:[%s7417_s3 + $0x74] ss:$8 sps:$4 sm:$0xff]   ;;  %v5250_v25 = vld [vmem:[%s7417_s3 + $0x60] ss:$8 sps:$4 sm:$0xff]  }
 0x1f8   : > { %v2842_v63 = vsel %vm2827_vm7, %v2450_v1, %v2841_v18  ;;  %v2559_v24 = vrot.slane %v2558_v45, 2  ;;  %v2986_v7 = vrot.slane %v6646_v54, 2  ;;  %3373 = vmatprep.subr.bf16.mxu1 %v5249_v23  ;;  %v5252_v1 = vld [vmem:[%s7417_s3 + $0x64] ss:$8 sps:$4 sm:$0xff]  }
 0x1f9   : > { %2889 = vst.msk [vmem:[#allocation2 + $0x31] sm:$0xff] %vm1881_vm13, %v2842_v63  ;;  %v2540_v4 = vrot.slane %v2539_v38, 1  ;;  %v2546_v35 = vmax.f32 %v2544_v52, %v2545_v13  ;;  %v2553_v27 = vmax.f32 %v2551_v31, %v2552_v12  ;;  %3374 = vmatpush1.bf16.msra.mxu1 %v5247_v40 }
 0x1fa   : > { %v2560_v28 = vmax.f32 %v2558_v45, %v2559_v24  ;;  %v6724_v34 = vsel %vm559_vm0, %v2985_v57, %v2986_v7  ;;  %3375 = vmatprep.subr.bf16.mxu1 %v5252_v1 }
 0x1fb   : > { %v2541_v36 = vmax.f32 %v2539_v38, %v2540_v4  ;;  %v2547_v37 = vrot.slane %v2546_v35, 1  ;;  %v2554_v26 = vrot.slane %v2553_v27, 1  ;;  %v5253_v4 = vld [vmem:[%s7417_s3 + $0x50] ss:$8 sps:$4 sm:$0xff]  }
 0x1fc   : > { %v2561_v61 = vrot.slane %v2560_v28, 1 }
 0x1fd   : > { %v2548_v44 = vmax.f32 %v2546_v35, %v2547_v37  ;;  %v2555_v56 = vmax.f32 %v2553_v27, %v2554_v26  ;;  %v2853_v62 = vsel %vm2821_vm4, %v2541_v36, %v2852_v0  ;;  %3376 = vmatpush1.bf16.msra.mxu1 %v5250_v25  ;;  %v5258_v36 = vld [vmem:[%s7417_s3 + $0x44] ss:$8 sps:$4 sm:$0xff]  }
 0x1fe   : > { %v2562_v29 = vmax.f32 %v2560_v28, %v2561_v61  ;;  %3377 = vmatprep.subr.bf16.mxu1 %v5255_v39 }
 0x1ff   : > { %v2854_v48 = vsel %vm2823_vm5, %v2548_v44, %v2853_v62 }
 0x200   : > { %v2855_v46 = vsel %vm2825_vm6, %v2555_v56, %v2854_v48  ;;  %v6715_v59 = vld [vmem:[#allocation2 + $0x30] sm:$0xff]  ;;  %v6717_v14 = vld [vmem:[#allocation2 + $0x38] sm:$0x3] }
 0x201   : > { %v2856_v60 = vsel %vm2827_vm7, %v2562_v29, %v2855_v46  ;;  %v2988_v17 = vrot.slane %v6715_v59, 2  ;;  %v2989_v11 = vrot.slane %v6717_v14, 2  ;;  %3378 = vmatpush1.bf16.msra.mxu1 %v5253_v4 }
 0x202   : > { %2891 = vst.msk [vmem:[#allocation2 + $0x51] sm:$0xff] %vm1881_vm13, %v2856_v60  ;;  %3379 = vmatprep.subr.bf16.mxu1 %v5258_v36 }
 0x203   : > { %v6727_v42 = vsel %vm559_vm0, %v2988_v17, %v2989_v11  ;;  %v5256_v17 = vld [vmem:[%s7417_s3 + $0x40] ss:$8 sps:$4 sm:$0xff]  }
 0x204   : > { %v3234_v54 = vpack.c.bf16 %v6727_v42, %v6724_v34 }
 0x205   : > { %3380 = vmatpush1.bf16.msra.mxu1 %v5256_v17 }
 0x206   : > { %4340 = vmatprep.mubr.msk.bf16.mxu1 %vm1881_vm13, %v3234_v54 }
 0x207   : > { %v4419_v43 = vpop.f32.mrf.mxu0 }
 0x208   : > { %v1779_v2 = vadd.f32 %v4419_v43, %v6506_v53 }
 0x209   : > { %v1770_v58 = vpop.f32.mrf.mxu0 }
 0x20a   : > { %v1863_v19 = vmax.f32 %v1779_v2, 0.0  ;;  %v1771_v20 = vadd.f32 %v6506_v53, %v1770_v58  ;;  %v5261_v58 = vld [vmem:[%s7417_s3 + $0x34] ss:$8 sps:$4 sm:$0xff]  }
 0x20b   : > { %v4420_v15 = vpop.f32.mrf.mxu0  ;;  %3381 = vmatprep.subr.bf16.mxu1 %v5261_v58 }
 0x20c   : > { %v4427_v47 = vpop.f32.mrf.mxu1  ;;  %v1861_v50 = vmax.f32 %v1771_v20, 0.0  ;;  %v1782_v22 = vadd.f32 %v4420_v15, %v6506_v53  ;;  %v1901_v6 = vsel %vm1881_vm13, %v1863_v19, -inf }
 0x20d   : > { %v1811_v8 = vadd.f32 %v4427_v47, %v6506_v53  ;;  %v1773_v41 = vpop.f32.mrf.mxu0 }
 0x20e   : > { %v1802_v49 = vpop.f32.mrf.mxu1  ;;  %v1900_v55 = vsel %vm1881_vm13, %v1861_v50, -inf  ;;  %v1864_v9 = vmax.f32 %v1782_v22, 0.0  ;;  %v1774_v53 = vadd.f32 %v6747_v3, %v1773_v41 }
 0x20f   : > { %v1902_v21 = vmax.f32 %v1900_v55, %v1901_v6  ;;  %v1871_v32 = vmax.f32 %v1811_v8, 0.0  ;;  %v1803_v31 = vadd.f32 %v6747_v3, %v1802_v49  ;;  %v5259_v55 = vld [vmem:[%s7417_s3 + $0x30] ss:$8 sps:$4 sm:$0xff]  }
 0x210   : > { %v1862_v52 = vmax.f32 %v1774_v53, 0.0  ;;  %v4428_v51 = vpop.f32.mrf.mxu1  ;;  %v1904_v18 = vsel %vm1881_vm13, %v1864_v9, -inf  ;;  %3382 = vmatpush1.bf16.msra.mxu1 %v5259_v55 }
 0x211   : > { %v2048_v16 = vcombine.high %v1902_v21, %v1902_v21  ;;  %v2055_v45 = vrot.slane %v1902_v21, %v6515_v33  ;;  %v1913_v27 = vsel %vm1881_vm13, %v1871_v32, -inf  ;;  %v1869_v28 = vmax.f32 %v1803_v31, 0.0 }
 0x212   : > { %v1903_v38 = vsel %vm1881_vm13, %v1862_v52, -inf  ;;  %v1805_v0 = vpop.f32.mrf.mxu1  ;;  %v1814_v46 = vadd.f32 %v6747_v3, %v4428_v51 }
 0x213   : > { %v2062_v13 = vrot.slane %v2048_v16, %v6515_v33  ;;  %v2063_v12 = vcombine.high %v2055_v45, %v2055_v45  ;;  %v2451_v63 = vsel %vm2282_vm14, %v2055_v45, -inf  ;;  %v1905_v24 = vmax.f32 %v1903_v38, %v1904_v18 }
 0x214   : > { %v2452_v35 = vrot.slane %v2451_v63, 4  ;;  %v1806_v60 = vadd.f32 %v6747_v3, %v1805_v0  ;;  %v1912_v47 = vsel %vm1881_vm13, %v1869_v28, -inf  ;;  %v1872_v52 = vmax.f32 %v1814_v46, 0.0 }
 0x215   : > { %v2064_v37 = vcombine.high %v2062_v13, %v2062_v13  ;;  %v2458_v26 = vsel %vm2282_vm14, %v2063_v12, -inf  ;;  %v2465_v61 = vsel %vm2282_vm14, %v2062_v13, -inf  ;;  %v2065_v44 = vcombine.high %v1905_v24, %v1905_v24 }
 0x216   : > { %v2453_v56 = vmax.f32 %v2451_v63, %v2452_v35  ;;  %v2459_v62 = vrot.slane %v2458_v26, 4  ;;  %v2466_v29 = vrot.slane %v2465_v61, 4  ;;  %v2072_v48 = vrot.slane %v1905_v24, %v6515_v33 }
 0x217   : > { %v2472_v57 = vsel %vm2282_vm14, %v2064_v37, -inf  ;;  %v2079_v7 = vrot.slane %v2065_v44, %v6515_v33  ;;  %v1870_v31 = vmax.f32 %v1806_v60, 0.0  ;;  %v1914_v45 = vmax.f32 %v1912_v47, %v1913_v27 }
 0x218   : > { %v2454_v11 = vrot.slane %v2453_v56, 2  ;;  %v2460_v54 = vmax.f32 %v2458_v26, %v2459_v62  ;;  %v2467_v43 = vmax.f32 %v2465_v61, %v2466_v29  ;;  %v2473_v2 = vrot.slane %v2472_v57, 4 }
 0x219   : > { %v2080_v19 = vcombine.high %v2072_v48, %v2072_v48  ;;  %v2479_v20 = vsel %vm2282_vm14, %v2072_v48, -inf  ;;  %v2493_v15 = vsel %vm2282_vm14, %v2079_v7, -inf  ;;  %v2081_v23 = vcombine.high %v2079_v7, %v2079_v7 }
 0x21a   : > { %v2455_v50 = vmax.f32 %v2453_v56, %v2454_v11  ;;  %v2461_v22 = vrot.slane %v2460_v54, 2  ;;  %v2468_v8 = vrot.slane %v2467_v43, 2  ;;  %v2474_v40 = vmax.f32 %v2472_v57, %v2473_v2 }
 0x21b   : > { %v2480_v41 = vrot.slane %v2479_v20, 4  ;;  %v2486_v49 = vsel %vm2282_vm14, %v2080_v19, -inf  ;;  %v2494_v6 = vrot.slane %v2493_v15, 4  ;;  %v2500_v12 = vsel %vm2282_vm14, %v2081_v23, -inf }
 0x21c   : > { %v2456_v9 = vrot.slane %v2455_v50, 1  ;;  %v2462_v53 = vmax.f32 %v2460_v54, %v2461_v22  ;;  %v2469_v1 = vmax.f32 %v2467_v43, %v2468_v8  ;;  %v2475_v21 = vrot.slane %v2474_v40, 2 }
 0x21d   : > { %v2481_v25 = vmax.f32 %v2479_v20, %v2480_v41  ;;  %v2487_v32 = vrot.slane %v2486_v49, 4  ;;  %v2495_v35 = vmax.f32 %v2493_v15, %v2494_v6  ;;  %v1916_v36 = vsel %vm1881_vm13, %v1872_v52, -inf }
 0x21e   : > { %v2463_v51 = vrot.slane %v2462_v53, 1  ;;  %v2470_v39 = vrot.slane %v2469_v1, 1  ;;  %v2476_v16 = vmax.f32 %v2474_v40, %v2475_v21  ;;  %v2457_v18 = vmax.f32 %v2455_v50, %v2456_v9 }
 0x21f   : > { %v2482_v38 = vrot.slane %v2481_v25, 2  ;;  %v2488_v13 = vmax.f32 %v2486_v49, %v2487_v32  ;;  %v1915_v37 = vsel %vm1881_vm13, %v1870_v31, -inf  ;;  %v2496_v27 = vrot.slane %v2495_v35, 2 }
 0x220   : > { %v2464_v63 = vmax.f32 %v2462_v53, %v2463_v51  ;;  %v2471_v24 = vmax.f32 %v2469_v1, %v2470_v39  ;;  %v2477_v4 = vrot.slane %v2476_v16, 1  ;;  %v2501_v44 = vrot.slane %v2500_v12, 4 }
 0x221   : > { %v2483_v28 = vmax.f32 %v2481_v25, %v2482_v38  ;;  %v2489_v0 = vrot.slane %v2488_v13, 2  ;;  %v2116_v48 = vcombine.high %v1914_v45, %v1914_v45  ;;  %v2497_v57 = vmax.f32 %v2495_v35, %v2496_v27 }
 0x222   : > { %v2478_v26 = vmax.f32 %v2476_v16, %v2477_v4  ;;  %v2843_v61 = vsel %vm2815_vm15, %v2464_v63, %v2457_v18  ;;  %v2502_v7 = vmax.f32 %v2500_v12, %v2501_v44  ;;  %v2123_v60 = vrot.slane %v1914_v45, %v6515_v33 }
 0x223   : > { %v2844_v56 = vsel %vm2817_vm2, %v2471_v24, %v2843_v61  ;;  %v2484_v62 = vrot.slane %v2483_v28, 1  ;;  %v2490_v29 = vmax.f32 %v2488_v13, %v2489_v0  ;;  %v2130_v54 = vrot.slane %v2116_v48, %v6515_v33 }
 0x224   : > { %v2845_v46 = vsel %vm2819_vm3, %v2478_v26, %v2844_v56  ;;  %v1917_v43 = vmax.f32 %v1915_v37, %v1916_v36  ;;  %v2498_v2 = vrot.slane %v2497_v57, 1  ;;  %v2503_v58 = vrot.slane %v2502_v7, 2 }
 0x225   : > { %v2485_v17 = vmax.f32 %v2483_v28, %v2484_v62  ;;  %v2491_v11 = vrot.slane %v2490_v29, 1  ;;  %v2131_v19 = vcombine.high %v2123_v60, %v2123_v60  ;;  %v2563_v20 = vsel %vm2282_vm14, %v2123_v60, -inf }
 0x226   : > { %v2132_v50 = vcombine.high %v2130_v54, %v2130_v54  ;;  %v2564_v22 = vrot.slane %v2563_v20, 4  ;;  %v2499_v8 = vmax.f32 %v2497_v57, %v2498_v2  ;;  %v2504_v40 = vmax.f32 %v2502_v7, %v2503_v58 }
 0x227   : > { %v2492_v15 = vmax.f32 %v2490_v29, %v2491_v11  ;;  %v2846_v47 = vsel %vm2821_vm4, %v2485_v17, %v2845_v46  ;;  %v2570_v23 = vsel %vm2282_vm14, %v2131_v19, -inf  ;;  %v2577_v41 = vsel %vm2282_vm14, %v2130_v54, -inf }
 0x228   : > { %v2565_v6 = vmax.f32 %v2563_v20, %v2564_v22  ;;  %v2571_v55 = vrot.slane %v2570_v23, 4  ;;  %v2578_v9 = vrot.slane %v2577_v41, 4  ;;  %v2505_v53 = vrot.slane %v2504_v40, 1 }
 0x229   : > { %v2847_v49 = vsel %vm2823_vm5, %v2492_v15, %v2846_v47  ;;  %v2584_v21 = vsel %vm2282_vm14, %v2132_v50, -inf  ;;  %v2133_v25 = vcombine.high %v1917_v43, %v1917_v43  ;;  %v2140_v16 = vrot.slane %v1917_v43, %v6515_v33 }
 0x22a   : > { %v2848_v1 = vsel %vm2825_vm6, %v2499_v8, %v2847_v49  ;;  %v2566_v32 = vrot.slane %v2565_v6, 2  ;;  %v2572_v52 = vmax.f32 %v2570_v23, %v2571_v55  ;;  %v2579_v31 = vmax.f32 %v2577_v41, %v2578_v9 }
 0x22b   : > { %v2585_v51 = vrot.slane %v2584_v21, 4  ;;  %v2506_v39 = vmax.f32 %v2504_v40, %v2505_v53  ;;  %v2147_v45 = vrot.slane %v2133_v25, %v6515_v33  ;;  %v2148_v24 = vcombine.high %v2140_v16, %v2140_v16 }
 0x22c   : > { %v2567_v18 = vmax.f32 %v2565_v6, %v2566_v32  ;;  %v2573_v38 = vrot.slane %v2572_v52, 2  ;;  %v2580_v13 = vrot.slane %v2579_v31, 2  ;;  %v2591_v35 = vsel %vm2282_vm14, %v2140_v16, -inf  ;;  %v4431_v28 = vpop.f32.mrf.mxu1 }
 0x22d   : > { %v2586_v12 = vmax.f32 %v2584_v21, %v2585_v51  ;;  %v2849_v63 = vsel %vm2827_vm7, %v2506_v39, %v2848_v1  ;;  %v2149_v4 = vcombine.high %v2147_v45, %v2147_v45  ;;  %v2592_v61 = vrot.slane %v2591_v35, 4 }
 0x22e   : > { %2890 = vst.msk [vmem:[#allocation2 + $0x41] sm:$0xff] %vm1881_vm13, %v2849_v63  ;;  %v2568_v0 = vrot.slane %v2567_v18, 1  ;;  %v2574_v36 = vmax.f32 %v2572_v52, %v2573_v38  ;;  %v2581_v37 = vmax.f32 %v2579_v31, %v2580_v13  ;;  %v2598_v27 = vsel %vm2282_vm14, %v2148_v24, -inf  ;;  %v1818_v17 = vpop.f32.mrf.mxu1  ;;  %v6824_v24 = vld [vmem:[#allocation2 + $0x58] sm:$0x3] }
 0x22f   : > { %v2587_v26 = vrot.slane %v2586_v12, 2  ;;  %v2605_v44 = vsel %vm2282_vm14, %v2147_v45, -inf  ;;  %v2612_v56 = vsel %vm2282_vm14, %v2149_v4, -inf  ;;  %v2593_v57 = vmax.f32 %v2591_v35, %v2592_v61 }
 0x230   : > { %v2575_v62 = vrot.slane %v2574_v36, 1  ;;  %v2582_v29 = vrot.slane %v2581_v37, 1  ;;  %v2599_v7 = vrot.slane %v2598_v27, 4  ;;  %v2606_v46 = vrot.slane %v2605_v44, 4  ;;  %v4432_v41 = vpop.f32.mrf.mxu1 }
 0x231   : > { %v2588_v48 = vmax.f32 %v2586_v12, %v2587_v26  ;;  %v2613_v60 = vrot.slane %v2612_v56, 4  ;;  %v2569_v11 = vmax.f32 %v2567_v18, %v2568_v0  ;;  %v2594_v58 = vrot.slane %v2593_v57, 2  ;;  %v6820_v18 = vld [vmem:[#allocation2 + $0x50] sm:$0xff] }
 0x232   : > { %v2576_v54 = vmax.f32 %v2574_v36, %v2575_v62  ;;  %v2583_v43 = vmax.f32 %v2581_v37, %v2582_v29  ;;  %v2600_v19 = vmax.f32 %v2598_v27, %v2599_v7  ;;  %v2607_v20 = vmax.f32 %v2605_v44, %v2606_v46  ;;  %v1821_v39 = vpop.f32.mrf.mxu1 }
 0x233   : > { %v2589_v2 = vrot.slane %v2588_v48, 1  ;;  %v2614_v15 = vmax.f32 %v2612_v56, %v2613_v60  ;;  %v2595_v8 = vmax.f32 %v2593_v57, %v2594_v58  ;;  %v1827_v53 = vadd.f32 %v6747_v3, %v4431_v28 }
 0x234   : > { %v2857_v50 = vsel %vm2815_vm15, %v2576_v54, %v2569_v11  ;;  %v2601_v40 = vrot.slane %v2600_v19, 2  ;;  %v2608_v23 = vrot.slane %v2607_v20, 2  ;;  %v1819_v25 = vadd.f32 %v6747_v3, %v1818_v17 }
 0x235   : > { %v2590_v47 = vmax.f32 %v2588_v48, %v2589_v2  ;;  %v2858_v22 = vsel %vm2817_vm2, %v2583_v43, %v2857_v50  ;;  %v2615_v49 = vrot.slane %v2614_v15, 2  ;;  %v2596_v6 = vrot.slane %v2595_v8, 1  ;;  %v6851_v50 = vld [vmem:[#allocation2 + $0x48] sm:$0x3] }
 0x236   : > { %v2602_v55 = vmax.f32 %v2600_v19, %v2601_v40  ;;  %v2609_v9 = vmax.f32 %v2607_v20, %v2608_v23  ;;  %v1875_v51 = vmax.f32 %v1827_v53, 0.0  ;;  %v1873_v45 = vmax.f32 %v1819_v25, 0.0 }
 0x237   : > { %v2616_v1 = vmax.f32 %v2614_v15, %v2615_v49  ;;  %v2859_v21 = vsel %vm2819_vm3, %v2590_v47, %v2858_v22  ;;  %v2597_v32 = vmax.f32 %v2595_v8, %v2596_v6  ;;  %v1830_v28 = vadd.f32 %v6747_v3, %v4432_v41  ;;  %v6849_v47 = vld [vmem:[#allocation2 + $0x40] sm:$0xff] }
 0x238   : > { %v2603_v52 = vrot.slane %v2602_v55, 1  ;;  %v2610_v31 = vrot.slane %v2609_v9, 1  ;;  %v1919_v63 = vsel %vm1881_vm13, %v1875_v51, -inf  ;;  %v1918_v35 = vsel %vm1881_vm13, %v1873_v45, -inf  ;;  %v5262_v41 = vld [vmem:[%s7417_s3 + $0x20] ss:$8 sps:$4 sm:$0xff]  }
 0x239   : > { %v2617_v16 = vrot.slane %v2616_v1, 1  ;;  %v2860_v12 = vsel %vm2821_vm4, %v2597_v32, %v2859_v21  ;;  %v1822_v0 = vadd.f32 %v6747_v3, %v1821_v39  ;;  %v1920_v37 = vmax.f32 %v1918_v35, %v1919_v63  ;;  %v5264_v49 = vld [vmem:[%s7417_s3 + $0x24] ss:$8 sps:$4 sm:$0xff]  }
 0x23a   : > { %v2604_v38 = vmax.f32 %v2602_v55, %v2603_v52  ;;  %v2611_v13 = vmax.f32 %v2609_v9, %v2610_v31  ;;  %v2946_v26 = vrot.slane %v6820_v18, 1  ;;  %v1876_v27 = vmax.f32 %v1830_v28, 0.0  ;;  %3383 = vmatprep.subr.bf16.mxu1 %v5264_v49 }
 0x23b   : > { %v2618_v4 = vmax.f32 %v2616_v1, %v2617_v16  ;;  %v1874_v44 = vmax.f32 %v1822_v0, 0.0  ;;  %v2947_v56 = vrot.slane %v6824_v24, 1  ;;  %v2150_v29 = vcombine.high %v1920_v37, %v1920_v37  ;;  %3384 = vmatpush1.bf16.msra.mxu1 %v5262_v41 }
 0x23c   : > { %v2861_v36 = vsel %vm2823_vm5, %v2604_v38, %v2860_v12  ;;  %v2157_v48 = vrot.slane %v1920_v37, %v6515_v33  ;;  %v5131_v57 = vpack.i.bf16 %v6724_v34, %v6617_v10  ;;  %v1922_v7 = vsel %vm1881_vm13, %v1876_v27, -inf }
 0x23d   : > { %v2862_v61 = vsel %vm2825_vm6, %v2611_v13, %v2861_v36  ;;  %v1921_v46 = vsel %vm1881_vm13, %v1874_v44, -inf  ;;  %v2940_v60 = vrot.slane %v6715_v59, 1  ;;  %v2941_v17 = vrot.slane %v6717_v14, 1 }
 0x23e   : > { %v2863_v62 = vsel %vm2827_vm7, %v2618_v4, %v2862_v61  ;;  %v2164_v11 = vrot.slane %v2150_v29, %v6515_v33  ;;  %v2165_v54 = vcombine.high %v2157_v48, %v2157_v48  ;;  %v2619_v43 = vsel %vm2282_vm14, %v2157_v48, -inf }
 0x23f   : > { %2892 = vst.msk [vmem:[#allocation2 + $0x61] sm:$0xff] %vm1881_vm13, %v2863_v62  ;;  %v1923_v2 = vmax.f32 %v1921_v46, %v1922_v7  ;;  %v2620_v58 = vrot.slane %v2619_v43, 4  ;;  %v6845_v19 = vsel %vm382_vm1, %v2946_v26, %v2947_v56  ;;  %v2994_v20 = vrot.slane %v6820_v18, 2  ;;  %v5265_v26 = vld [vmem:[%s7417_s3 + $0x10] ss:$8 sps:$4 sm:$0xff]  }
 0x240   : > { %v2995_v15 = vrot.slane %v6824_v24, 2  ;;  %v2166_v22 = vcombine.high %v2164_v11, %v2164_v11  ;;  %v2626_v8 = vsel %vm2282_vm14, %v2165_v54, -inf  ;;  %v2633_v40 = vsel %vm2282_vm14, %v2164_v11, -inf  ;;  %v5267_v62 = vld [vmem:[%s7417_s3 + $0x14] ss:$8 sps:$4 sm:$0xff]  }
 0x241   : > { %v2167_v23 = vcombine.high %v1923_v2, %v1923_v2  ;;  %v2621_v6 = vmax.f32 %v2619_v43, %v2620_v58  ;;  %v2627_v55 = vrot.slane %v2626_v8, 4  ;;  %v2634_v9 = vrot.slane %v2633_v40, 4  ;;  %3385 = vmatprep.subr.bf16.mxu1 %v5267_v62 }
 0x242   : > { %v2174_v53 = vrot.slane %v1923_v2, %v6515_v33  ;;  %v2640_v1 = vsel %vm2282_vm14, %v2166_v22, -inf  ;;  %v2991_v25 = vrot.slane %v6849_v47, 2  ;;  %v2992_v32 = vrot.slane %v6851_v50, 2  ;;  %3386 = vmatpush1.bf16.msra.mxu1 %v5265_v26 }
 0x243   : > { %v2181_v21 = vrot.slane %v2167_v23, %v6515_v33  ;;  %v2622_v52 = vrot.slane %v2621_v6, 2  ;;  %v2628_v31 = vmax.f32 %v2626_v8, %v2627_v55  ;;  %v2635_v51 = vmax.f32 %v2633_v40, %v2634_v9 }
 0x244   : > { %v2641_v39 = vrot.slane %v2640_v1, 4  ;;  %v2182_v16 = vcombine.high %v2174_v53, %v2174_v53  ;;  %v2647_v38 = vsel %vm2282_vm14, %v2174_v53, -inf  ;;  %v5268_v53 = vld [vmem:[%s7417_s3] ss:$8 sps:$4 sm:$0xff]   ;;  %v6919_v10 = vsel %vm559_vm0, %v2991_v25, %v2992_v32 }
 0x245   : > { %v2183_v45 = vcombine.high %v2181_v21, %v2181_v21  ;;  %v2661_v13 = vsel %vm2282_vm14, %v2181_v21, -inf  ;;  %v2623_v12 = vmax.f32 %v2621_v6, %v2622_v52  ;;  %v2629_v63 = vrot.slane %v2628_v31, 2 }
 0x246   : > { %v2636_v4 = vrot.slane %v2635_v51, 2  ;;  %v2642_v35 = vmax.f32 %v2640_v1, %v2641_v39  ;;  %v2648_v28 = vrot.slane %v2647_v38, 4  ;;  %v2654_v0 = vsel %vm2282_vm14, %v2182_v16, -inf  ;;  %v6876_v11 = vld [vmem:[#allocation2 + $0x60] sm:$0xff]  ;;  %v2908_v41 = vld [vmem:[#allocation2 + $0x68] sm:$0x3] }
 0x247   : > { %v2662_v36 = vrot.slane %v2661_v13, 4  ;;  %v2668_v37 = vsel %vm2282_vm14, %v2183_v45, -inf  ;;  %v2624_v61 = vrot.slane %v2623_v12, 1  ;;  %v2630_v27 = vmax.f32 %v2628_v31, %v2629_v63  ;;  %v5270_v1 = vld [vmem:[%s7417_s3 + $0x4] ss:$8 sps:$4 sm:$0xff]  }
 0x248   : > { %v2637_v44 = vmax.f32 %v2635_v51, %v2636_v4  ;;  %v2643_v56 = vrot.slane %v2642_v35, 2  ;;  %v2649_v29 = vmax.f32 %v2647_v38, %v2648_v28  ;;  %v2655_v48 = vrot.slane %v2654_v0, 4  ;;  %3387 = vmatprep.subr.bf16.mxu1 %v5270_v1 }
 0x249   : > { %v2663_v7 = vmax.f32 %v2661_v13, %v2662_v36  ;;  %v2669_v46 = vrot.slane %v2668_v37, 4  ;;  %v2625_v54 = vmax.f32 %v2623_v12, %v2624_v61  ;;  %v2631_v43 = vrot.slane %v2630_v27, 1  ;;  %3388 = vmatpush1.bf16.msra.mxu1 %v5268_v53 }
 0x24a   : > { %v2638_v2 = vrot.slane %v2637_v44, 1  ;;  %v2644_v58 = vmax.f32 %v2642_v35, %v2643_v56  ;;  %v2650_v22 = vrot.slane %v2649_v29, 2  ;;  %v2656_v8 = vmax.f32 %v2654_v0, %v2655_v48 }
 0x24b   : > { %v2664_v40 = vrot.slane %v2663_v7, 2  ;;  %v2670_v23 = vmax.f32 %v2668_v37, %v2669_v46  ;;  %v2632_v49 = vmax.f32 %v2630_v27, %v2631_v43  ;;  %v5121_v9 = vpack.i.bf16 %v6876_v11, %v6820_v18  ;;  %v5271_v27 = vld [vmem:[%s7417_s3 + $0x80] ss:$8 sps:$4 sm:$0xff]  }
 0x24c   : > { %v2639_v6 = vmax.f32 %v2637_v44, %v2638_v2  ;;  %v2645_v55 = vrot.slane %v2644_v58, 1  ;;  %v2651_v21 = vmax.f32 %v2649_v29, %v2650_v22  ;;  %v2657_v52 = vrot.slane %v2656_v8, 2  ;;  %v5273_v44 = vld [vmem:[%s7417_s3 + $0x84] ss:$8 sps:$4 sm:$0xff]  }
 0x24d   : > { %v2665_v31 = vmax.f32 %v2663_v7, %v2664_v40  ;;  %v2671_v51 = vrot.slane %v2670_v23, 2  ;;  %v2864_v16 = vsel %vm2815_vm15, %v2632_v49, %v2625_v54  ;;  %5122 = vrot.lane.b32.xlu0 %v5121_v9, %s5342_s21  ;;  %v2949_v45 = vrot.slane %v6876_v11, 1  ;;  %v6907_v29 = vld [vmem:[#allocation2 + $0x20] sm:$0xff]  ;;  %3403 = vmatprep.subr.bf16.mxu1 %v5273_v44 }
 0x24e   : > { %v2646_v39 = vmax.f32 %v2644_v58, %v2645_v55  ;;  %v2950_v38 = vrot.slane %v2908_v41, 1  ;;  %v2865_v13 = vsel %vm2817_vm2, %v2639_v6, %v2864_v16  ;;  %v2652_v12 = vrot.slane %v2651_v21, 1  ;;  %3404 = vmatpush2.bf16.msra.mxu1 %v5271_v27 }
 0x24f   : > { %v2658_v63 = vmax.f32 %v2656_v8, %v2657_v52  ;;  %v2666_v4 = vrot.slane %v2665_v31, 1  ;;  %v2672_v35 = vmax.f32 %v2670_v23, %v2671_v51  ;;  %v2997_v36 = vrot.slane %v6876_v11, 2 }
 0x250   : > { %v2866_v28 = vsel %vm2819_vm3, %v2646_v39, %v2865_v13  ;;  %v6892_v0 = vsel %vm382_vm1, %v2949_v45, %v2950_v38  ;;  %v2653_v37 = vmax.f32 %v2651_v21, %v2652_v12  ;;  %v5146_v48 = vpack.i.bf16 %v6715_v59, %v6907_v29 }
 0x251   : > { %v2659_v26 = vrot.slane %v2658_v63, 1  ;;  %v5136_v61 = vpack.i.bf16 %v6892_v0, %v6845_v19  ;;  %v2667_v56 = vmax.f32 %v2665_v31, %v2666_v4  ;;  %v2673_v62 = vrot.slane %v2672_v35, 1  ;;  %5132 = vrot.lane.b32.xlu0 %v5131_v57, %s5344_s29 }
 0x252   : > { %v2998_v7 = vrot.slane %v2908_v41, 2  ;;  %v2867_v43 = vsel %vm2821_vm4, %v2653_v37, %v2866_v28  ;;  %v6926_v58 = vsel %vm559_vm0, %v2994_v20, %v2995_v15  ;;  %v6936_v8 = vsel %vm382_vm1, %v2940_v60, %v2941_v17 }
 0x253   : > { %v2660_v54 = vmax.f32 %v2658_v63, %v2659_v26  ;;  %5137 = vrot.lane.b32.xlu1 %v5136_v61, %s5343_s22  ;;  %v2674_v57 = vmax.f32 %v2672_v35, %v2673_v62  ;;  %v3236_v14 = vpack.c.bf16 %v6926_v58, %v6919_v10  ;;  %v6952_v49 = vpack.i.bf16 %v6936_v8, %v6654_v5 }
 0x254   : > { %v6929_v22 = vsel %vm559_vm0, %v2997_v36, %v2998_v7  ;;  %v2943_v55 = vrot.slane %v6849_v47, 1  ;;  %v2944_v9 = vrot.slane %v6851_v50, 1  ;;  %v5166_v5 = vpack.i.bf16 %v6727_v42, %v6724_v34 }
 0x255   : > { %v2868_v32 = vsel %vm2823_vm5, %v2660_v54, %v2867_v43  ;;  %v5141_v24 = vpack.i.bf16 %v6929_v22, %v6926_v58  ;;  %v5176_v45 = vpack.i.bf16 %v6820_v18, %v6849_v47  ;;  %v5171_v13 = vpack.i.bf16 %v6849_v47, %v6715_v59 }
 0x256   : > { %v4435_v46 = vpop.f32.mrf.mxu1  ;;  %v2869_v15 = vsel %vm2825_vm6, %v2667_v56, %v2868_v32  ;;  %v2945_v50 = vsel %vm382_vm1, %v2943_v55, %v2944_v9  ;;  %v5186_v26 = vpack.i.bf16 %v6919_v10, %v6727_v42 }
 0x257   : > { %v1843_v2 = vadd.f32 %v6747_v3, %v4435_v46  ;;  %v2870_v60 = vsel %vm2827_vm7, %v2674_v57, %v2869_v15  ;;  %5147 = vrot.lane.b32.xlu1 %v5146_v48, %s5345_s30  ;;  %5142 = vrot.lane.b32.xlu0 %v5141_v24, %s5344_s29  ;;  %v5181_v28 = vpack.i.bf16 %v2945_v50, %v6936_v8 }
 0x258   : > { %v1834_v25 = vpop.f32.mrf.mxu1  ;;  %2893 = vst.msk [vmem:[#allocation2 + $0x71] sm:$0xff] %vm1881_vm13, %v2870_v60  ;;  %v6976_v36 = vpack.i.bf16 %v6845_v19, %v2945_v50 }
 0x259   : > { %v1879_v40 = vmax.f32 %v1843_v2, 0.0  ;;  %v1835_v20 = vadd.f32 %v6747_v3, %v1834_v25 }
 0x25a   : > { %v4436_v23 = vpop.f32.mrf.mxu1 }
 0x25b   : > { %v1877_v17 = vmax.f32 %v1835_v20, 0.0  ;;  %v1846_v41 = vadd.f32 %v6747_v3, %v4436_v23  ;;  %v1925_v53 = vsel %vm1881_vm13, %v1879_v40, -inf  ;;  %5157 = vrot.lane.b32.xlu0 %v6952_v49, %s5346_s8 }
 0x25c   : > { %v1837_v6 = vpop.f32.mrf.mxu1 }
 0x25d   : > { %v1924_v1 = vsel %vm1881_vm13, %v1877_v17, -inf  ;;  %v1880_v21 = vmax.f32 %v1846_v41, 0.0  ;;  %v1838_v52 = vadd.f32 %v6747_v3, %v1837_v6 }
 0x25e   : > { %v1926_v31 = vmax.f32 %v1924_v1, %v1925_v53 }
 0x25f   : > { %v1878_v51 = vmax.f32 %v1838_v52, 0.0  ;;  %v1928_v38 = vsel %vm1881_vm13, %v1880_v21, -inf  ;;  %5167 = vrot.lane.b32.xlu0 %v5166_v5, %s5340_s19  ;;  %v6978_v37 = vld [vmem:[#allocation2 + $0x70] sm:$0xff]  ;;  %v2910_v50 = vld [vmem:[#allocation2 + $0x78] sm:$0x3] }
 0x260   : > { %v2184_v39 = vcombine.high %v1926_v31, %v1926_v31  ;;  %v2191_v16 = vrot.slane %v1926_v31, %v6515_v33  ;;  %v5151_v43 = vpack.i.bf16 %v6978_v37, %v6876_v11  ;;  %v2952_v2 = vrot.slane %v6978_v37, 1 }
 0x261   : > { %v1927_v3 = vsel %vm1881_vm13, %v1878_v51, -inf }
 0x262   : > { %v2198_v12 = vrot.slane %v2184_v39, %v6515_v33  ;;  %v2199_v63 = vcombine.high %v2191_v16, %v2191_v16  ;;  %v2675_v34 = vsel %vm2282_vm14, %v2191_v16, -inf  ;;  %v1929_v4 = vmax.f32 %v1927_v3, %v1928_v38  ;;  %5152 = vrot.lane.b32.xlu1 %v5151_v43, %s5345_s30 }
 0x263   : > { %v2676_v35 = vrot.slane %v2675_v34, 4  ;;  %5177 = vrot.lane.b32.xlu0 %v5176_v45, %s5345_s30 }
 0x264   : > { %v2200_v61 = vcombine.high %v2198_v12, %v2198_v12  ;;  %v2682_v27 = vsel %vm2282_vm14, %v2199_v63, -inf  ;;  %v2689_v44 = vsel %vm2282_vm14, %v2198_v12, -inf  ;;  %v2201_v56 = vcombine.high %v1929_v4, %v1929_v4 }
 0x265   : > { %v2677_v62 = vmax.f32 %v2675_v34, %v2676_v35  ;;  %v2683_v48 = vrot.slane %v2682_v27, 4  ;;  %v2690_v7 = vrot.slane %v2689_v44, 4  ;;  %v2208_v46 = vrot.slane %v1929_v4, %v6515_v33 }
 0x266   : > { %v2696_v54 = vsel %vm2282_vm14, %v2200_v61, -inf  ;;  %v2215_v19 = vrot.slane %v2201_v56, %v6515_v33  ;;  %5162 = vrot.lane.b32.xlu1 %v6952_v49, %s5341_s20 }
 0x267   : > { %v2678_v57 = vrot.slane %v2677_v62, 2  ;;  %v2684_v8 = vmax.f32 %v2682_v27, %v2683_v48  ;;  %v2691_v25 = vmax.f32 %v2689_v44, %v2690_v7  ;;  %v2697_v32 = vrot.slane %v2696_v54, 4  ;;  %5182 = vrot.lane.b32.xlu0 %v5181_v28, %s5343_s22 }
 0x268   : > { %v2216_v24 = vcombine.high %v2208_v46, %v2208_v46  ;;  %v2217_v40 = vcombine.high %v2215_v19, %v2215_v19  ;;  %v2703_v20 = vsel %vm2282_vm14, %v2208_v46, -inf  ;;  %v2717_v15 = vsel %vm2282_vm14, %v2215_v19, -inf }
 0x269   : > { %v2679_v23 = vmax.f32 %v2677_v62, %v2678_v57  ;;  %v2685_v60 = vrot.slane %v2684_v8, 2  ;;  %v2692_v17 = vrot.slane %v2691_v25, 2  ;;  %v2698_v41 = vmax.f32 %v2696_v54, %v2697_v32 }
 0x26a   : > { %v2704_v6 = vrot.slane %v2703_v20, 4  ;;  %v2710_v55 = vsel %vm2282_vm14, %v2216_v24, -inf  ;;  %v2718_v9 = vrot.slane %v2717_v15, 4  ;;  %v2724_v53 = vsel %vm2282_vm14, %v2217_v40, -inf  ;;  %5172 = vrot.lane.b32.xlu1 %v5171_v13, %s5342_s21 }
 0x26b   : > { %v2680_v1 = vrot.slane %v2679_v23, 1  ;;  %v2686_v21 = vmax.f32 %v2684_v8, %v2685_v60  ;;  %v2693_v52 = vmax.f32 %v2691_v25, %v2692_v17  ;;  %v2699_v31 = vrot.slane %v2698_v41, 2  ;;  %5197 = vrot.lane.b32.xlu0 %v6976_v36, %s5341_s20 }
 0x26c   : > { %v2705_v5 = vmax.f32 %v2703_v20, %v2704_v6  ;;  %v2711_v51 = vrot.slane %v2710_v55, 4  ;;  %v2719_v39 = vmax.f32 %v2717_v15, %v2718_v9  ;;  %v2725_v16 = vrot.slane %v2724_v53, 4 }
 0x26d   : > { %v2681_v45 = vmax.f32 %v2679_v23, %v2680_v1  ;;  %v2687_v38 = vrot.slane %v2686_v21, 1  ;;  %v2694_v3 = vrot.slane %v2693_v52, 1  ;;  %v2700_v12 = vmax.f32 %v2698_v41, %v2699_v31  ;;  %v7037_v1 = vld [vmem:[#allocation2 + $0x98] sm:$0x3] }
 0x26e   : > { %v2706_v63 = vrot.slane %v2705_v5, 2  ;;  %v2712_v34 = vmax.f32 %v2710_v55, %v2711_v51  ;;  %v2720_v4 = vrot.slane %v2719_v39, 2  ;;  %v2726_v35 = vmax.f32 %v2724_v53, %v2725_v16  ;;  %5187 = vrot.lane.b32.xlu1 %v5186_v26, %s5344_s29  ;;  %v7035_v53 = vld [vmem:[#allocation2 + $0x90] sm:$0xff] }
 0x26f   : > { %v2688_v61 = vmax.f32 %v2686_v21, %v2687_v38  ;;  %v2695_v27 = vmax.f32 %v2693_v52, %v2694_v3  ;;  %v2701_v44 = vrot.slane %v2700_v12, 1  ;;  %v2953_v28 = vrot.slane %v2910_v50, 1 }
 0x270   : > { %v2707_v56 = vmax.f32 %v2705_v5, %v2706_v63  ;;  %v2713_v62 = vrot.slane %v2712_v34, 2  ;;  %v2721_v48 = vmax.f32 %v2719_v39, %v2720_v4  ;;  %v2727_v7 = vrot.slane %v2726_v35, 2 }
 0x271   : > { %v2702_v49 = vmax.f32 %v2700_v12, %v2701_v44  ;;  %v2871_v46 = vsel %vm2815_vm15, %v2688_v61, %v2681_v45  ;;  %v2954_v54 = vsel %vm382_vm1, %v2952_v2, %v2953_v28  ;;  %v3000_v19 = vrot.slane %v6978_v37, 2 }
 0x272   : > { %v2872_v43 = vsel %vm2817_vm2, %v2695_v27, %v2871_v46  ;;  %v2708_v57 = vrot.slane %v2707_v56, 1  ;;  %v2714_v8 = vmax.f32 %v2712_v34, %v2713_v62  ;;  %v2722_v25 = vrot.slane %v2721_v48, 1  ;;  %5192 = vrot.lane.b32.xlu1 %v6976_v36, %s5346_s8  ;;  %v5113_v27 = vpop.permute.xlu1 %5112 }
 0x273   : > { %v2728_v32 = vmax.f32 %v2726_v35, %v2727_v7  ;;  %v2873_v24 = vsel %vm2819_vm3, %v2702_v49, %v2872_v43  ;;  %v5201_v40 = vpack.i.bf16 %v2954_v54, %v6892_v0  ;;  %v3001_v20 = vrot.slane %v2910_v50, 2  ;;  %v5108_v35 = vpop.permute.xlu0 %5107  ;;  %v5319_v43 = vld [vmem:[#allocation2 + $0x10] sm:$0xff] }
 0x274   : > { %v2709_v59 = vmax.f32 %v2707_v56, %v2708_v57  ;;  %v2715_v13 = vrot.slane %v2714_v8, 1  ;;  %v2723_v2 = vmax.f32 %v2721_v48, %v2722_v25  ;;  %v5206_v9 = vpack.i.bf16 %v6926_v58, %v6919_v10 }
 0x275   : > { %v2729_v15 = vrot.slane %v2728_v32, 1  ;;  %5202 = vrot.lane.b32.xlu0 %v5201_v40, %s5346_s8  ;;  %v7017_v23 = vsel %vm559_vm0, %v3000_v19, %v3001_v20  ;;  %v3133_v16 = vrot.slane %v7035_v53, 1  ;;  %v3134_v50 = vrot.slane %v7037_v1, 1 }
 0x276   : > { %v2716_v60 = vmax.f32 %v2714_v8, %v2715_v13  ;;  %v2874_v17 = vsel %vm2821_vm4, %v2709_v59, %v2873_v24  ;;  %v3238_v0 = vpack.c.bf16 %v7017_v23, %v6929_v22  ;;  %v5216_v6 = vpack.i.bf16 %v7017_v23, %v6929_v22  ;;  %5207 = vrot.lane.b32.xlu1 %v5206_v9, %s5340_s19  ;;  %v5128_v28 = vpop.permute.xlu1 %5127 }
 0x277   : > { %v2730_v41 = vmax.f32 %v2728_v32, %v2729_v15  ;;  %v3135_v63 = vsel %vm382_vm1, %v3133_v16, %v3134_v50  ;;  %v5118_v61 = vpop.permute.xlu0 %5117  ;;  %v5109_v56 = vunpack.i.l.bf16 %v5108_v35  ;;  %v5110_v62 = vunpack.i.h.bf16 %v5108_v35 }
 0x278   : > { %v2875_v42 = vsel %vm2823_vm5, %v2716_v60, %v2874_v17  ;;  %v5114_v49 = vunpack.i.l.bf16 %v5113_v27  ;;  %v5115_v46 = vunpack.i.h.bf16 %v5113_v27  ;;  %v5120_v8 = vunpack.i.h.bf16 %v5118_v61 }
 0x279   : > { %v2876_v26 = vsel %vm2825_vm6, %v2723_v2, %v2875_v42  ;;  %5217 = vrot.lane.b32.xlu0 %v5216_v6, %s5340_s19  ;;  %v3172_v57 = vsel %vm1881_vm13, %v5319_v43, %v5110_v62  ;;  %v5119_v25 = vunpack.i.l.bf16 %v5118_v61  ;;  %v5130_v32 = vunpack.i.h.bf16 %v5128_v28 }
 0x27a   : > { %v2877_v55 = vsel %vm2827_vm7, %v2730_v41, %v2876_v26  ;;  %5212 = vrot.lane.b32.xlu1 %v5201_v40, %s5341_s20  ;;  %v5129_v24 = vunpack.i.l.bf16 %v5128_v28 }
 0x27b   : > { %2894 = vst.msk [vmem:[#allocation2 + $0x81] sm:$0xff] %vm1881_vm13, %v2877_v55 }
 0x282   : > { %v2911_v36 = vld [vmem:[#allocation2 + $0x80] sm:$0xff]  ;;  %v2912_v21 = vld [vmem:[#allocation2 + $0x88] sm:$0x3] }
 0x283   : > { %v5221_v52 = vpack.i.bf16 %v2911_v36, %v6978_v37  ;;  %v3053_v31 = vrot.slane %v2911_v36, 1  ;;  %v3054_v5 = vrot.slane %v2912_v21, 1  ;;  %v3080_v51 = vrot.slane %v2911_v36, 2 }
 0x284   : > { %v3081_v39 = vrot.slane %v2912_v21, 2  ;;  %v5236_v34 = vpack.i.bf16 %v7035_v53, %v2911_v36 }
 0x285   : > { %5222 = vrot.lane.b32.xlu1 %v5221_v52, %s5342_s21  ;;  %v3055_v45 = vsel %vm382_vm1, %v3053_v31, %v3054_v5  ;;  %vm3179_vm1 = vcmask 261120  }
 0x286   : > { %v5226_v38 = vpack.i.bf16 %v3055_v45, %v2954_v54  ;;  %v7045_v3 = vsel %vm559_vm0, %v3080_v51, %v3081_v39  ;;  %v5241_v4 = vpack.i.bf16 %v3135_v63, %v3055_v45  ;;  %v5318_v54 = vld [vmem:[#allocation2] sm:$0xff]  ;;  %v3181_v15 = vsel %vm3179_vm1, %v3172_v57, %v5115_v46 }
 0x287   : > { %v5231_v12 = vpack.i.bf16 %v7045_v3, %v7017_v23  ;;  %v3171_v19 = vsel %vm1881_vm13, %v5318_v54, %v5109_v56  ;;  %v3190_v6 = vsel %vm3188_vm8, %v3181_v15, %v5120_v8 }
 0x288   : > { %5227 = vrot.lane.b32.xlu0 %v5226_v38, %s5343_s22  ;;  %v3180_v59 = vsel %vm3179_vm1, %v3171_v19, %v5114_v49  ;;  %v3199_v26 = vsel %vm3197_vm9, %v3190_v6, %v5130_v32 }
 0x289   : > { %5232 = vrot.lane.b32.xlu1 %v5231_v12, %s5344_s29  ;;  %v3189_v41 = vsel %vm3188_vm8, %v3180_v59, %v5119_v25  ;;  %v3160_v59 = vrot.slane %v7035_v53, 2  ;;  %s278_s29 = scalar_lea.vmem %s7421_s7, %s4363_s18 }
 0x28a   : > { %v3198_v42 = vsel %vm3197_vm9, %v3189_v41, %v5129_v24 }
 0x28c   : > { %5237 = vrot.lane.b32.xlu0 %v5236_v34, %s5345_s30 }
 0x28d   : > { %5242 = vrot.lane.b32.xlu1 %v5241_v4, %s5346_s8  ;;  %v5320_v4 = vld [vmem:[#allocation2 + $0x30] sm:$0xff] }
 0x2bf   : > { %v7055_v44 = vpop.permute.xlu0 %5122 }
 0x2c3   : > { %v5133_v48 = vpop.permute.xlu0 %5132 }
 0x2c4   : > { %v5135_v13 = vunpack.i.h.bf16 %v5133_v48  ;;  %v5134_v2 = vunpack.i.l.bf16 %v5133_v48 }
 0x2c5   : > { %v7057_v7 = vpop.permute.xlu1 %5137 }
 0x2c6   : > { %v3207_v9 = vsel %vm3206_vm10, %v3198_v42, %v5134_v2  ;;  %v3208_v36 = vsel %vm3206_vm10, %v3199_v26, %v5135_v13 }
 0x2c9   : > { %v5148_v40 = vpop.permute.xlu1 %5147  ;;  %v7061_v20 = vpop.permute.xlu0 %5142 }
 0x2ca   : > { %v5150_v60 = vunpack.i.h.bf16 %v5148_v40  ;;  %v5149_v17 = vunpack.i.l.bf16 %v5148_v40 }
 0x2cc   : > { %v3216_v31 = vsel %vm3215_vm11, %v3207_v9, %v5149_v17  ;;  %v3217_v5 = vsel %vm3215_vm11, %v3208_v36, %v5150_v60  ;;  %v3161_v60 = vrot.slane %v7037_v1, 2  ;;  %v5124_v1 = vunpack.i.l.bf16 %v7055_v44 }
 0x2cd   : > { %v5158_v55 = vpop.permute.xlu0 %5157 }
 0x2ce   : > { %v5160_v21 = vunpack.i.h.bf16 %v5158_v55  ;;  %v5159_v52 = vunpack.i.l.bf16 %v5158_v55  ;;  %v3162_v53 = vsel %vm559_vm0, %v3160_v59, %v3161_v60  ;;  %vm3710_vm0 = vcmask 1041408  }
 0x2d0   : > { %v3225_v51 = vsel %vm3224_vm12, %v3216_v31, %v5159_v52  ;;  %v3226_v39 = vsel %vm3224_vm12, %v3217_v5, %v5160_v21  ;;  %v5125_v31 = vunpack.i.h.bf16 %v7055_v44 }
 0x2d1   : > { %v3233_v16 = vpack.c.bf16 %v3226_v39, %v3225_v51  ;;  %v5168_v50 = vpop.permute.xlu0 %5167  ;;  %v5140_v39 = vunpack.i.h.bf16 %v7057_v7 }
 0x2d2   : > { %v5170_v27 = vunpack.i.h.bf16 %v5168_v50  ;;  %v5169_v28 = vunpack.i.l.bf16 %v5168_v50 }
 0x2d3   : > { %3406 = vmatmul.mubr.bf16.vlgmr.msra.gmra.mxu1 %v3233_v16  ;;  %v5139_v16 = vunpack.i.l.bf16 %v7057_v7 }
 0x2d4   : > { %4341 = vmatprep.mubr.msk.bf16.mxu1 %vm1881_vm13, %v3236_v14  ;;  %v7079_v45 = vpop.permute.xlu1 %5152 }
 0x2d5   : > { %v5178_v38 = vpop.permute.xlu0 %5177  ;;  %v5154_v7 = vunpack.i.l.bf16 %v7079_v45 }
 0x2d6   : > { %v5180_v13 = vunpack.i.h.bf16 %v5178_v38  ;;  %v5179_v2 = vunpack.i.l.bf16 %v5178_v38 }
 0x2d8   : > { %v5163_v12 = vpop.permute.xlu1 %5162 }
 0x2d9   : > { %v5165_v63 = vunpack.i.h.bf16 %v5163_v12  ;;  %v5164_v34 = vunpack.i.l.bf16 %v5163_v12  ;;  %v5183_v62 = vpop.permute.xlu0 %5182 }
 0x2da   : > { %v5185_v54 = vunpack.i.h.bf16 %v5183_v62  ;;  %v5184_v19 = vunpack.i.l.bf16 %v5183_v62 }
 0x2db   : > { %v3174_v35 = vsel %vm1881_vm13, %v5320_v4, %v5165_v63  ;;  %v3173_v61 = vsel %vm1881_vm13, %v6907_v29, %v5164_v34  ;;  %v5145_v63 = vunpack.i.h.bf16 %v7061_v20  ;;  %v5144_v34 = vunpack.i.l.bf16 %v7061_v20 }
 0x2dc   : > { %v5173_v56 = vpop.permute.xlu1 %5172  ;;  %v3182_v58 = vsel %vm3179_vm1, %v3173_v61, %v5169_v28  ;;  %v3183_v14 = vsel %vm3179_vm1, %v3174_v35, %v5170_v27 }
 0x2dd   : > { %v5175_v48 = vunpack.i.h.bf16 %v5173_v56  ;;  %v5174_v10 = vunpack.i.l.bf16 %v5173_v56  ;;  %v5198_v32 = vpop.permute.xlu0 %5197 }
 0x2de   : > { %v5200_v6 = vunpack.i.h.bf16 %v5198_v32  ;;  %v5199_v42 = vunpack.i.l.bf16 %v5198_v32 }
 0x2df   : > { %v3191_v49 = vsel %vm3188_vm8, %v3182_v58, %v5174_v10  ;;  %v3192_v46 = vsel %vm3188_vm8, %v3183_v14, %v5175_v48 }
 0x2e0   : > { %v5188_v43 = vpop.permute.xlu1 %5187  ;;  %v3200_v29 = vsel %vm3197_vm9, %v3191_v49, %v5184_v19  ;;  %v3201_v25 = vsel %vm3197_vm9, %v3192_v46, %v5185_v54  ;;  %v3176_v50 = vsel %vm1881_vm13, %v6820_v18, %v5200_v6  ;;  %v3175_v38 = vsel %vm1881_vm13, %v6849_v47, %v5199_v42 }
 0x2e1   : > { %v5190_v57 = vunpack.i.h.bf16 %v5188_v43  ;;  %v5189_v8 = vunpack.i.l.bf16 %v5188_v43  ;;  %v5155_v18 = vunpack.i.h.bf16 %v7079_v45  ;;  %v3240_v54 = vpack.c.bf16 %v3162_v53, %v7045_v3 }
 0x2e3   : > { %v3209_v24 = vsel %vm3206_vm10, %v3200_v29, %v5189_v8  ;;  %v3210_v40 = vsel %vm3206_vm10, %v3201_v25, %v5190_v57 }
 0x2e4   : > { %v5193_v15 = vpop.permute.xlu1 %5192  ;;  %v3218_v26 = vsel %vm3215_vm11, %v3209_v24, %v5179_v2  ;;  %v3219_v55 = vsel %vm3215_vm11, %v3210_v40, %v5180_v13 }
 0x2e5   : > { %v5195_v17 = vunpack.i.h.bf16 %v5193_v15  ;;  %v5194_v41 = vunpack.i.l.bf16 %v5193_v15 }
 0x2e7   : > { %v3227_v9 = vsel %vm3224_vm12, %v3218_v26, %v5194_v41  ;;  %v3228_v36 = vsel %vm3224_vm12, %v3219_v55, %v5195_v17  ;;  %v5203_v12 = vpop.permute.xlu0 %5202 }
 0x2e8   : > { %v5208_v21 = vpop.permute.xlu1 %5207  ;;  %v3235_v52 = vpack.c.bf16 %v3228_v36, %v3227_v9  ;;  %v5205_v27 = vunpack.i.h.bf16 %v5203_v12  ;;  %v5204_v20 = vunpack.i.l.bf16 %v5203_v12  ;;  %v5279_v12 = vld [vmem:[%s7419_s5 + $0x28] sm:$0xff]  }
 0x2e9   : > { %v5210_v5 = vunpack.i.h.bf16 %v5208_v21  ;;  %v5209_v51 = vunpack.i.l.bf16 %v5208_v21 }
 0x2ea   : > { %3416 = vmatmul.mubr.bf16.gmra.mxu1 %v3235_v52 }
 0x2eb   : > { %v3184_v44 = vsel %vm3179_vm1, %v3175_v38, %v5209_v51  ;;  %v3185_v4 = vsel %vm3179_vm1, %v3176_v50, %v5210_v5  ;;  %4342 = vmatprep.mubr.msk.bf16.mxu1 %vm1881_vm13, %v3238_v0  ;;  %v5218_v10 = vpop.permute.xlu0 %5217  ;;  %v5274_v51 = vld [vmem:[%s7419_s5 + $0x78] sm:$0xff]   ;;  %v5277_v50 = vld [vmem:[%s7419_s5 + $0x30] sm:$0xff]   ;;  %v5278_v38 = vld [vmem:[%s7419_s5 + $0x68] sm:$0xff]  }
 0x2ec   : > { %v3193_v47 = vsel %vm3188_vm8, %v3184_v44, %v5124_v1  ;;  %v3194_v35 = vsel %vm3188_vm8, %v3185_v4, %v5125_v31  ;;  %v5213_v61 = vpop.permute.xlu1 %5212  ;;  %v5220_v29 = vunpack.i.h.bf16 %v5218_v10  ;;  %v5219_v25 = vunpack.i.l.bf16 %v5218_v10  ;;  %4381 = vmatprep.subr.bf16.mxu0 %v5274_v51  ;;  %v5282_v44 = vld [vmem:[%s7419_s5 + $0x58] sm:$0xff]  }
 0x2ed   : > { %v3202_v28 = vsel %vm3197_vm9, %v3193_v47, %v5139_v16  ;;  %v3203_v56 = vsel %vm3197_vm9, %v3194_v35, %v5140_v39  ;;  %v5215_v62 = vunpack.i.h.bf16 %v5213_v61  ;;  %v5214_v48 = vunpack.i.l.bf16 %v5213_v61  ;;  %v5275_v39 = vld [vmem:[%s7419_s5 + $0x38] sm:$0xff]   ;;  %v5276_v16 = vld [vmem:[%s7419_s5 + $0x70] sm:$0xff]   ;;  %v5286_v47 = vld [vmem:[%s7419_s5 + $0x48] sm:$0xff]  }
 0x2ee   : > { %v3211_v22 = vsel %vm3206_vm10, %v3202_v28, %v5144_v34  ;;  %v3212_v23 = vsel %vm3206_vm10, %v3203_v56, %v5145_v63  ;;  %4382 = vmatpush3.bf16.msra.mxu0 %v5275_v39  ;;  %v5280_v63 = vld [vmem:[%s7419_s5 + $0x60] sm:$0xff]   ;;  %v5283_v4 = vld [vmem:[%s7419_s5 + $0x18] sm:$0xff]   ;;  %v5287_v35 = vld [vmem:[%s7419_s5 + $0x8] sm:$0xff]   ;;  %v3267_v28 = vsub.s32 1, %v6501_v30 }
 0x2ef   : > { %v3220_v0 = vsel %vm3215_vm11, %v3211_v22, %v5154_v7  ;;  %v3221_v45 = vsel %vm3215_vm11, %v3212_v23, %v5155_v18  ;;  %v3178_v19 = vsel %vm1881_vm13, %v6978_v37, %v5215_v62  ;;  %v3177_v43 = vsel %vm1881_vm13, %v6876_v11, %v5214_v48  ;;  %4383 = vmatprep.subr.bf16.mxu0 %v5276_v16  ;;  %v5281_v34 = vld [vmem:[%s7419_s5 + $0x20] sm:$0xff]   ;;  %v5284_v18 = vld [vmem:[%s7419_s5 + $0x50] sm:$0xff]  }
 0x2f0   : > { %v3229_v58 = vsel %vm3224_vm12, %v3220_v0, %v5204_v20  ;;  %v3230_v14 = vsel %vm3224_vm12, %v3221_v45, %v5205_v27  ;;  %v3186_v24 = vsel %vm3179_vm1, %v3177_v43, %v5219_v25  ;;  %v3187_v40 = vsel %vm3179_vm1, %v3178_v19, %v5220_v29  ;;  %v5285_v7 = vld [vmem:[%s7419_s5 + $0x10] sm:$0xff]   ;;  %v5288_v61 = vld [vmem:[%s7419_s5 + $0x40] sm:$0xff]  }
 0x2f1   : > { %v3237_v46 = vpack.c.bf16 %v3230_v14, %v3229_v58  ;;  %v5289_v27 = vld [vmem:[%s7419_s5] sm:$0xff]   ;;  %v3263_v20 = vsub.s32 0, %v6501_v30 }
 0x2f2   : > { %4384 = vmatpush3.bf16.msra.mxu0 %v5277_v50  ;;  %v3259_v56 = vld [vmem:[%s7418_s4] sm:$0x3] }
 0x2f3   : > { %3426 = vmatmul.mubr.bf16.gmra.mxu1 %v3237_v46  ;;  %4385 = vmatprep.subr.bf16.mxu0 %v5278_v38  ;;  %v7198_v48 = vrot.slane %v3259_v56, %v3263_v20  ;;  %v7200_v22 = vrot.slane %v3259_v56, %v3267_v28 }
 0x2f4   : > { %4343 = vmatprep.mubr.msk.bf16.mxu1 %vm1881_vm13, %v3240_v54 }
 0x2f6   : > { %4386 = vmatpush3.bf16.msra.mxu0 %v5279_v12 }
 0x2f7   : > { %v5223_v49 = vpop.permute.xlu1 %5222  ;;  %4387 = vmatprep.subr.bf16.mxu0 %v5280_v63 }
 0x2f8   : > { %v5225_v57 = vunpack.i.h.bf16 %v5223_v49  ;;  %v5224_v8 = vunpack.i.l.bf16 %v5223_v49 }
 0x2fa   : > { %v5228_v32 = vpop.permute.xlu0 %5227  ;;  %v3195_v37 = vsel %vm3188_vm8, %v3186_v24, %v5224_v8  ;;  %v3196_v2 = vsel %vm3188_vm8, %v3187_v40, %v5225_v57  ;;  %4388 = vmatpush3.bf16.msra.mxu0 %v5281_v34 }
 0x2fb   : > { %v5230_v59 = vunpack.i.h.bf16 %v5228_v32  ;;  %v5229_v3 = vunpack.i.l.bf16 %v5228_v32  ;;  %v5233_v13 = vpop.permute.xlu1 %5232  ;;  %4389 = vmatprep.subr.bf16.mxu0 %v5282_v44 }
 0x2fc   : > { %v5235_v11 = vunpack.i.h.bf16 %v5233_v13  ;;  %v5234_v15 = vunpack.i.l.bf16 %v5233_v13 }
 0x2fd   : > { %v3204_v60 = vsel %vm3197_vm9, %v3195_v37, %v5229_v3  ;;  %v3205_v17 = vsel %vm3197_vm9, %v3196_v2, %v5230_v59 }
 0x2fe   : > { %v5238_v41 = vpop.permute.xlu0 %5237  ;;  %v3213_v55 = vsel %vm3206_vm10, %v3204_v60, %v5234_v15  ;;  %v3214_v9 = vsel %vm3206_vm10, %v3205_v17, %v5235_v11  ;;  %4390 = vmatpush3.bf16.msra.mxu0 %v5283_v4 }
 0x2ff   : > { %v5240_v6 = vunpack.i.h.bf16 %v5238_v41  ;;  %v5239_v42 = vunpack.i.l.bf16 %v5238_v41  ;;  %v5243_v26 = vpop.permute.xlu1 %5242  ;;  %4391 = vmatprep.subr.bf16.mxu0 %v5284_v18 }
 0x300   : > { %v5245_v36 = vunpack.i.h.bf16 %v5243_v26  ;;  %v5244_v21 = vunpack.i.l.bf16 %v5243_v26 }
 0x301   : > { %v3222_v52 = vsel %vm3215_vm11, %v3213_v55, %v5239_v42  ;;  %v3223_v53 = vsel %vm3215_vm11, %v3214_v9, %v5240_v6 }
 0x302   : > { %v3231_v31 = vsel %vm3224_vm12, %v3222_v52, %v5244_v21  ;;  %v3232_v1 = vsel %vm3224_vm12, %v3223_v53, %v5245_v36  ;;  %4392 = vmatpush3.bf16.msra.mxu0 %v5285_v7 }
 0x303   : > { %v3239_v5 = vpack.c.bf16 %v3232_v1, %v3231_v31  ;;  %4393 = vmatprep.subr.bf16.mxu0 %v5286_v47 }
 0x305   : > { %3436 = vmatmul.mubr.bf16.gmra.mxu1 %v3239_v5 }
 0x306   : > { %4394 = vmatpush3.bf16.msra.mxu0 %v5287_v35 }
 0x307   : > { %4395 = vmatprep.subr.bf16.mxu0 %v5288_v61 }
 0x30a   : > { %4396 = vmatpush3.bf16.msra.mxu0 %v5289_v27 }
 0x393   : > { %v3407_v62 = vpop.f32.mrf.mxu1 }
 0x394   : > { %v3408_v45 = vadd.f32 %v3407_v62, %v7198_v48 }
 0x395   : > { %v3409_v23 = vpop.f32.mrf.mxu1 }
 0x396   : > { %v3410_v10 = vadd.f32 %v3409_v23, %v7200_v22  ;;  %v3446_v46 = vmax.f32 %v3408_v45, 0.0 }
 0x397   : > { %v3411_v0 = vpop.f32.mrf.mxu1 }
 0x398   : > { %v3412_v58 = vadd.f32 %v3411_v0, %v7198_v48  ;;  %v3447_v54 = vmax.f32 %v3410_v10, 0.0 }
 0x399   : > { %v3413_v14 = vpop.f32.mrf.mxu1 }
 0x39a   : > { %v3448_v49 = vmax.f32 %v3412_v58, 0.0  ;;  %v3414_v30 = vadd.f32 %v3413_v14, %v7200_v22 }
 0x39c   : > { %v3449_v19 = vmax.f32 %v3414_v30, 0.0  ;;  %v3462_v43 = vmax.f32 %v3446_v46, %v3448_v49 }
 0x39e   : > { %v3463_v57 = vmax.f32 %v3447_v54, %v3449_v19 }
 0x3a0   : > { %v3478_v8 = vcombine.low %v3462_v43, %v3463_v57  ;;  %v3479_v29 = vcombine.high %v3462_v43, %v3463_v57 }
 0x3a2   : > { %v3486_v25 = vrot.slane %v3478_v8, %v6515_v33  ;;  %v3493_v32 = vrot.slane %v3479_v29, %v6515_v33 }
 0x3a4   : > { %v3494_v24 = vcombine.high %v3486_v25, %v3486_v25  ;;  %v3495_v40 = vcombine.high %v3493_v32, %v3493_v32  ;;  %v3556_v59 = vrot.slane %v3486_v25, %v6515_v33  ;;  %v3572_v3 = vrot.slane %v3493_v32, %v6515_v33 }
 0x3a6   : > { %v3557_v13 = vcombine.high %v3556_v59, %v3556_v59  ;;  %v3564_v37 = vrot.slane %v3494_v24, %v6515_v33  ;;  %v3573_v2 = vcombine.high %v3572_v3, %v3572_v3  ;;  %v3580_v11 = vrot.slane %v3495_v40, %v6515_v33 }
 0x3a7   : > { %v3711_v15 = vsel %vm3710_vm0, %v3556_v59, -inf  ;;  %v3739_v60 = vsel %vm3710_vm0, %v3572_v3, -inf }
 0x3a8   : > { %v3565_v17 = vcombine.high %v3564_v37, %v3564_v37  ;;  %v3581_v41 = vcombine.high %v3580_v11, %v3580_v11  ;;  %v3712_v6 = vrot.slane %v3711_v15, 4  ;;  %v3718_v42 = vsel %vm3710_vm0, %v3557_v13, -inf }
 0x3a9   : > { %v3719_v26 = vrot.slane %v3718_v42, 4  ;;  %v3725_v55 = vsel %vm3710_vm0, %v3564_v37, -inf  ;;  %v3740_v9 = vrot.slane %v3739_v60, 4  ;;  %v3746_v36 = vsel %vm3710_vm0, %v3573_v2, -inf }
 0x3aa   : > { %v3713_v21 = vmax.f32 %v3711_v15, %v3712_v6  ;;  %v3726_v52 = vrot.slane %v3725_v55, 4  ;;  %v3732_v53 = vsel %vm3710_vm0, %v3565_v17, -inf  ;;  %v3747_v31 = vrot.slane %v3746_v36, 4  ;;  %v3417_v63 = vpop.f32.mrf.mxu1 }
 0x3ab   : > { %v3720_v1 = vmax.f32 %v3718_v42, %v3719_v26  ;;  %v3733_v5 = vrot.slane %v3732_v53, 4  ;;  %v3741_v51 = vmax.f32 %v3739_v60, %v3740_v9  ;;  %v3753_v39 = vsel %vm3710_vm0, %v3580_v11, -inf }
 0x3ac   : > { %v3714_v16 = vrot.slane %v3713_v21, 2  ;;  %v3727_v50 = vmax.f32 %v3725_v55, %v3726_v52  ;;  %v3748_v38 = vmax.f32 %v3746_v36, %v3747_v31  ;;  %v3754_v12 = vrot.slane %v3753_v39, 4  ;;  %v3419_v27 = vpop.f32.mrf.mxu1 }
 0x3ad   : > { %v3721_v34 = vrot.slane %v3720_v1, 2  ;;  %v3734_v44 = vmax.f32 %v3732_v53, %v3733_v5  ;;  %v3742_v4 = vrot.slane %v3741_v51, 2  ;;  %v3760_v18 = vsel %vm3710_vm0, %v3581_v41, -inf }
 0x3ae   : > { %v3715_v7 = vmax.f32 %v3713_v21, %v3714_v16  ;;  %v3728_v47 = vrot.slane %v3727_v50, 2  ;;  %v3749_v35 = vrot.slane %v3748_v38, 2  ;;  %v3755_v61 = vmax.f32 %v3753_v39, %v3754_v12  ;;  %v3421_v58 = vpop.f32.mrf.mxu1 }
 0x3af   : > { %v3722_v20 = vmax.f32 %v3720_v1, %v3721_v34  ;;  %v3735_v28 = vrot.slane %v3734_v44, 2  ;;  %v3743_v56 = vmax.f32 %v3741_v51, %v3742_v4  ;;  %v3761_v62 = vrot.slane %v3760_v18, 4 }
 0x3b0   : > { %v3716_v23 = vrot.slane %v3715_v7, 1  ;;  %v3729_v0 = vmax.f32 %v3727_v50, %v3728_v47  ;;  %v3750_v45 = vmax.f32 %v3748_v38, %v3749_v35  ;;  %v3756_v10 = vrot.slane %v3755_v61, 2  ;;  %v3423_v8 = vpop.f32.mrf.mxu1 }
 0x3b1   : > { %v3723_v14 = vrot.slane %v3722_v20, 1  ;;  %v3736_v49 = vmax.f32 %v3734_v44, %v3735_v28  ;;  %v3744_v30 = vrot.slane %v3743_v56, 1  ;;  %v3762_v46 = vmax.f32 %v3760_v18, %v3761_v62 }
 0x3b2   : > { %v3717_v54 = vmax.f32 %v3715_v7, %v3716_v23  ;;  %v3730_v19 = vrot.slane %v3729_v0, 1  ;;  %v3751_v43 = vrot.slane %v3750_v45, 1  ;;  %v3757_v57 = vmax.f32 %v3755_v61, %v3756_v10 }
 0x3b3   : > { %v3724_v29 = vmax.f32 %v3722_v20, %v3723_v14  ;;  %v3737_v25 = vrot.slane %v3736_v49, 1  ;;  %v3763_v32 = vrot.slane %v3762_v46, 2  ;;  %v3745_v40 = vmax.f32 %v3743_v56, %v3744_v30  ;;  %v3427_v13 = vpop.f32.mrf.mxu1 }
 0x3b4   : > { %v3731_v24 = vmax.f32 %v3729_v0, %v3730_v19  ;;  %v3758_v59 = vrot.slane %v3757_v57, 1  ;;  %v3752_v37 = vmax.f32 %v3750_v45, %v3751_v43  ;;  %v3935_v11 = vpack.c.bf16 %v3717_v54, %v3717_v54 }
 0x3b5   : > { %v3738_v3 = vmax.f32 %v3736_v49, %v3737_v25  ;;  %v3764_v2 = vmax.f32 %v3762_v46, %v3763_v32  ;;  %v3936_v60 = vpack.c.bf16 %v3724_v29, %v3724_v29  ;;  %v3429_v17 = vpop.f32.mrf.mxu1  ;;  %v3939_v42 = vpack.c.bf16 %v3745_v40, %v3745_v40 }
 0x3b6   : > { %v3937_v15 = vpack.c.bf16 %v3731_v24, %v3731_v24  ;;  %v3759_v41 = vmax.f32 %v3757_v57, %v3758_v59  ;;  %v3418_v26 = vadd.f32 %v3417_v63, %v7198_v48  ;;  %v3420_v9 = vadd.f32 %v3419_v27, %v7200_v22 }
 0x3b7   : > { %v3938_v6 = vpack.c.bf16 %v3738_v3, %v3738_v3  ;;  %v3422_v36 = vadd.f32 %v3421_v58, %v7198_v48  ;;  %v3424_v21 = vadd.f32 %v3423_v8, %v7200_v22  ;;  %v3431_v52 = vpop.f32.mrf.mxu1  ;;  %v3765_v53 = vrot.slane %v3764_v2, 1 }
 0x3b8   : > { %v4040_v55 = vunpack.c.l.b16 %v3937_v15  ;;  %v3940_v31 = vpack.c.bf16 %v3752_v37, %v3752_v37  ;;  %v4038_v1 = vunpack.c.l.b16 %v3935_v11  ;;  %v3428_v5 = vadd.f32 %v3427_v13, %v7198_v48 }
 0x3b9   : > { %v3450_v51 = vmax.f32 %v3418_v26, 0.0  ;;  %v3451_v39 = vmax.f32 %v3420_v9, 0.0  ;;  %v3452_v16 = vmax.f32 %v3422_v36, 0.0  ;;  %v3453_v50 = vmax.f32 %v3424_v21, 0.0  ;;  %v3433_v38 = vpop.f32.mrf.mxu1 }
 0x3ba   : > { %v3941_v12 = vpack.c.bf16 %v3759_v41, %v3759_v41  ;;  %v3430_v63 = vadd.f32 %v3429_v17, %v7200_v22  ;;  %v3432_v34 = vadd.f32 %v3431_v52, %v7198_v48  ;;  %v3434_v44 = vadd.f32 %v3433_v38, %v7200_v22 }
 0x3bb   : > { %v4041_v4 = vunpack.c.l.b16 %v3938_v6  ;;  %v4070_v18 = vsel %vm2815_vm15, %v4040_v55, %v4038_v1  ;;  %v3464_v7 = vmax.f32 %v3450_v51, %v3452_v16  ;;  %v3465_v47 = vmax.f32 %v3451_v39, %v3453_v50 }
 0x3bc   : > { %v3454_v35 = vmax.f32 %v3428_v5, 0.0  ;;  %v3455_v61 = vmax.f32 %v3430_v63, 0.0  ;;  %v3456_v27 = vmax.f32 %v3432_v34, 0.0  ;;  %v3457_v20 = vmax.f32 %v3434_v44, 0.0 }
 0x3bd   : > { %v4039_v28 = vunpack.c.l.b16 %v3936_v60  ;;  %v4042_v56 = vunpack.c.l.b16 %v3939_v42  ;;  %v3496_v62 = vcombine.low %v3464_v7, %v3465_v47  ;;  %v3497_v23 = vcombine.high %v3464_v7, %v3465_v47 }
 0x3be   : > { %v3466_v0 = vmax.f32 %v3454_v35, %v3456_v27  ;;  %v3467_v45 = vmax.f32 %v3455_v61, %v3457_v20  ;;  %v3766_v10 = vmax.f32 %v3764_v2, %v3765_v53  ;;  %v4043_v54 = vunpack.c.l.b16 %v3940_v31 }
 0x3bf   : > { %v4071_v58 = vsel %vm2817_vm2, %v4042_v56, %v4070_v18  ;;  %v3504_v14 = vrot.slane %v3496_v62, %v6515_v33  ;;  %v3511_v49 = vrot.slane %v3497_v23, %v6515_v33  ;;  %v4077_v46 = vsel %vm2815_vm15, %v4041_v4, %v4039_v28 }
 0x3c0   : > { %v4044_v19 = vunpack.c.l.b16 %v3941_v12  ;;  %v3514_v43 = vcombine.low %v3466_v0, %v3467_v45  ;;  %v3515_v57 = vcombine.high %v3466_v0, %v3467_v45  ;;  %v3942_v40 = vpack.c.bf16 %v3766_v10, %v3766_v10 }
 0x3c1   : > { %v3512_v8 = vcombine.high %v3504_v14, %v3504_v14  ;;  %v3513_v29 = vcombine.high %v3511_v49, %v3511_v49  ;;  %v3588_v25 = vrot.slane %v3504_v14, %v6515_v33  ;;  %v3604_v32 = vrot.slane %v3511_v49, %v6515_v33 }
 0x3c2   : > { %v7239_v59 = vsel %vm2817_vm2, %v4043_v54, %v4077_v46  ;;  %v7242_v3 = vsel %vm2819_vm3, %v4044_v19, %v4071_v58  ;;  %v3522_v17 = vrot.slane %v3514_v43, %v6515_v33  ;;  %v3529_v41 = vrot.slane %v3515_v57, %v6515_v33 }
 0x3c3   : > { %v3589_v13 = vcombine.high %v3588_v25, %v3588_v25  ;;  %v3596_v37 = vrot.slane %v3512_v8, %v6515_v33  ;;  %v3605_v2 = vcombine.high %v3604_v32, %v3604_v32  ;;  %v3612_v11 = vrot.slane %v3513_v29, %v6515_v33 }
 0x3c4   : > { %v3767_v15 = vsel %vm3710_vm0, %v3588_v25, -inf  ;;  %v3795_v60 = vsel %vm3710_vm0, %v3604_v32, -inf  ;;  %v7255_v34 = vunpack.c.l.b16 %v3942_v40  ;;  %v3530_v18 = vcombine.high %v3522_v17, %v3522_v17 }
 0x3c5   : > { %v3437_v30 = vpop.f32.mrf.mxu1  ;;  %v3597_v6 = vcombine.high %v3596_v37, %v3596_v37  ;;  %v3613_v42 = vcombine.high %v3612_v11, %v3612_v11  ;;  %v3768_v26 = vrot.slane %v3767_v15, 4  ;;  %v3774_v55 = vsel %vm3710_vm0, %v3589_v13, -inf }
 0x3c6   : > { %v7236_v24 = vadd.f32 %v3437_v30, %v7198_v48  ;;  %v3775_v9 = vrot.slane %v3774_v55, 4  ;;  %v3781_v36 = vsel %vm3710_vm0, %v3596_v37, -inf  ;;  %v3796_v21 = vrot.slane %v3795_v60, 4 }
 0x3c7   : > { %v3802_v52 = vsel %vm3710_vm0, %v3605_v2, -inf  ;;  %v3769_v53 = vmax.f32 %v3767_v15, %v3768_v26  ;;  %v3782_v31 = vrot.slane %v3781_v36, 4  ;;  %v3788_v1 = vsel %vm3710_vm0, %v3597_v6, -inf  ;;  %v3439_v58 = vpop.f32.mrf.mxu1 }
 0x3c8   : > { %v3803_v5 = vrot.slane %v3802_v52, 4  ;;  %v3776_v51 = vmax.f32 %v3774_v55, %v3775_v9  ;;  %v3789_v39 = vrot.slane %v3788_v1, 4  ;;  %v3797_v16 = vmax.f32 %v3795_v60, %v3796_v21 }
 0x3c9   : > { %v3809_v50 = vsel %vm3710_vm0, %v3612_v11, -inf  ;;  %v3770_v38 = vrot.slane %v3769_v53, 2  ;;  %v3783_v12 = vmax.f32 %v3781_v36, %v3782_v31  ;;  %v3458_v7 = vmax.f32 %v7236_v24, 0.0 }
 0x3ca   : > { %v3810_v63 = vrot.slane %v3809_v50, 4  ;;  %v3777_v44 = vrot.slane %v3776_v51, 2  ;;  %v3798_v4 = vrot.slane %v3797_v16, 2  ;;  %v3531_v27 = vcombine.high %v3529_v41, %v3529_v41 }
 0x3cb   : > { %v3771_v47 = vmax.f32 %v3769_v53, %v3770_v38  ;;  %v3784_v35 = vrot.slane %v3783_v12, 2  ;;  %v7258_v20 = vmax.f32 %v3788_v1, %v3789_v39  ;;  %v7260_v56 = vmax.f32 %v3802_v52, %v3803_v5 }
 0x3cc   : > { %v3811_v61 = vmax.f32 %v3809_v50, %v3810_v63  ;;  %v3799_v28 = vmax.f32 %v3797_v16, %v3798_v4  ;;  %v7263_v62 = vsel %vm3710_vm0, %v3613_v42, -inf  ;;  %v3620_v10 = vrot.slane %v3522_v17, %v6515_v33 }
 0x3cd   : > { %v3772_v23 = vrot.slane %v3771_v47, 1  ;;  %v3785_v0 = vmax.f32 %v3783_v12, %v3784_v35  ;;  %v7266_v14 = vmax.f32 %v3776_v51, %v3777_v44  ;;  %v3628_v30 = vrot.slane %v3530_v18, %v6515_v33 }
 0x3ce   : > { %v3812_v45 = vrot.slane %v3811_v61, 2  ;;  %v3800_v49 = vrot.slane %v3799_v28, 1  ;;  %v3636_v46 = vrot.slane %v3529_v41, %v6515_v33  ;;  %v3621_v57 = vcombine.high %v3620_v10, %v3620_v10 }
 0x3cf   : > { %v7270_v54 = vmax.f32 %v3771_v47, %v3772_v23  ;;  %v3786_v19 = vrot.slane %v3785_v0, 1  ;;  %v3805_v8 = vrot.slane %v7260_v56, 2  ;;  %v3629_v29 = vcombine.high %v3628_v30, %v3628_v30 }
 0x3d0   : > { %v7272_v43 = vmax.f32 %v3811_v61, %v3812_v45  ;;  %v3644_v25 = vrot.slane %v3531_v27, %v6515_v33  ;;  %v7277_v32 = vadd.f32 %v3439_v58, %v7200_v22  ;;  %v3791_v40 = vrot.slane %v7258_v20, 2 }
 0x3d1   : > { %v7280_v13 = vmax.f32 %v3799_v28, %v3800_v49  ;;  %v3817_v37 = vrot.slane %v7263_v62, 4  ;;  %v3823_v2 = vsel %vm3710_vm0, %v3620_v10, -inf  ;;  %v3779_v11 = vrot.slane %v7266_v14, 1 }
 0x3d2   : > { %v3637_v15 = vcombine.high %v3636_v46, %v3636_v46  ;;  %v3824_v60 = vrot.slane %v3823_v2, 4  ;;  %v3830_v17 = vsel %vm3710_vm0, %v3621_v57, -inf  ;;  %v7286_v41 = vmax.f32 %v3785_v0, %v3786_v19 }
 0x3d3   : > { %v3814_v6 = vrot.slane %v7272_v43, 1  ;;  %v3943_v42 = vpack.c.bf16 %v7270_v54, %v7270_v54  ;;  %v3831_v26 = vrot.slane %v3830_v17, 4  ;;  %v3645_v55 = vcombine.high %v3644_v25, %v3644_v25 }
 0x3d4   : > { %v3825_v9 = vmax.f32 %v3823_v2, %v3824_v60  ;;  %v3837_v36 = vsel %vm3710_vm0, %v3628_v30, -inf  ;;  %v3844_v21 = vsel %vm3710_vm0, %v3629_v29, -inf  ;;  %v3947_v52 = vpack.c.bf16 %v7280_v13, %v7280_v13  ;;  %v3441_v60 = vpop.f32.mrf.mxu1 }
 0x3d5   : > { %v3832_v53 = vmax.f32 %v3830_v17, %v3831_v26  ;;  %v3838_v31 = vrot.slane %v3837_v36, 4  ;;  %v3845_v1 = vrot.slane %v3844_v21, 4  ;;  %v3851_v51 = vsel %vm3710_vm0, %v3636_v46, -inf }
 0x3d6   : > { %v3826_v5 = vrot.slane %v3825_v9, 2  ;;  %v3858_v39 = vsel %vm3710_vm0, %v3637_v15, -inf  ;;  %v3865_v16 = vsel %vm3710_vm0, %v3644_v25, -inf  ;;  %v3852_v63 = vrot.slane %v3851_v51, 4 }
 0x3d7   : > { %v3833_v50 = vrot.slane %v3832_v53, 2  ;;  %v3839_v38 = vmax.f32 %v3837_v36, %v3838_v31  ;;  %v3846_v12 = vmax.f32 %v3844_v21, %v3845_v1  ;;  %v3859_v4 = vrot.slane %v3858_v39, 4 }
 0x3d8   : > { %v3827_v44 = vmax.f32 %v3825_v9, %v3826_v5  ;;  %v3866_v18 = vrot.slane %v3865_v16, 4  ;;  %v3872_v47 = vsel %vm3710_vm0, %v3645_v55, -inf  ;;  %v3853_v28 = vmax.f32 %v3851_v51, %v3852_v63  ;;  %v3443_v63 = vpop.f32.mrf.mxu1 }
 0x3d9   : > { %v3834_v35 = vmax.f32 %v3832_v53, %v3833_v50  ;;  %v3840_v61 = vrot.slane %v3839_v38, 2  ;;  %v3847_v27 = vrot.slane %v3846_v12, 2  ;;  %v3860_v0 = vmax.f32 %v3858_v39, %v3859_v4 }
 0x3da   : > { %v3828_v23 = vrot.slane %v3827_v44, 1  ;;  %v3867_v45 = vmax.f32 %v3865_v16, %v3866_v18  ;;  %v3873_v10 = vrot.slane %v3872_v47, 4  ;;  %v3854_v46 = vrot.slane %v3853_v28, 2 }
 0x3db   : > { %v3835_v58 = vrot.slane %v3834_v35, 1  ;;  %v3841_v49 = vmax.f32 %v3839_v38, %v3840_v61  ;;  %v3848_v30 = vmax.f32 %v3846_v12, %v3847_v27  ;;  %v3861_v19 = vrot.slane %v3860_v0, 2 }
 0x3dc   : > { %v3829_v54 = vmax.f32 %v3827_v44, %v3828_v23  ;;  %v3868_v57 = vrot.slane %v3867_v45, 2  ;;  %v3874_v29 = vmax.f32 %v3872_v47, %v3873_v10  ;;  %v3855_v15 = vmax.f32 %v3853_v28, %v3854_v46 }
 0x3dd   : > { %v3836_v25 = vmax.f32 %v3834_v35, %v3835_v58  ;;  %v3842_v13 = vrot.slane %v3841_v49, 1  ;;  %v3849_v2 = vrot.slane %v3848_v30, 1  ;;  %v3862_v17 = vmax.f32 %v3860_v0, %v3861_v19 }
 0x3de   : > { %v3869_v26 = vmax.f32 %v3867_v45, %v3868_v57  ;;  %v3875_v55 = vrot.slane %v3874_v29, 2  ;;  %v3951_v9 = vpack.c.bf16 %v3829_v54, %v3829_v54  ;;  %v3856_v53 = vrot.slane %v3855_v15, 1 }
 0x3df   : > { %v3843_v36 = vmax.f32 %v3841_v49, %v3842_v13  ;;  %v3850_v21 = vmax.f32 %v3848_v30, %v3849_v2  ;;  %v3952_v31 = vpack.c.bf16 %v3836_v25, %v3836_v25  ;;  %v7300_v1 = vmax.f32 %v7272_v43, %v3814_v6 }
 0x3e0   : > { %v3863_v5 = vrot.slane %v3862_v17, 1  ;;  %v3870_v51 = vrot.slane %v3869_v26, 1  ;;  %v3876_v39 = vmax.f32 %v3874_v29, %v3875_v55  ;;  %v3945_v16 = vpack.c.bf16 %v7286_v41, %v7286_v41 }
 0x3e1   : > { %v7304_v50 = vunpack.c.l.b16 %v3943_v42  ;;  %v3857_v38 = vmax.f32 %v3855_v15, %v3856_v53  ;;  %v3953_v12 = vpack.c.bf16 %v3843_v36, %v3843_v36  ;;  %v7306_v44 = vunpack.c.l.b16 %v3947_v52 }
 0x3e2   : > { %v3864_v4 = vmax.f32 %v3862_v17, %v3863_v5  ;;  %v3871_v18 = vmax.f32 %v3869_v26, %v3870_v51  ;;  %v3954_v47 = vpack.c.bf16 %v3850_v21, %v3850_v21  ;;  %v4054_v61 = vunpack.c.l.b16 %v3951_v9 }
 0x3e3   : > { %v3955_v35 = vpack.c.bf16 %v3857_v38, %v3857_v38  ;;  %v4055_v43 = vunpack.c.l.b16 %v3952_v31  ;;  %v3442_v6 = vadd.f32 %v3441_v60, %v7198_v48  ;;  %v3877_v27 = vrot.slane %v3876_v39, 1 }
 0x3e4   : > { %v3459_v28 = vmax.f32 %v7277_v32, 0.0  ;;  %v3444_v41 = vadd.f32 %v3443_v63, %v7200_v22  ;;  %v3780_v42 = vmax.f32 %v7266_v14, %v3779_v11  ;;  %v3956_v23 = vpack.c.bf16 %v3864_v4, %v3864_v4 }
 0x3e5   : > { %v4056_v52 = vunpack.c.l.b16 %v3953_v12  ;;  %v3460_v0 = vmax.f32 %v3442_v6, 0.0  ;;  %v3792_v45 = vmax.f32 %v7258_v20, %v3791_v40  ;;  %v3957_v10 = vpack.c.bf16 %v3871_v18, %v3871_v18 }
 0x3e6   : > { %v4057_v58 = vunpack.c.l.b16 %v3954_v47  ;;  %v3461_v49 = vmax.f32 %v3444_v41, 0.0  ;;  %v3806_v48 = vmax.f32 %v7260_v56, %v3805_v8  ;;  %v4058_v32 = vunpack.c.l.b16 %v3955_v35 }
 0x3e7   : > { %v3468_v22 = vmax.f32 %v3458_v7, %v3460_v0  ;;  %v3793_v30 = vrot.slane %v3792_v45, 1  ;;  %v3818_v14 = vmax.f32 %v7263_v62, %v3817_v37  ;;  %v3878_v54 = vmax.f32 %v3876_v39, %v3877_v27 }
 0x3e8   : > { %v3469_v11 = vmax.f32 %v3459_v28, %v3461_v49  ;;  %v3807_v46 = vrot.slane %v3806_v48, 1  ;;  %v3944_v20 = vpack.c.bf16 %v3780_v42, %v3780_v42  ;;  %v4059_v40 = vunpack.c.l.b16 %v3956_v23 }
 0x3e9   : > { %v4084_v19 = vsel %vm2815_vm15, %v4056_v52, %v4054_v61  ;;  %v3794_v57 = vmax.f32 %v3792_v45, %v3793_v30  ;;  %v3819_v29 = vrot.slane %v3818_v14, 2  ;;  %v4091_v24 = vsel %vm2815_vm15, %v4057_v58, %v4055_v43 }
 0x3ea   : > { %v3532_v25 = vcombine.low %v3468_v22, %v3469_v11  ;;  %v3533_v56 = vcombine.high %v3468_v22, %v3469_v11  ;;  %v7326_v8 = vmax.f32 %v3806_v48, %v3807_v46  ;;  %v3958_v2 = vpack.c.bf16 %v3878_v54, %v3878_v54 }
 0x3eb   : > { %v3820_v7 = vmax.f32 %v3818_v14, %v3819_v29  ;;  %v3946_v13 = vpack.c.bf16 %v3794_v57, %v3794_v57  ;;  %v4047_v15 = vunpack.c.l.b16 %v3944_v20  ;;  %v7329_v62 = vunpack.c.l.b16 %v3945_v16 }
 0x3ec   : > { %v7331_v37 = vunpack.c.l.b16 %v3957_v10  ;;  %v3540_v60 = vrot.slane %v3532_v25, %v6515_v33  ;;  %v3547_v17 = vrot.slane %v3533_v56, %v6515_v33  ;;  %v7336_v26 = vsel %vm2817_vm2, %v4058_v32, %v4084_v19 }
 0x3ed   : > { %v3821_v55 = vrot.slane %v3820_v7, 1  ;;  %v4079_v9 = vsel %vm2819_vm3, %v7255_v34, %v7239_v59  ;;  %v7342_v36 = vsel %vm2817_vm2, %v4059_v40, %v4091_v24  ;;  %v3948_v51 = vpack.c.bf16 %v7326_v8, %v7326_v8 }
 0x3ee   : > { %v3548_v21 = vcombine.high %v3540_v60, %v3540_v60  ;;  %v3549_v53 = vcombine.high %v3547_v17, %v3547_v17  ;;  %v3652_v31 = vrot.slane %v3540_v60, %v6515_v33  ;;  %v3668_v5 = vrot.slane %v3547_v17, %v6515_v33 }
 0x3ef   : > { %v7348_v39 = vunpack.c.l.b16 %v3946_v13  ;;  %v7350_v16 = vunpack.c.l.b16 %v3958_v2  ;;  %v7353_v38 = vsel %vm2821_vm4, %v4047_v15, %v4079_v9  ;;  %v7359_v47 = vmax.f32 %v3820_v7, %v3821_v55 }
 0x3f0   : > { %v3653_v59 = vcombine.high %v3652_v31, %v3652_v31  ;;  %v3660_v34 = vrot.slane %v3548_v21, %v6515_v33  ;;  %v3669_v12 = vcombine.high %v3668_v5, %v3668_v5  ;;  %v3676_v63 = vrot.slane %v3549_v53, %v6515_v33 }
 0x3f1   : > { %v3879_v4 = vsel %vm3710_vm0, %v3652_v31, -inf  ;;  %v3907_v18 = vsel %vm3710_vm0, %v3668_v5, -inf  ;;  %v3949_v35 = vpack.c.bf16 %v7300_v1, %v7300_v1  ;;  %v3950_v8 = vpack.c.bf16 %v7359_v47, %v7359_v47 }
 0x3f2   : > { %v3661_v61 = vcombine.high %v3660_v34, %v3660_v34  ;;  %v3677_v43 = vcombine.high %v3676_v63, %v3676_v63  ;;  %v3880_v6 = vrot.slane %v3879_v4, 4  ;;  %v3886_v27 = vsel %vm3710_vm0, %v3653_v59, -inf }
 0x3f3   : > { %v3887_v28 = vrot.slane %v3886_v27, 4  ;;  %v3893_v41 = vsel %vm3710_vm0, %v3660_v34, -inf  ;;  %v3908_v42 = vrot.slane %v3907_v18, 4  ;;  %v3914_v33 = vsel %vm3710_vm0, %v3669_v12, -inf }
 0x3f4   : > { %v3881_v23 = vmax.f32 %v3879_v4, %v3880_v6  ;;  %v3894_v52 = vrot.slane %v3893_v41, 4  ;;  %v3900_v0 = vsel %vm3710_vm0, %v3661_v61, -inf  ;;  %v3915_v45 = vrot.slane %v3914_v33, 4 }
 0x3f5   : > { %v3888_v10 = vmax.f32 %v3886_v27, %v3887_v28  ;;  %v3901_v58 = vrot.slane %v3900_v0, 4  ;;  %v3909_v49 = vmax.f32 %v3907_v18, %v3908_v42  ;;  %v3921_v48 = vsel %vm3710_vm0, %v3676_v63, -inf }
 0x3f6   : > { %v3882_v32 = vrot.slane %v3881_v23, 2  ;;  %v3895_v22 = vmax.f32 %v3893_v41, %v3894_v52  ;;  %v3916_v30 = vmax.f32 %v3914_v33, %v3915_v45  ;;  %v3922_v14 = vrot.slane %v3921_v48, 4 }
 0x3f7   : > { %v3889_v11 = vrot.slane %v3888_v10, 2  ;;  %v3902_v46 = vmax.f32 %v3900_v0, %v3901_v58  ;;  %v3910_v54 = vrot.slane %v3909_v49, 2  ;;  %v3928_v20 = vsel %vm3710_vm0, %v3677_v43, -inf }
 0x3f8   : > { %v3883_v40 = vmax.f32 %v3881_v23, %v3882_v32  ;;  %v3896_v19 = vrot.slane %v3895_v22, 2  ;;  %v3917_v57 = vrot.slane %v3916_v30, 2  ;;  %v3923_v29 = vmax.f32 %v3921_v48, %v3922_v14 }
 0x3f9   : > { %v3890_v25 = vmax.f32 %v3888_v10, %v3889_v11  ;;  %v3903_v56 = vrot.slane %v3902_v46, 2  ;;  %v3911_v24 = vmax.f32 %v3909_v49, %v3910_v54  ;;  %v3929_v7 = vrot.slane %v3928_v20, 4 }
 0x3fa   : > { %v3884_v13 = vrot.slane %v3883_v40, 1  ;;  %v3897_v2 = vmax.f32 %v3895_v22, %v3896_v19  ;;  %v3924_v15 = vrot.slane %v3923_v29, 2  ;;  %v3918_v60 = vmax.f32 %v3916_v30, %v3917_v57 }
 0x3fb   : > { %v3891_v17 = vrot.slane %v3890_v25, 1  ;;  %v3912_v55 = vrot.slane %v3911_v24, 1  ;;  %v3904_v9 = vmax.f32 %v3902_v46, %v3903_v56  ;;  %v3930_v21 = vmax.f32 %v3928_v20, %v3929_v7 }
 0x3fc   : > { %v3885_v53 = vmax.f32 %v3883_v40, %v3884_v13  ;;  %v3898_v31 = vrot.slane %v3897_v2, 1  ;;  %v3925_v5 = vmax.f32 %v3923_v29, %v3924_v15  ;;  %v3919_v59 = vrot.slane %v3918_v60, 1 }
 0x3fd   : > { %v3913_v34 = vmax.f32 %v3911_v24, %v3912_v55  ;;  %v3892_v12 = vmax.f32 %v3890_v25, %v3891_v17  ;;  %v3905_v63 = vrot.slane %v3904_v9, 1  ;;  %v3931_v4 = vrot.slane %v3930_v21, 2 }
 0x3fe   : > { %v3899_v18 = vmax.f32 %v3897_v2, %v3898_v31  ;;  %v3926_v61 = vrot.slane %v3925_v5, 1  ;;  %v3959_v43 = vpack.c.bf16 %v3885_v53, %v3885_v53  ;;  %v3920_v6 = vmax.f32 %v3918_v60, %v3919_v59 }
 0x3ff   : > { %v3963_v27 = vpack.c.bf16 %v3913_v34, %v3913_v34  ;;  %v3906_v28 = vmax.f32 %v3904_v9, %v3905_v63  ;;  %v3932_v41 = vmax.f32 %v3930_v21, %v3931_v4  ;;  %v3960_v42 = vpack.c.bf16 %v3892_v12, %v3892_v12 }
 0x400   : > { %v3927_v33 = vmax.f32 %v3925_v5, %v3926_v61  ;;  %v3961_v23 = vpack.c.bf16 %v3899_v18, %v3899_v18  ;;  %v3964_v52 = vpack.c.bf16 %v3920_v6, %v3920_v6  ;;  %v4051_v0 = vunpack.c.l.b16 %v3948_v51 }
 0x401   : > { %v4062_v45 = vunpack.c.l.b16 %v3959_v43  ;;  %v3933_v10 = vrot.slane %v3932_v41, 1  ;;  %v3962_v58 = vpack.c.bf16 %v3906_v28, %v3906_v28  ;;  %v4081_v49 = vsel %vm2823_vm5, %v7348_v39, %v7353_v38 }
 0x402   : > { %v4064_v48 = vunpack.c.l.b16 %v3961_v23  ;;  %v4063_v32 = vunpack.c.l.b16 %v3960_v42  ;;  %v4093_v22 = vsel %vm2819_vm3, %v7350_v16, %v7342_v36  ;;  %v3965_v30 = vpack.c.bf16 %v3927_v33, %v3927_v33 }
 0x403   : > { %v4066_v14 = vunpack.c.l.b16 %v3963_v27  ;;  %v3934_v11 = vmax.f32 %v3932_v41, %v3933_v10  ;;  %v4065_v51 = vunpack.c.l.b16 %v3962_v58  ;;  %v4067_v46 = vunpack.c.l.b16 %v3964_v52 }
 0x404   : > { %v4094_v54 = vsel %vm2821_vm4, %v4063_v32, %v4093_v22  ;;  %v4073_v39 = vsel %vm2821_vm4, %v7304_v50, %v7242_v3  ;;  %v4086_v38 = vsel %vm2819_vm3, %v7331_v37, %v7336_v26  ;;  %v4082_v40 = vsel %vm2825_vm6, %v4051_v0, %v4081_v49 }
 0x405   : > { %v3966_v20 = vpack.c.bf16 %v3934_v11, %v3934_v11  ;;  %v4095_v36 = vsel %vm2823_vm5, %v4065_v51, %v4094_v54  ;;  %v4074_v16 = vsel %vm2823_vm5, %v7329_v62, %v4073_v39  ;;  %v4087_v47 = vsel %vm2821_vm4, %v4062_v45, %v4086_v38 }
 0x406   : > { %v4096_v19 = vsel %vm2825_vm6, %v4067_v46, %v4095_v36  ;;  %v4068_v57 = vunpack.c.l.b16 %v3965_v30  ;;  %v4088_v3 = vsel %vm2823_vm5, %v4064_v48, %v4087_v47  ;;  %v4053_v50 = vunpack.c.l.b16 %v3950_v8 }
 0x407   : > { %v4069_v29 = vunpack.c.l.b16 %v3966_v20  ;;  %v4075_v37 = vsel %vm2825_vm6, %v7306_v44, %v4074_v16  ;;  %v4089_v26 = vsel %vm2825_vm6, %v4066_v14, %v4088_v3  ;;  %v4052_v62 = vunpack.c.l.b16 %v3949_v35  ;;  %v4344_v44 = vld [vmem:[%s7420_s6] ss:$0 sm:$0xff] }
 0x408   : > { %v4090_v25 = vsel %vm2827_vm7, %v4068_v57, %v4089_v26  ;;  %v4083_v56 = vsel %vm2827_vm7, %v4053_v50, %v4082_v40 }
 0x409   : > { %v4097_v24 = vsel %vm2827_vm7, %v4069_v29, %v4096_v19  ;;  %v4076_v13 = vsel %vm2827_vm7, %v4052_v62, %v4075_v37 }
 0x40a   : > { %v4099_v7 = vpack.c.b16 %v4097_v24, %v4083_v56  ;;  %v4098_v2 = vpack.c.b16 %v4090_v25, %v4076_v13 }
 0x40c   : > { %4230 = vmatprep.mubr.bf16.mxu0 %v4099_v7 }
 0x40d   : > { %4231 = vmatmul.mubr.bf16.vlgmr.msra.gmra.mxu0 %v4098_v2 }
 0x4cd   : > { %v4397_v15 = vpop.f32.mrf.mxu0 }
 0x4cf   : > { %v4398_v1 = vpop.f32.mrf.mxu0 }
 0x4d0   : > { %v4399_v35 = vadd.f32 %v4398_v1, %v4397_v15 }
 0x4d1   : > { %v4400_v60 = vpop.f32.mrf.mxu0 }
 0x4d2   : > { %v4233_v17 = vadd.f32 %v4399_v35, %v4344_v44 }
 0x4d3   : > { %v4401_v55 = vpop.f32.mrf.mxu0 }
 0x4d4   : > { %4239 = vst [vmem:[%s278_s29] sm:$0xff] %v4233_v17  ;;  %v4402_v9 = vadd.f32 %v4401_v55, %v4400_v60 }
 0x4d6   : > { %v4236_v21 = vadd.f32 %v4402_v9, %v4344_v44 }
 0x4d8   : > { %4240 = vst [vmem:[%s278_s29 + $0x8] sm:$0xff] %v4236_v21 }
 0x4d9 PF: > { %s17_s24 = sadd.s32 1, %s5327_s24  }
 0x4da   : > { %p14_p4 = scmp.ge.s32.totalorder %s17_s24, 4  }
 0x4dc   :  { %16 = sbr.rel (!%p14_p4) target bundleno = 1 (0x1), region = 79 }

</bundles_post_ra>
